<compile_context>
chip_gen: v7x
topology: tpu7x:2x2x1
jax: 0.10.0
libtpu: 0.0.40
codegen_flags: <defaults>
</compile_context>

<pallas_src>
import functools

import jax
import jax.numpy as jnp
from jax.experimental import pallas as pl
from jax.experimental.pallas import tpu as pltpu


def _round_up(x, m):
    return (x + m - 1) // m * m


# ----------------------------- Pallas kernel --------------------------------
def lstm_fc_kernel(x_ref,                       # (T, TB, D_in)   time-major, batch-tiled
                   w0x_ref, w0h_ref, b0_ref,    # (D_in,4Hp) (Hp,4Hp) (1,4Hp)  [i|f|o|g], lane-padded
                   w1x_ref, w1h_ref, b1_ref,    # (Hp,4Hp) (Hp,4Hp) (1,4Hp)
                   wfc_ref, bfc_ref,            # (Hp, Cp) (1, Cp)
                   out_ref):                    # (TB, Cp)
    T, TB, D_in = x_ref.shape
    Hp = w0h_ref.shape[0]
    G = 4 * Hp

    w0h = w0h_ref[...]
    w1x = w1x_ref[...]
    w1h = w1h_ref[...]
    # Hoist the (1,4Hp)->(TB,4Hp) bias broadcast out of the recurrence
    # (JAX does not CSE broadcast_in_dim).
    b1 = jnp.broadcast_to(b1_ref[...], (TB, G))

    # ---- hoisted layer-0 input projection: ONE MXU matmul, staged TIME-MAJOR ----
    # Row block [t*TB, (t+1)*TB) is timestep t, so the per-step read below is a
    # contiguous, sublane-aligned slab (tile-aligned vector loads, no XLU gather).
    # The (T, TB, D) -> (T*TB, D) merge is free because TB % 8 == 0.
    x_flat = x_ref[...].reshape(T * TB, D_in)
    xp = (jnp.dot(x_flat, w0x_ref[...], preferred_element_type=jnp.float32)
          + b0_ref[...])                        # (T*TB, 4Hp) f32, VMEM-resident

    def gates_to_hc(gates, c):
        # gate layout [i | f | o | g], each gate zero-padded to its own Hp-wide
        # (128-lane-aligned) slot: one sigmoid over a contiguous 3*Hp block plus
        # one tanh (2 EUP pushes), and every slice below is lane-tile aligned
        # so the elementwise combines need no lane-alignment rolls.
        sig = jax.nn.sigmoid(gates[:, :3 * Hp])
        g = jnp.tanh(gates[:, 3 * Hp:])
        i, f, o = sig[:, :Hp], sig[:, Hp:2 * Hp], sig[:, 2 * Hp:]
        c_new = f * c + i * g
        return o * jnp.tanh(c_new), c_new

    h0 = c0 = h1 = c1 = jnp.zeros((TB, Hp), jnp.float32)
    # Fully unrolled time loop (T is small & static): all slices are static and
    # the whole recurrence is visible to the scheduler.
    # TODO(synk): for long sequences (T >~ 32) switch to lax.fori_loop(unroll=2..4)
    # with xp parked in a VMEM scratch to keep vreg live ranges bounded.
    for t in range(T):
        xp_t = xp[t * TB:(t + 1) * TB]
        # layer 0: only the recurrent matmul remains on the serial chain.
        g0 = jnp.dot(h0.astype(w0h.dtype), w0h,
                     preferred_element_type=jnp.float32) + xp_t
        h0, c0 = gates_to_hc(g0, c0)
        # layer 1: two un-fused MXU pushes instead of a lane-direction concat;
        # MXU has slack here, the concat's XLU shifts/extra vreg copy did not.
        g1 = (jnp.dot(h0.astype(w1x.dtype), w1x,
                      preferred_element_type=jnp.float32)
              + jnp.dot(h1.astype(w1h.dtype), w1h,
                        preferred_element_type=jnp.float32)
              + b1)
        h1, c1 = gates_to_hc(g1, c1)

    # fc head on the last timestep of the top layer; Cp is a multiple of 128 so the
    # single output store is lane-dense (wrapper slices back to C).
    out_ref[...] = (jnp.dot(h1.astype(wfc_ref.dtype), wfc_ref[...],
                            preferred_element_type=jnp.float32) + bfc_ref[...])


# ------------------------------- wrapper -------------------------------------
def _prep_gates(w, H, Hp):
    """PyTorch gate order (K, 4H) [i|f|g|o] -> kernel (K, 4*Hp) [i|f|o|g], each
    gate zero-padded to its own Hp-wide, 128-lane-aligned slot."""
    i, f, g, o = (w[..., k * H:(k + 1) * H] for k in range(4))
    pad = [(0, 0)] * (w.ndim - 1) + [(0, Hp - H)]
    return jnp.concatenate([jnp.pad(blk, pad) for blk in (i, f, o, g)], axis=-1)


def _pad_rows(w, rows):
    return jnp.pad(w, ((0, rows - w.shape[0]), (0, 0)))


def _pick_batch_tile(B, Hp):
    """Batch tile TB: stay inside the 64-vreg file, keep padding small, and keep
    >= 2 grid steps whenever the batch can be split (so v7x's 2 TCs both work)."""
    B8 = _round_up(max(B, 1), 8)
    # vreg budget: per 8 batch rows, h0/c0/h1/c1 + gates + xp[t] are ~12*(Hp/128)
    # f32 vregs; keep the live set around ~48 of the 64 vregs (spill vld/vst sit
    # on the recurrence's serial chain, so avoid them outright).
    vregs_per_group = 12 * (Hp // 128)
    tb_cap = min(64, 8 * max(1, 48 // vregs_per_group))
    if B8 >= 16:  # guarantee grid >= 2 so "parallel" can shard across two TCs (v7x)
        tb_cap = min(tb_cap, _round_up((B8 + 1) // 2, 8))
    cands = [tb for tb in (8, 16, 32, 64) if tb <= tb_cap] or [8]
    # divisor-aware choice: minimize padded batch, tie-break to the larger tile
    TB = min(cands, key=lambda tb: (_round_up(B8, tb), -tb))
    return TB, _round_up(B8, TB)


@functools.partial(jax.jit, static_argnames=("weight_dtype",))
def rnn_forward(x, params, weight_dtype=jnp.float32):
    """x: (B, T, D_in) float32.  Returns (B, num_classes) float32.

    weight_dtype=jnp.bfloat16 is recommended on v5e, v6e and v7x alike: it only
    affects the MXU operands (x and the weight matrices, halving their DMA bytes
    and MXU operand width); gates, carries and accumulation stay f32 via
    preferred_element_type, so no bf16 ever reaches the VPU/EUP.
    """
    B, T, D_in = x.shape
    H = params["whh0"].shape[0]
    C = params["wfc"].shape[1]
    Hp = _round_up(H, 128)          # each gate/hidden slot gets its own 128-lane tile
    G = 4 * Hp
    Cp = _round_up(C, 128)          # lane-dense final store

    # ---- parameter prep: gate permute + lane pad, row pad to Hp, dtype cast ----
    w0x = _prep_gates(params["wih0"], H, Hp).astype(weight_dtype)                 # (D_in, 4Hp)
    w0h = _pad_rows(_prep_gates(params["whh0"], H, Hp), Hp).astype(weight_dtype)  # (Hp, 4Hp)
    b0 = _prep_gates(params["b0"], H, Hp)                                         # (1, 4Hp) f32
    w1x = _pad_rows(_prep_gates(params["wih1"], H, Hp), Hp).astype(weight_dtype)  # (Hp, 4Hp)
    w1h = _pad_rows(_prep_gates(params["whh1"], H, Hp), Hp).astype(weight_dtype)  # (Hp, 4Hp)
    b1 = _prep_gates(params["b1"], H, Hp)                                         # (1, 4Hp) f32
    wfc = jnp.pad(params["wfc"], ((0, Hp - H), (0, Cp - C))).astype(weight_dtype) # (Hp, Cp)
    bfc = jnp.pad(params["bfc"], ((0, 0), (0, Cp - C)))                           # (1, Cp) f32

    # ---- batch tiling + one-time time-major staging of x ----
    TB, B_pad = _pick_batch_tile(B, Hp)
    xk = jnp.transpose(x.astype(weight_dtype), (1, 0, 2))     # (T, B, D_in), off the recurrence
    if B_pad != B:
        xk = jnp.pad(xk, ((0, 0), (0, B_pad - B), (0, 0)))

    grid = (B_pad // TB,)

    def wspec(shape):
        # whole-array block at a constant block index -> stays VMEM-resident.
        # TODO(synk): mark these pipeline_mode=pl.Buffered(1) (single-buffer the
        # never-changing weights) when H is large enough for double-buffering to
        # matter on v7x's 64 MiB VMEM; negligible at these sizes.
        zeros = (0,) * len(shape)
        return pl.BlockSpec(shape, lambda b, _z=zeros: _z)

    out = pl.pallas_call(
        lstm_fc_kernel,
        out_shape=jax.ShapeDtypeStruct((B_pad, Cp), jnp.float32),
        grid=grid,
        in_specs=[
            pl.BlockSpec((T, TB, D_in), lambda b: (0, b, 0)),   # x: time-major, batch-tiled
            wspec((D_in, G)), wspec((Hp, G)), wspec((1, G)),    # layer-0 weights
            wspec((Hp, G)), wspec((Hp, G)), wspec((1, G)),      # layer-1 weights (un-fused)
            wspec((Hp, Cp)), wspec((1, Cp)),                    # fc head
        ],
        out_specs=pl.BlockSpec((TB, Cp), lambda b: (b, 0)),
        compiler_params=pltpu.CompilerParams(
            dimension_semantics=("parallel",),                  # shards batch over v7x's 2 TCs
            vmem_limit_bytes=32 * 1024 * 1024,                  # explicit; safe on v5e..v7x
        ),
    )(xk, w0x, w0h, b0, w1x, w1h, b1, wfc, bfc)
    return out[:B, :C]


# ------------------------- parameter construction ----------------------------
def init_params(key, input_size, hidden_size, num_classes):
    """PyTorch-style uniform(-1/sqrt(H), 1/sqrt(H)) init, deterministic.

    Weights are stored transposed vs. PyTorch (row-major (K, N) matmuls), in
    PyTorch gate order [i|f|g|o]:
      wih*: (in, 4H), whh*: (H, 4H), b*: (1, 4H) = b_ih + b_hh, wfc: (H, C), bfc: (1, C)
    """
    H = hidden_size
    bound = 1.0 / jnp.sqrt(jnp.float32(H))
    keys = jax.random.split(key, 10)

    def u(k, shape):
        return jax.random.uniform(k, shape, jnp.float32, -bound, bound)

    return {
        # layer 0: input -> hidden
        "wih0": u(keys[0], (input_size, 4 * H)),
        "whh0": u(keys[1], (H, 4 * H)),
        "b0":   (u(keys[2], (1, 4 * H)) + u(keys[3], (1, 4 * H))),
        # layer 1: hidden -> hidden
        "wih1": u(keys[4], (H, 4 * H)),
        "whh1": u(keys[5], (H, 4 * H)),
        "b1":   (u(keys[6], (1, 4 * H)) + u(keys[7], (1, 4 * H))),
        # fc head (see TODO(synk) at top about in_features)
        "wfc":  u(keys[8], (H, num_classes)),
        "bfc":  u(keys[9], (1, num_classes)),
    }


# ---------------------------- pure-JAX reference ------------------------------
def rnn_forward_ref(x, params):
    B, T, D_in = x.shape
    H = params["whh0"].shape[0]

    def cell(x_t, h, c, wih, whh, b):
        gates = x_t @ wih + h @ whh + b            # PyTorch gate order [i|f|g|o]
        i = jax.nn.sigmoid(gates[:, 0 * H:1 * H])
        f = jax.nn.sigmoid(gates[:, 1 * H:2 * H])
        g = jnp.tanh(gates[:, 2 * H:3 * H])
        o = jax.nn.sigmoid(gates[:, 3 * H:4 * H])
        c_new = f * c + i * g
        return o * jnp.tanh(c_new), c_new

    h0 = c0 = h1 = c1 = jnp.zeros((B, H), jnp.float32)
    for t in range(T):
        x_t = x[:, t, :]
        h0, c0 = cell(x_t, h0, c0, params["wih0"], params["whh0"], params["b0"])
        h1, c1 = cell(h0, h1, c1, params["wih1"], params["whh1"], params["b1"])
    return h1 @ params["wfc"] + params["bfc"]


# ---------------------------------- main --------------------------------------
if __name__ == "__main__":
    # small, forward-consistent shapes: x is (batch, seq, input_size)
    batch, seq_len, input_size = 2, 8, 28
    hidden_size, num_classes = 32, 10

    key = jax.random.PRNGKey(0)
    kx, kp = jax.random.split(key)
    x = jax.random.normal(kx, (batch, seq_len, input_size), jnp.float32)
    params = init_params(kp, input_size, hidden_size, num_classes)

    # f32 path (strict check)
    out = jax.block_until_ready(rnn_forward(x, params))
    ref = rnn_forward_ref(x, params)
    assert out.shape == (batch, num_classes)
    assert jnp.allclose(out, ref, atol=1e-4, rtol=1e-4), "f32 path mismatch vs reference"

    # bf16 MXU-operand path (recommended on v5e/v6e/v7x), looser tolerance
    out_bf16 = jax.block_until_ready(rnn_forward(x, params, weight_dtype=jnp.bfloat16))
    assert out_bf16.shape == (batch, num_classes)
    assert jnp.allclose(out_bf16, ref, atol=5e-2, rtol=5e-2), "bf16 path mismatch vs reference"

    print("KERNEL_OK")
</pallas_src>

<mosaic_0001>
module attributes {stable_mosaic.version = 11 : i64} {
  func.func @lstm_fc_kernel(%arg0: i32, %arg1: memref<8x8x28xf32, #tpu.memory_space<vmem>>, %arg2: memref<28x512xf32, #tpu.memory_space<vmem>>, %arg3: memref<128x512xf32, #tpu.memory_space<vmem>>, %arg4: memref<1x512xf32, #tpu.memory_space<vmem>>, %arg5: memref<128x512xf32, #tpu.memory_space<vmem>>, %arg6: memref<128x512xf32, #tpu.memory_space<vmem>>, %arg7: memref<1x512xf32, #tpu.memory_space<vmem>>, %arg8: memref<128x128xf32, #tpu.memory_space<vmem>>, %arg9: memref<1x128xf32, #tpu.memory_space<vmem>>, %arg10: memref<8x128xf32, #tpu.memory_space<vmem>>) attributes {dimension_semantics = [#tpu.dimension_semantics<parallel>], iteration_bounds = array<i64: 1>, scalar_prefetch = 0 : i64, scratch_operands = 0 : i64, tpu.core_type = #tpu.core_type<tc>, window_params = [{transform_indices = @transform_0, window_bounds = array<i64: 8, 8, 28>}, {pipeline_mode = #tpu.pipeline_mode<synchronous>, transform_indices = @transform_1, window_bounds = array<i64: 28, 512>}, {pipeline_mode = #tpu.pipeline_mode<synchronous>, transform_indices = @transform_2, window_bounds = array<i64: 128, 512>}, {pipeline_mode = #tpu.pipeline_mode<synchronous>, transform_indices = @transform_3, window_bounds = array<i64: 1, 512>}, {pipeline_mode = #tpu.pipeline_mode<synchronous>, transform_indices = @transform_4, window_bounds = array<i64: 128, 512>}, {pipeline_mode = #tpu.pipeline_mode<synchronous>, transform_indices = @transform_5, window_bounds = array<i64: 128, 512>}, {pipeline_mode = #tpu.pipeline_mode<synchronous>, transform_indices = @transform_6, window_bounds = array<i64: 1, 512>}, {pipeline_mode = #tpu.pipeline_mode<synchronous>, transform_indices = @transform_7, window_bounds = array<i64: 128, 128>}, {pipeline_mode = #tpu.pipeline_mode<synchronous>, transform_indices = @transform_8, window_bounds = array<i64: 1, 128>}, {transform_indices = @transform_9, window_bounds = array<i64: 8, 128>}]} {
    %c0 = arith.constant 0 : index
    %c0_0 = arith.constant 0 : index
    %0 = vector.load %arg3[%c0, %c0_0] : memref<128x512xf32, #tpu.memory_space<vmem>>, vector<128x512xf32>
    %c0_1 = arith.constant 0 : index
    %c0_2 = arith.constant 0 : index
    %1 = vector.load %arg5[%c0_1, %c0_2] : memref<128x512xf32, #tpu.memory_space<vmem>>, vector<128x512xf32>
    %c0_3 = arith.constant 0 : index
    %c0_4 = arith.constant 0 : index
    %2 = vector.load %arg6[%c0_3, %c0_4] : memref<128x512xf32, #tpu.memory_space<vmem>>, vector<128x512xf32>
    %c0_5 = arith.constant 0 : index
    %c0_6 = arith.constant 0 : index
    %3 = vector.load %arg7[%c0_5, %c0_6] : memref<1x512xf32, #tpu.memory_space<vmem>>, vector<1x512xf32>
    %4 = vector.shape_cast %3 : vector<1x512xf32> to vector<1x512xf32>
    %5 = vector.broadcast %4 : vector<1x512xf32> to vector<8x512xf32>
    %c0_7 = arith.constant 0 : index
    %c0_8 = arith.constant 0 : index
    %c0_9 = arith.constant 0 : index
    %6 = vector.load %arg1[%c0_7, %c0_8, %c0_9] : memref<8x8x28xf32, #tpu.memory_space<vmem>>, vector<8x8x28xf32>
    %7 = vector.shape_cast %6 : vector<8x8x28xf32> to vector<64x28xf32>
    %c0_10 = arith.constant 0 : index
    %c0_11 = arith.constant 0 : index
    %8 = vector.load %arg2[%c0_10, %c0_11] : memref<28x512xf32, #tpu.memory_space<vmem>>, vector<28x512xf32>
    %cst = arith.constant dense<0.000000e+00> : vector<64x512xf32>
    %9 = tpu.matmul %7, %8, %cst {dimension_numbers = #tpu.dot_dimension_numbers<[1], [0], [0], [1], [0, 0, 1, 1], [], []>} : vector<64x28xf32>, vector<28x512xf32>, vector<64x512xf32> -> vector<64x512xf32>
    %c0_12 = arith.constant 0 : index
    %c0_13 = arith.constant 0 : index
    %10 = vector.load %arg4[%c0_12, %c0_13] : memref<1x512xf32, #tpu.memory_space<vmem>>, vector<1x512xf32>
    %11 = vector.broadcast %10 : vector<1x512xf32> to vector<64x512xf32>
    %12 = arith.addf %9, %11 : vector<64x512xf32>
    %cst_14 = arith.constant 0.000000e+00 : f32
    %13 = vector.broadcast %cst_14 : f32 to vector<8x128xf32>
    %14 = vector.extract_strided_slice %12 {offsets = [0, 0], sizes = [8, 512], strides = [1, 1]} : vector<64x512xf32> to vector<8x512xf32>
    %cst_15 = arith.constant dense<0.000000e+00> : vector<8x512xf32>
    %15 = tpu.matmul %13, %0, %cst_15 {dimension_numbers = #tpu.dot_dimension_numbers<[1], [0], [0], [1], [0, 0, 1, 1], [], []>} : vector<8x128xf32>, vector<128x512xf32>, vector<8x512xf32> -> vector<8x512xf32>
    %16 = arith.addf %15, %14 : vector<8x512xf32>
    %17 = vector.extract_strided_slice %16 {offsets = [0, 0], sizes = [8, 384], strides = [1, 1]} : vector<8x512xf32> to vector<8x384xf32>
    %18 = arith.negf %17 : vector<8x384xf32>
    %19 = math.exp %18 : vector<8x384xf32>
    %cst_16 = arith.constant 1.000000e+00 : f32
    %20 = vector.broadcast %cst_16 : f32 to vector<8x384xf32>
    %21 = arith.addf %20, %19 : vector<8x384xf32>
    %22 = arith.divf %20, %21 : vector<8x384xf32>
    %23 = vector.extract_strided_slice %16 {offsets = [0, 384], sizes = [8, 128], strides = [1, 1]} : vector<8x512xf32> to vector<8x128xf32>
    %24 = math.tanh %23 : vector<8x128xf32>
    %25 = vector.extract_strided_slice %22 {offsets = [0, 0], sizes = [8, 128], strides = [1, 1]} : vector<8x384xf32> to vector<8x128xf32>
    %26 = vector.extract_strided_slice %22 {offsets = [0, 128], sizes = [8, 128], strides = [1, 1]} : vector<8x384xf32> to vector<8x128xf32>
    %27 = vector.extract_strided_slice %22 {offsets = [0, 256], sizes = [8, 128], strides = [1, 1]} : vector<8x384xf32> to vector<8x128xf32>
    %28 = arith.mulf %26, %13 : vector<8x128xf32>
    %29 = arith.mulf %25, %24 : vector<8x128xf32>
    %30 = arith.addf %28, %29 : vector<8x128xf32>
    %31 = math.tanh %30 : vector<8x128xf32>
    %32 = arith.mulf %27, %31 : vector<8x128xf32>
    %cst_17 = arith.constant dense<0.000000e+00> : vector<8x512xf32>
    %33 = tpu.matmul %32, %1, %cst_17 {dimension_numbers = #tpu.dot_dimension_numbers<[1], [0], [0], [1], [0, 0, 1, 1], [], []>} : vector<8x128xf32>, vector<128x512xf32>, vector<8x512xf32> -> vector<8x512xf32>
    %cst_18 = arith.constant dense<0.000000e+00> : vector<8x512xf32>
    %34 = tpu.matmul %13, %2, %cst_18 {dimension_numbers = #tpu.dot_dimension_numbers<[1], [0], [0], [1], [0, 0, 1, 1], [], []>} : vector<8x128xf32>, vector<128x512xf32>, vector<8x512xf32> -> vector<8x512xf32>
    %35 = arith.addf %33, %34 : vector<8x512xf32>
    %36 = arith.addf %35, %5 : vector<8x512xf32>
    %37 = vector.extract_strided_slice %36 {offsets = [0, 0], sizes = [8, 384], strides = [1, 1]} : vector<8x512xf32> to vector<8x384xf32>
    %38 = arith.negf %37 : vector<8x384xf32>
    %39 = math.exp %38 : vector<8x384xf32>
    %cst_19 = arith.constant 1.000000e+00 : f32
    %40 = vector.broadcast %cst_19 : f32 to vector<8x384xf32>
    %41 = arith.addf %40, %39 : vector<8x384xf32>
    %42 = arith.divf %40, %41 : vector<8x384xf32>
    %43 = vector.extract_strided_slice %36 {offsets = [0, 384], sizes = [8, 128], strides = [1, 1]} : vector<8x512xf32> to vector<8x128xf32>
    %44 = math.tanh %43 : vector<8x128xf32>
    %45 = vector.extract_strided_slice %42 {offsets = [0, 0], sizes = [8, 128], strides = [1, 1]} : vector<8x384xf32> to vector<8x128xf32>
    %46 = vector.extract_strided_slice %42 {offsets = [0, 128], sizes = [8, 128], strides = [1, 1]} : vector<8x384xf32> to vector<8x128xf32>
    %47 = vector.extract_strided_slice %42 {offsets = [0, 256], sizes = [8, 128], strides = [1, 1]} : vector<8x384xf32> to vector<8x128xf32>
    %48 = arith.mulf %46, %13 : vector<8x128xf32>
    %49 = arith.mulf %45, %44 : vector<8x128xf32>
    %50 = arith.addf %48, %49 : vector<8x128xf32>
    %51 = math.tanh %50 : vector<8x128xf32>
    %52 = arith.mulf %47, %51 : vector<8x128xf32>
    %53 = vector.extract_strided_slice %12 {offsets = [8, 0], sizes = [8, 512], strides = [1, 1]} : vector<64x512xf32> to vector<8x512xf32>
    %cst_20 = arith.constant dense<0.000000e+00> : vector<8x512xf32>
    %54 = tpu.matmul %32, %0, %cst_20 {dimension_numbers = #tpu.dot_dimension_numbers<[1], [0], [0], [1], [0, 0, 1, 1], [], []>} : vector<8x128xf32>, vector<128x512xf32>, vector<8x512xf32> -> vector<8x512xf32>
    %55 = arith.addf %54, %53 : vector<8x512xf32>
    %56 = vector.extract_strided_slice %55 {offsets = [0, 0], sizes = [8, 384], strides = [1, 1]} : vector<8x512xf32> to vector<8x384xf32>
    %57 = arith.negf %56 : vector<8x384xf32>
    %58 = math.exp %57 : vector<8x384xf32>
    %cst_21 = arith.constant 1.000000e+00 : f32
    %59 = vector.broadcast %cst_21 : f32 to vector<8x384xf32>
    %60 = arith.addf %59, %58 : vector<8x384xf32>
    %61 = arith.divf %59, %60 : vector<8x384xf32>
    %62 = vector.extract_strided_slice %55 {offsets = [0, 384], sizes = [8, 128], strides = [1, 1]} : vector<8x512xf32> to vector<8x128xf32>
    %63 = math.tanh %62 : vector<8x128xf32>
    %64 = vector.extract_strided_slice %61 {offsets = [0, 0], sizes = [8, 128], strides = [1, 1]} : vector<8x384xf32> to vector<8x128xf32>
    %65 = vector.extract_strided_slice %61 {offsets = [0, 128], sizes = [8, 128], strides = [1, 1]} : vector<8x384xf32> to vector<8x128xf32>
    %66 = vector.extract_strided_slice %61 {offsets = [0, 256], sizes = [8, 128], strides = [1, 1]} : vector<8x384xf32> to vector<8x128xf32>
    %67 = arith.mulf %65, %30 : vector<8x128xf32>
    %68 = arith.mulf %64, %63 : vector<8x128xf32>
    %69 = arith.addf %67, %68 : vector<8x128xf32>
    %70 = math.tanh %69 : vector<8x128xf32>
    %71 = arith.mulf %66, %70 : vector<8x128xf32>
    %cst_22 = arith.constant dense<0.000000e+00> : vector<8x512xf32>
    %72 = tpu.matmul %71, %1, %cst_22 {dimension_numbers = #tpu.dot_dimension_numbers<[1], [0], [0], [1], [0, 0, 1, 1], [], []>} : vector<8x128xf32>, vector<128x512xf32>, vector<8x512xf32> -> vector<8x512xf32>
    %cst_23 = arith.constant dense<0.000000e+00> : vector<8x512xf32>
    %73 = tpu.matmul %52, %2, %cst_23 {dimension_numbers = #tpu.dot_dimension_numbers<[1], [0], [0], [1], [0, 0, 1, 1], [], []>} : vector<8x128xf32>, vector<128x512xf32>, vector<8x512xf32> -> vector<8x512xf32>
    %74 = arith.addf %72, %73 : vector<8x512xf32>
    %75 = arith.addf %74, %5 : vector<8x512xf32>
    %76 = vector.extract_strided_slice %75 {offsets = [0, 0], sizes = [8, 384], strides = [1, 1]} : vector<8x512xf32> to vector<8x384xf32>
    %77 = arith.negf %76 : vector<8x384xf32>
    %78 = math.exp %77 : vector<8x384xf32>
    %cst_24 = arith.constant 1.000000e+00 : f32
    %79 = vector.broadcast %cst_24 : f32 to vector<8x384xf32>
    %80 = arith.addf %79, %78 : vector<8x384xf32>
    %81 = arith.divf %79, %80 : vector<8x384xf32>
    %82 = vector.extract_strided_slice %75 {offsets = [0, 384], sizes = [8, 128], strides = [1, 1]} : vector<8x512xf32> to vector<8x128xf32>
    %83 = math.tanh %82 : vector<8x128xf32>
    %84 = vector.extract_strided_slice %81 {offsets = [0, 0], sizes = [8, 128], strides = [1, 1]} : vector<8x384xf32> to vector<8x128xf32>
    %85 = vector.extract_strided_slice %81 {offsets = [0, 128], sizes = [8, 128], strides = [1, 1]} : vector<8x384xf32> to vector<8x128xf32>
    %86 = vector.extract_strided_slice %81 {offsets = [0, 256], sizes = [8, 128], strides = [1, 1]} : vector<8x384xf32> to vector<8x128xf32>
    %87 = arith.mulf %85, %50 : vector<8x128xf32>
    %88 = arith.mulf %84, %83 : vector<8x128xf32>
    %89 = arith.addf %87, %88 : vector<8x128xf32>
    %90 = math.tanh %89 : vector<8x128xf32>
    %91 = arith.mulf %86, %90 : vector<8x128xf32>
    %92 = vector.extract_strided_slice %12 {offsets = [16, 0], sizes = [8, 512], strides = [1, 1]} : vector<64x512xf32> to vector<8x512xf32>
    %cst_25 = arith.constant dense<0.000000e+00> : vector<8x512xf32>
    %93 = tpu.matmul %71, %0, %cst_25 {dimension_numbers = #tpu.dot_dimension_numbers<[1], [0], [0], [1], [0, 0, 1, 1], [], []>} : vector<8x128xf32>, vector<128x512xf32>, vector<8x512xf32> -> vector<8x512xf32>
    %94 = arith.addf %93, %92 : vector<8x512xf32>
    %95 = vector.extract_strided_slice %94 {offsets = [0, 0], sizes = [8, 384], strides = [1, 1]} : vector<8x512xf32> to vector<8x384xf32>
    %96 = arith.negf %95 : vector<8x384xf32>
    %97 = math.exp %96 : vector<8x384xf32>
    %cst_26 = arith.constant 1.000000e+00 : f32
    %98 = vector.broadcast %cst_26 : f32 to vector<8x384xf32>
    %99 = arith.addf %98, %97 : vector<8x384xf32>
    %100 = arith.divf %98, %99 : vector<8x384xf32>
    %101 = vector.extract_strided_slice %94 {offsets = [0, 384], sizes = [8, 128], strides = [1, 1]} : vector<8x512xf32> to vector<8x128xf32>
    %102 = math.tanh %101 : vector<8x128xf32>
    %103 = vector.extract_strided_slice %100 {offsets = [0, 0], sizes = [8, 128], strides = [1, 1]} : vector<8x384xf32> to vector<8x128xf32>
    %104 = vector.extract_strided_slice %100 {offsets = [0, 128], sizes = [8, 128], strides = [1, 1]} : vector<8x384xf32> to vector<8x128xf32>
    %105 = vector.extract_strided_slice %100 {offsets = [0, 256], sizes = [8, 128], strides = [1, 1]} : vector<8x384xf32> to vector<8x128xf32>
    %106 = arith.mulf %104, %69 : vector<8x128xf32>
    %107 = arith.mulf %103, %102 : vector<8x128xf32>
    %108 = arith.addf %106, %107 : vector<8x128xf32>
    %109 = math.tanh %108 : vector<8x128xf32>
    %110 = arith.mulf %105, %109 : vector<8x128xf32>
    %cst_27 = arith.constant dense<0.000000e+00> : vector<8x512xf32>
    %111 = tpu.matmul %110, %1, %cst_27 {dimension_numbers = #tpu.dot_dimension_numbers<[1], [0], [0], [1], [0, 0, 1, 1], [], []>} : vector<8x128xf32>, vector<128x512xf32>, vector<8x512xf32> -> vector<8x512xf32>
    %cst_28 = arith.constant dense<0.000000e+00> : vector<8x512xf32>
    %112 = tpu.matmul %91, %2, %cst_28 {dimension_numbers = #tpu.dot_dimension_numbers<[1], [0], [0], [1], [0, 0, 1, 1], [], []>} : vector<8x128xf32>, vector<128x512xf32>, vector<8x512xf32> -> vector<8x512xf32>
    %113 = arith.addf %111, %112 : vector<8x512xf32>
    %114 = arith.addf %113, %5 : vector<8x512xf32>
    %115 = vector.extract_strided_slice %114 {offsets = [0, 0], sizes = [8, 384], strides = [1, 1]} : vector<8x512xf32> to vector<8x384xf32>
    %116 = arith.negf %115 : vector<8x384xf32>
    %117 = math.exp %116 : vector<8x384xf32>
    %cst_29 = arith.constant 1.000000e+00 : f32
    %118 = vector.broadcast %cst_29 : f32 to vector<8x384xf32>
    %119 = arith.addf %118, %117 : vector<8x384xf32>
    %120 = arith.divf %118, %119 : vector<8x384xf32>
    %121 = vector.extract_strided_slice %114 {offsets = [0, 384], sizes = [8, 128], strides = [1, 1]} : vector<8x512xf32> to vector<8x128xf32>
    %122 = math.tanh %121 : vector<8x128xf32>
    %123 = vector.extract_strided_slice %120 {offsets = [0, 0], sizes = [8, 128], strides = [1, 1]} : vector<8x384xf32> to vector<8x128xf32>
    %124 = vector.extract_strided_slice %120 {offsets = [0, 128], sizes = [8, 128], strides = [1, 1]} : vector<8x384xf32> to vector<8x128xf32>
    %125 = vector.extract_strided_slice %120 {offsets = [0, 256], sizes = [8, 128], strides = [1, 1]} : vector<8x384xf32> to vector<8x128xf32>
    %126 = arith.mulf %124, %89 : vector<8x128xf32>
    %127 = arith.mulf %123, %122 : vector<8x128xf32>
    %128 = arith.addf %126, %127 : vector<8x128xf32>
    %129 = math.tanh %128 : vector<8x128xf32>
    %130 = arith.mulf %125, %129 : vector<8x128xf32>
    %131 = vector.extract_strided_slice %12 {offsets = [24, 0], sizes = [8, 512], strides = [1, 1]} : vector<64x512xf32> to vector<8x512xf32>
    %cst_30 = arith.constant dense<0.000000e+00> : vector<8x512xf32>
    %132 = tpu.matmul %110, %0, %cst_30 {dimension_numbers = #tpu.dot_dimension_numbers<[1], [0], [0], [1], [0, 0, 1, 1], [], []>} : vector<8x128xf32>, vector<128x512xf32>, vector<8x512xf32> -> vector<8x512xf32>
    %133 = arith.addf %132, %131 : vector<8x512xf32>
    %134 = vector.extract_strided_slice %133 {offsets = [0, 0], sizes = [8, 384], strides = [1, 1]} : vector<8x512xf32> to vector<8x384xf32>
    %135 = arith.negf %134 : vector<8x384xf32>
    %136 = math.exp %135 : vector<8x384xf32>
    %cst_31 = arith.constant 1.000000e+00 : f32
    %137 = vector.broadcast %cst_31 : f32 to vector<8x384xf32>
    %138 = arith.addf %137, %136 : vector<8x384xf32>
    %139 = arith.divf %137, %138 : vector<8x384xf32>
    %140 = vector.extract_strided_slice %133 {offsets = [0, 384], sizes = [8, 128], strides = [1, 1]} : vector<8x512xf32> to vector<8x128xf32>
    %141 = math.tanh %140 : vector<8x128xf32>
    %142 = vector.extract_strided_slice %139 {offsets = [0, 0], sizes = [8, 128], strides = [1, 1]} : vector<8x384xf32> to vector<8x128xf32>
    %143 = vector.extract_strided_slice %139 {offsets = [0, 128], sizes = [8, 128], strides = [1, 1]} : vector<8x384xf32> to vector<8x128xf32>
    %144 = vector.extract_strided_slice %139 {offsets = [0, 256], sizes = [8, 128], strides = [1, 1]} : vector<8x384xf32> to vector<8x128xf32>
    %145 = arith.mulf %143, %108 : vector<8x128xf32>
    %146 = arith.mulf %142, %141 : vector<8x128xf32>
    %147 = arith.addf %145, %146 : vector<8x128xf32>
    %148 = math.tanh %147 : vector<8x128xf32>
    %149 = arith.mulf %144, %148 : vector<8x128xf32>
    %cst_32 = arith.constant dense<0.000000e+00> : vector<8x512xf32>
    %150 = tpu.matmul %149, %1, %cst_32 {dimension_numbers = #tpu.dot_dimension_numbers<[1], [0], [0], [1], [0, 0, 1, 1], [], []>} : vector<8x128xf32>, vector<128x512xf32>, vector<8x512xf32> -> vector<8x512xf32>
    %cst_33 = arith.constant dense<0.000000e+00> : vector<8x512xf32>
    %151 = tpu.matmul %130, %2, %cst_33 {dimension_numbers = #tpu.dot_dimension_numbers<[1], [0], [0], [1], [0, 0, 1, 1], [], []>} : vector<8x128xf32>, vector<128x512xf32>, vector<8x512xf32> -> vector<8x512xf32>
    %152 = arith.addf %150, %151 : vector<8x512xf32>
    %153 = arith.addf %152, %5 : vector<8x512xf32>
    %154 = vector.extract_strided_slice %153 {offsets = [0, 0], sizes = [8, 384], strides = [1, 1]} : vector<8x512xf32> to vector<8x384xf32>
    %155 = arith.negf %154 : vector<8x384xf32>
    %156 = math.exp %155 : vector<8x384xf32>
    %cst_34 = arith.constant 1.000000e+00 : f32
    %157 = vector.broadcast %cst_34 : f32 to vector<8x384xf32>
    %158 = arith.addf %157, %156 : vector<8x384xf32>
    %159 = arith.divf %157, %158 : vector<8x384xf32>
    %160 = vector.extract_strided_slice %153 {offsets = [0, 384], sizes = [8, 128], strides = [1, 1]} : vector<8x512xf32> to vector<8x128xf32>
    %161 = math.tanh %160 : vector<8x128xf32>
    %162 = vector.extract_strided_slice %159 {offsets = [0, 0], sizes = [8, 128], strides = [1, 1]} : vector<8x384xf32> to vector<8x128xf32>
    %163 = vector.extract_strided_slice %159 {offsets = [0, 128], sizes = [8, 128], strides = [1, 1]} : vector<8x384xf32> to vector<8x128xf32>
    %164 = vector.extract_strided_slice %159 {offsets = [0, 256], sizes = [8, 128], strides = [1, 1]} : vector<8x384xf32> to vector<8x128xf32>
    %165 = arith.mulf %163, %128 : vector<8x128xf32>
    %166 = arith.mulf %162, %161 : vector<8x128xf32>
    %167 = arith.addf %165, %166 : vector<8x128xf32>
    %168 = math.tanh %167 : vector<8x128xf32>
    %169 = arith.mulf %164, %168 : vector<8x128xf32>
    %170 = vector.extract_strided_slice %12 {offsets = [32, 0], sizes = [8, 512], strides = [1, 1]} : vector<64x512xf32> to vector<8x512xf32>
    %cst_35 = arith.constant dense<0.000000e+00> : vector<8x512xf32>
    %171 = tpu.matmul %149, %0, %cst_35 {dimension_numbers = #tpu.dot_dimension_numbers<[1], [0], [0], [1], [0, 0, 1, 1], [], []>} : vector<8x128xf32>, vector<128x512xf32>, vector<8x512xf32> -> vector<8x512xf32>
    %172 = arith.addf %171, %170 : vector<8x512xf32>
    %173 = vector.extract_strided_slice %172 {offsets = [0, 0], sizes = [8, 384], strides = [1, 1]} : vector<8x512xf32> to vector<8x384xf32>
    %174 = arith.negf %173 : vector<8x384xf32>
    %175 = math.exp %174 : vector<8x384xf32>
    %cst_36 = arith.constant 1.000000e+00 : f32
    %176 = vector.broadcast %cst_36 : f32 to vector<8x384xf32>
    %177 = arith.addf %176, %175 : vector<8x384xf32>
    %178 = arith.divf %176, %177 : vector<8x384xf32>
    %179 = vector.extract_strided_slice %172 {offsets = [0, 384], sizes = [8, 128], strides = [1, 1]} : vector<8x512xf32> to vector<8x128xf32>
    %180 = math.tanh %179 : vector<8x128xf32>
    %181 = vector.extract_strided_slice %178 {offsets = [0, 0], sizes = [8, 128], strides = [1, 1]} : vector<8x384xf32> to vector<8x128xf32>
    %182 = vector.extract_strided_slice %178 {offsets = [0, 128], sizes = [8, 128], strides = [1, 1]} : vector<8x384xf32> to vector<8x128xf32>
    %183 = vector.extract_strided_slice %178 {offsets = [0, 256], sizes = [8, 128], strides = [1, 1]} : vector<8x384xf32> to vector<8x128xf32>
    %184 = arith.mulf %182, %147 : vector<8x128xf32>
    %185 = arith.mulf %181, %180 : vector<8x128xf32>
    %186 = arith.addf %184, %185 : vector<8x128xf32>
    %187 = math.tanh %186 : vector<8x128xf32>
    %188 = arith.mulf %183, %187 : vector<8x128xf32>
    %cst_37 = arith.constant dense<0.000000e+00> : vector<8x512xf32>
    %189 = tpu.matmul %188, %1, %cst_37 {dimension_numbers = #tpu.dot_dimension_numbers<[1], [0], [0], [1], [0, 0, 1, 1], [], []>} : vector<8x128xf32>, vector<128x512xf32>, vector<8x512xf32> -> vector<8x512xf32>
    %cst_38 = arith.constant dense<0.000000e+00> : vector<8x512xf32>
    %190 = tpu.matmul %169, %2, %cst_38 {dimension_numbers = #tpu.dot_dimension_numbers<[1], [0], [0], [1], [0, 0, 1, 1], [], []>} : vector<8x128xf32>, vector<128x512xf32>, vector<8x512xf32> -> vector<8x512xf32>
    %191 = arith.addf %189, %190 : vector<8x512xf32>
    %192 = arith.addf %191, %5 : vector<8x512xf32>
    %193 = vector.extract_strided_slice %192 {offsets = [0, 0], sizes = [8, 384], strides = [1, 1]} : vector<8x512xf32> to vector<8x384xf32>
    %194 = arith.negf %193 : vector<8x384xf32>
    %195 = math.exp %194 : vector<8x384xf32>
    %cst_39 = arith.constant 1.000000e+00 : f32
    %196 = vector.broadcast %cst_39 : f32 to vector<8x384xf32>
    %197 = arith.addf %196, %195 : vector<8x384xf32>
    %198 = arith.divf %196, %197 : vector<8x384xf32>
    %199 = vector.extract_strided_slice %192 {offsets = [0, 384], sizes = [8, 128], strides = [1, 1]} : vector<8x512xf32> to vector<8x128xf32>
    %200 = math.tanh %199 : vector<8x128xf32>
    %201 = vector.extract_strided_slice %198 {offsets = [0, 0], sizes = [8, 128], strides = [1, 1]} : vector<8x384xf32> to vector<8x128xf32>
    %202 = vector.extract_strided_slice %198 {offsets = [0, 128], sizes = [8, 128], strides = [1, 1]} : vector<8x384xf32> to vector<8x128xf32>
    %203 = vector.extract_strided_slice %198 {offsets = [0, 256], sizes = [8, 128], strides = [1, 1]} : vector<8x384xf32> to vector<8x128xf32>
    %204 = arith.mulf %202, %167 : vector<8x128xf32>
    %205 = arith.mulf %201, %200 : vector<8x128xf32>
    %206 = arith.addf %204, %205 : vector<8x128xf32>
    %207 = math.tanh %206 : vector<8x128xf32>
    %208 = arith.mulf %203, %207 : vector<8x128xf32>
    %209 = vector.extract_strided_slice %12 {offsets = [40, 0], sizes = [8, 512], strides = [1, 1]} : vector<64x512xf32> to vector<8x512xf32>
    %cst_40 = arith.constant dense<0.000000e+00> : vector<8x512xf32>
    %210 = tpu.matmul %188, %0, %cst_40 {dimension_numbers = #tpu.dot_dimension_numbers<[1], [0], [0], [1], [0, 0, 1, 1], [], []>} : vector<8x128xf32>, vector<128x512xf32>, vector<8x512xf32> -> vector<8x512xf32>
    %211 = arith.addf %210, %209 : vector<8x512xf32>
    %212 = vector.extract_strided_slice %211 {offsets = [0, 0], sizes = [8, 384], strides = [1, 1]} : vector<8x512xf32> to vector<8x384xf32>
    %213 = arith.negf %212 : vector<8x384xf32>
    %214 = math.exp %213 : vector<8x384xf32>
    %cst_41 = arith.constant 1.000000e+00 : f32
    %215 = vector.broadcast %cst_41 : f32 to vector<8x384xf32>
    %216 = arith.addf %215, %214 : vector<8x384xf32>
    %217 = arith.divf %215, %216 : vector<8x384xf32>
    %218 = vector.extract_strided_slice %211 {offsets = [0, 384], sizes = [8, 128], strides = [1, 1]} : vector<8x512xf32> to vector<8x128xf32>
    %219 = math.tanh %218 : vector<8x128xf32>
    %220 = vector.extract_strided_slice %217 {offsets = [0, 0], sizes = [8, 128], strides = [1, 1]} : vector<8x384xf32> to vector<8x128xf32>
    %221 = vector.extract_strided_slice %217 {offsets = [0, 128], sizes = [8, 128], strides = [1, 1]} : vector<8x384xf32> to vector<8x128xf32>
    %222 = vector.extract_strided_slice %217 {offsets = [0, 256], sizes = [8, 128], strides = [1, 1]} : vector<8x384xf32> to vector<8x128xf32>
    %223 = arith.mulf %221, %186 : vector<8x128xf32>
    %224 = arith.mulf %220, %219 : vector<8x128xf32>
    %225 = arith.addf %223, %224 : vector<8x128xf32>
    %226 = math.tanh %225 : vector<8x128xf32>
    %227 = arith.mulf %222, %226 : vector<8x128xf32>
    %cst_42 = arith.constant dense<0.000000e+00> : vector<8x512xf32>
    %228 = tpu.matmul %227, %1, %cst_42 {dimension_numbers = #tpu.dot_dimension_numbers<[1], [0], [0], [1], [0, 0, 1, 1], [], []>} : vector<8x128xf32>, vector<128x512xf32>, vector<8x512xf32> -> vector<8x512xf32>
    %cst_43 = arith.constant dense<0.000000e+00> : vector<8x512xf32>
    %229 = tpu.matmul %208, %2, %cst_43 {dimension_numbers = #tpu.dot_dimension_numbers<[1], [0], [0], [1], [0, 0, 1, 1], [], []>} : vector<8x128xf32>, vector<128x512xf32>, vector<8x512xf32> -> vector<8x512xf32>
    %230 = arith.addf %228, %229 : vector<8x512xf32>
    %231 = arith.addf %230, %5 : vector<8x512xf32>
    %232 = vector.extract_strided_slice %231 {offsets = [0, 0], sizes = [8, 384], strides = [1, 1]} : vector<8x512xf32> to vector<8x384xf32>
    %233 = arith.negf %232 : vector<8x384xf32>
    %234 = math.exp %233 : vector<8x384xf32>
    %cst_44 = arith.constant 1.000000e+00 : f32
    %235 = vector.broadcast %cst_44 : f32 to vector<8x384xf32>
    %236 = arith.addf %235, %234 : vector<8x384xf32>
    %237 = arith.divf %235, %236 : vector<8x384xf32>
    %238 = vector.extract_strided_slice %231 {offsets = [0, 384], sizes = [8, 128], strides = [1, 1]} : vector<8x512xf32> to vector<8x128xf32>
    %239 = math.tanh %238 : vector<8x128xf32>
    %240 = vector.extract_strided_slice %237 {offsets = [0, 0], sizes = [8, 128], strides = [1, 1]} : vector<8x384xf32> to vector<8x128xf32>
    %241 = vector.extract_strided_slice %237 {offsets = [0, 128], sizes = [8, 128], strides = [1, 1]} : vector<8x384xf32> to vector<8x128xf32>
    %242 = vector.extract_strided_slice %237 {offsets = [0, 256], sizes = [8, 128], strides = [1, 1]} : vector<8x384xf32> to vector<8x128xf32>
    %243 = arith.mulf %241, %206 : vector<8x128xf32>
    %244 = arith.mulf %240, %239 : vector<8x128xf32>
    %245 = arith.addf %243, %244 : vector<8x128xf32>
    %246 = math.tanh %245 : vector<8x128xf32>
    %247 = arith.mulf %242, %246 : vector<8x128xf32>
    %248 = vector.extract_strided_slice %12 {offsets = [48, 0], sizes = [8, 512], strides = [1, 1]} : vector<64x512xf32> to vector<8x512xf32>
    %cst_45 = arith.constant dense<0.000000e+00> : vector<8x512xf32>
    %249 = tpu.matmul %227, %0, %cst_45 {dimension_numbers = #tpu.dot_dimension_numbers<[1], [0], [0], [1], [0, 0, 1, 1], [], []>} : vector<8x128xf32>, vector<128x512xf32>, vector<8x512xf32> -> vector<8x512xf32>
    %250 = arith.addf %249, %248 : vector<8x512xf32>
    %251 = vector.extract_strided_slice %250 {offsets = [0, 0], sizes = [8, 384], strides = [1, 1]} : vector<8x512xf32> to vector<8x384xf32>
    %252 = arith.negf %251 : vector<8x384xf32>
    %253 = math.exp %252 : vector<8x384xf32>
    %cst_46 = arith.constant 1.000000e+00 : f32
    %254 = vector.broadcast %cst_46 : f32 to vector<8x384xf32>
    %255 = arith.addf %254, %253 : vector<8x384xf32>
    %256 = arith.divf %254, %255 : vector<8x384xf32>
    %257 = vector.extract_strided_slice %250 {offsets = [0, 384], sizes = [8, 128], strides = [1, 1]} : vector<8x512xf32> to vector<8x128xf32>
    %258 = math.tanh %257 : vector<8x128xf32>
    %259 = vector.extract_strided_slice %256 {offsets = [0, 0], sizes = [8, 128], strides = [1, 1]} : vector<8x384xf32> to vector<8x128xf32>
    %260 = vector.extract_strided_slice %256 {offsets = [0, 128], sizes = [8, 128], strides = [1, 1]} : vector<8x384xf32> to vector<8x128xf32>
    %261 = vector.extract_strided_slice %256 {offsets = [0, 256], sizes = [8, 128], strides = [1, 1]} : vector<8x384xf32> to vector<8x128xf32>
    %262 = arith.mulf %260, %225 : vector<8x128xf32>
    %263 = arith.mulf %259, %258 : vector<8x128xf32>
    %264 = arith.addf %262, %263 : vector<8x128xf32>
    %265 = math.tanh %264 : vector<8x128xf32>
    %266 = arith.mulf %261, %265 : vector<8x128xf32>
    %cst_47 = arith.constant dense<0.000000e+00> : vector<8x512xf32>
    %267 = tpu.matmul %266, %1, %cst_47 {dimension_numbers = #tpu.dot_dimension_numbers<[1], [0], [0], [1], [0, 0, 1, 1], [], []>} : vector<8x128xf32>, vector<128x512xf32>, vector<8x512xf32> -> vector<8x512xf32>
    %cst_48 = arith.constant dense<0.000000e+00> : vector<8x512xf32>
    %268 = tpu.matmul %247, %2, %cst_48 {dimension_numbers = #tpu.dot_dimension_numbers<[1], [0], [0], [1], [0, 0, 1, 1], [], []>} : vector<8x128xf32>, vector<128x512xf32>, vector<8x512xf32> -> vector<8x512xf32>
    %269 = arith.addf %267, %268 : vector<8x512xf32>
    %270 = arith.addf %269, %5 : vector<8x512xf32>
    %271 = vector.extract_strided_slice %270 {offsets = [0, 0], sizes = [8, 384], strides = [1, 1]} : vector<8x512xf32> to vector<8x384xf32>
    %272 = arith.negf %271 : vector<8x384xf32>
    %273 = math.exp %272 : vector<8x384xf32>
    %cst_49 = arith.constant 1.000000e+00 : f32
    %274 = vector.broadcast %cst_49 : f32 to vector<8x384xf32>
    %275 = arith.addf %274, %273 : vector<8x384xf32>
    %276 = arith.divf %274, %275 : vector<8x384xf32>
    %277 = vector.extract_strided_slice %270 {offsets = [0, 384], sizes = [8, 128], strides = [1, 1]} : vector<8x512xf32> to vector<8x128xf32>
    %278 = math.tanh %277 : vector<8x128xf32>
    %279 = vector.extract_strided_slice %276 {offsets = [0, 0], sizes = [8, 128], strides = [1, 1]} : vector<8x384xf32> to vector<8x128xf32>
    %280 = vector.extract_strided_slice %276 {offsets = [0, 128], sizes = [8, 128], strides = [1, 1]} : vector<8x384xf32> to vector<8x128xf32>
    %281 = vector.extract_strided_slice %276 {offsets = [0, 256], sizes = [8, 128], strides = [1, 1]} : vector<8x384xf32> to vector<8x128xf32>
    %282 = arith.mulf %280, %245 : vector<8x128xf32>
    %283 = arith.mulf %279, %278 : vector<8x128xf32>
    %284 = arith.addf %282, %283 : vector<8x128xf32>
    %285 = math.tanh %284 : vector<8x128xf32>
    %286 = arith.mulf %281, %285 : vector<8x128xf32>
    %287 = vector.extract_strided_slice %12 {offsets = [56, 0], sizes = [8, 512], strides = [1, 1]} : vector<64x512xf32> to vector<8x512xf32>
    %cst_50 = arith.constant dense<0.000000e+00> : vector<8x512xf32>
    %288 = tpu.matmul %266, %0, %cst_50 {dimension_numbers = #tpu.dot_dimension_numbers<[1], [0], [0], [1], [0, 0, 1, 1], [], []>} : vector<8x128xf32>, vector<128x512xf32>, vector<8x512xf32> -> vector<8x512xf32>
    %289 = arith.addf %288, %287 : vector<8x512xf32>
    %290 = vector.extract_strided_slice %289 {offsets = [0, 0], sizes = [8, 384], strides = [1, 1]} : vector<8x512xf32> to vector<8x384xf32>
    %291 = arith.negf %290 : vector<8x384xf32>
    %292 = math.exp %291 : vector<8x384xf32>
    %cst_51 = arith.constant 1.000000e+00 : f32
    %293 = vector.broadcast %cst_51 : f32 to vector<8x384xf32>
    %294 = arith.addf %293, %292 : vector<8x384xf32>
    %295 = arith.divf %293, %294 : vector<8x384xf32>
    %296 = vector.extract_strided_slice %289 {offsets = [0, 384], sizes = [8, 128], strides = [1, 1]} : vector<8x512xf32> to vector<8x128xf32>
    %297 = math.tanh %296 : vector<8x128xf32>
    %298 = vector.extract_strided_slice %295 {offsets = [0, 0], sizes = [8, 128], strides = [1, 1]} : vector<8x384xf32> to vector<8x128xf32>
    %299 = vector.extract_strided_slice %295 {offsets = [0, 128], sizes = [8, 128], strides = [1, 1]} : vector<8x384xf32> to vector<8x128xf32>
    %300 = vector.extract_strided_slice %295 {offsets = [0, 256], sizes = [8, 128], strides = [1, 1]} : vector<8x384xf32> to vector<8x128xf32>
    %301 = arith.mulf %299, %264 : vector<8x128xf32>
    %302 = arith.mulf %298, %297 : vector<8x128xf32>
    %303 = arith.addf %301, %302 : vector<8x128xf32>
    %304 = math.tanh %303 : vector<8x128xf32>
    %305 = arith.mulf %300, %304 : vector<8x128xf32>
    %cst_52 = arith.constant dense<0.000000e+00> : vector<8x512xf32>
    %306 = tpu.matmul %305, %1, %cst_52 {dimension_numbers = #tpu.dot_dimension_numbers<[1], [0], [0], [1], [0, 0, 1, 1], [], []>} : vector<8x128xf32>, vector<128x512xf32>, vector<8x512xf32> -> vector<8x512xf32>
    %cst_53 = arith.constant dense<0.000000e+00> : vector<8x512xf32>
    %307 = tpu.matmul %286, %2, %cst_53 {dimension_numbers = #tpu.dot_dimension_numbers<[1], [0], [0], [1], [0, 0, 1, 1], [], []>} : vector<8x128xf32>, vector<128x512xf32>, vector<8x512xf32> -> vector<8x512xf32>
    %308 = arith.addf %306, %307 : vector<8x512xf32>
    %309 = arith.addf %308, %5 : vector<8x512xf32>
    %310 = vector.extract_strided_slice %309 {offsets = [0, 0], sizes = [8, 384], strides = [1, 1]} : vector<8x512xf32> to vector<8x384xf32>
    %311 = arith.negf %310 : vector<8x384xf32>
    %312 = math.exp %311 : vector<8x384xf32>
    %cst_54 = arith.constant 1.000000e+00 : f32
    %313 = vector.broadcast %cst_54 : f32 to vector<8x384xf32>
    %314 = arith.addf %313, %312 : vector<8x384xf32>
    %315 = arith.divf %313, %314 : vector<8x384xf32>
    %316 = vector.extract_strided_slice %309 {offsets = [0, 384], sizes = [8, 128], strides = [1, 1]} : vector<8x512xf32> to vector<8x128xf32>
    %317 = math.tanh %316 : vector<8x128xf32>
    %318 = vector.extract_strided_slice %315 {offsets = [0, 0], sizes = [8, 128], strides = [1, 1]} : vector<8x384xf32> to vector<8x128xf32>
    %319 = vector.extract_strided_slice %315 {offsets = [0, 128], sizes = [8, 128], strides = [1, 1]} : vector<8x384xf32> to vector<8x128xf32>
    %320 = vector.extract_strided_slice %315 {offsets = [0, 256], sizes = [8, 128], strides = [1, 1]} : vector<8x384xf32> to vector<8x128xf32>
    %321 = arith.mulf %319, %284 : vector<8x128xf32>
    %322 = arith.mulf %318, %317 : vector<8x128xf32>
    %323 = arith.addf %321, %322 : vector<8x128xf32>
    %324 = math.tanh %323 : vector<8x128xf32>
    %325 = arith.mulf %320, %324 : vector<8x128xf32>
    %c0_55 = arith.constant 0 : index
    %c0_56 = arith.constant 0 : index
    %326 = vector.load %arg8[%c0_55, %c0_56] : memref<128x128xf32, #tpu.memory_space<vmem>>, vector<128x128xf32>
    %cst_57 = arith.constant dense<0.000000e+00> : vector<8x128xf32>
    %327 = tpu.matmul %325, %326, %cst_57 {dimension_numbers = #tpu.dot_dimension_numbers<[1], [0], [0], [1], [0, 0, 1, 1], [], []>} : vector<8x128xf32>, vector<128x128xf32>, vector<8x128xf32> -> vector<8x128xf32>
    %c0_58 = arith.constant 0 : index
    %c0_59 = arith.constant 0 : index
    %328 = vector.load %arg9[%c0_58, %c0_59] : memref<1x128xf32, #tpu.memory_space<vmem>>, vector<1x128xf32>
    %329 = vector.broadcast %328 : vector<1x128xf32> to vector<8x128xf32>
    %330 = arith.addf %327, %329 : vector<8x128xf32>
    %c0_60 = arith.constant 0 : index
    %c0_61 = arith.constant 0 : index
    %331 = vector.load %arg10[%c0_60, %c0_61] : memref<8x128xf32, #tpu.memory_space<vmem>>, vector<8x128xf32>
    tpu.vector_store %arg10[%c0_60, %c0_61], %330 {strides = array<i32>} : memref<8x128xf32, #tpu.memory_space<vmem>>, vector<8x128xf32>,
    return
  }
  func.func @transform_0(%arg0: i32) -> (i32, i32, i32) {
    %c0_i32 = arith.constant 0 : i32
    %c0_i32_0 = arith.constant 0 : i32
    %c0_i32_1 = arith.constant 0 : i32
    return %c0_i32, %arg0, %c0_i32_0 : i32, i32, i32
  }
  func.func @transform_1(%arg0: i32) -> (i32, i32) {
    %c0_i32 = arith.constant 0 : i32
    %c0_i32_0 = arith.constant 0 : i32
    %c0_i32_1 = arith.constant 0 : i32
    return %c0_i32, %c0_i32_0 : i32, i32
  }
  func.func @transform_2(%arg0: i32) -> (i32, i32) {
    %c0_i32 = arith.constant 0 : i32
    %c0_i32_0 = arith.constant 0 : i32
    %c0_i32_1 = arith.constant 0 : i32
    return %c0_i32, %c0_i32_0 : i32, i32
  }
  func.func @transform_3(%arg0: i32) -> (i32, i32) {
    %c0_i32 = arith.constant 0 : i32
    %c0_i32_0 = arith.constant 0 : i32
    %c0_i32_1 = arith.constant 0 : i32
    return %c0_i32, %c0_i32_0 : i32, i32
  }
  func.func @transform_4(%arg0: i32) -> (i32, i32) {
    %c0_i32 = arith.constant 0 : i32
    %c0_i32_0 = arith.constant 0 : i32
    %c0_i32_1 = arith.constant 0 : i32
    return %c0_i32, %c0_i32_0 : i32, i32
  }
  func.func @transform_5(%arg0: i32) -> (i32, i32) {
    %c0_i32 = arith.constant 0 : i32
    %c0_i32_0 = arith.constant 0 : i32
    %c0_i32_1 = arith.constant 0 : i32
    return %c0_i32, %c0_i32_0 : i32, i32
  }
  func.func @transform_6(%arg0: i32) -> (i32, i32) {
    %c0_i32 = arith.constant 0 : i32
    %c0_i32_0 = arith.constant 0 : i32
    %c0_i32_1 = arith.constant 0 : i32
    return %c0_i32, %c0_i32_0 : i32, i32
  }
  func.func @transform_7(%arg0: i32) -> (i32, i32) {
    %c0_i32 = arith.constant 0 : i32
    %c0_i32_0 = arith.constant 0 : i32
    %c0_i32_1 = arith.constant 0 : i32
    return %c0_i32, %c0_i32_0 : i32, i32
  }
  func.func @transform_8(%arg0: i32) -> (i32, i32) {
    %c0_i32 = arith.constant 0 : i32
    %c0_i32_0 = arith.constant 0 : i32
    %c0_i32_1 = arith.constant 0 : i32
    return %c0_i32, %c0_i32_0 : i32, i32
  }
  func.func @transform_9(%arg0: i32) -> (i32, i32) {
    %c0_i32 = arith.constant 0 : i32
    %c0_i32_0 = arith.constant 0 : i32
    return %arg0, %c0_i32 : i32, i32
  }
}

</mosaic_0001>

<bundles_post_ra>
// kernel: rnn_forward.1
= control target key start
LH: loop header
LB: loop body
LE: loop exit
PB: predicated region body
PF: predicated region fallthrough
CT: control target
= control target key end

     0   :  { %vm317_vm0 = vcmask 1043456   ;;  %v8523_v3 = vmov 0.0   ;;  %vm6536_vm1 = vmmov 1   ;;  %vm292_vm3 = vcmask 228352   ;;  %s8513_s1 = inlined_call_operand.vmem [shape: f32[28,512], index: 1, kind: input, shape index: {}]   ;;  %s8514_s2 = inlined_call_operand.vmem [shape: f32[128,512], index: 2, kind: input, shape index: {}]   ;;  %s8515_s0 = inlined_call_operand.vmem [shape: f32[8,8,28], index: 0, kind: input, shape index: {}]   ;;  %s8516_s5 = inlined_call_operand.vmem [shape: f32[128,512], index: 5, kind: input, shape index: {}]   ;;  %s8517_s4 = inlined_call_operand.vmem [shape: f32[128,512], index: 4, kind: input, shape index: {}]   ;;  %s8518_s3 = inlined_call_operand.vmem [shape: f32[1,512], index: 3, kind: input, shape index: {}]   ;;  %s8519_s6 = inlined_call_operand.vmem [shape: f32[1,512], index: 6, kind: input, shape index: {}]   ;;  %s8520_s7 = inlined_call_operand.vmem [shape: f32[128,128], index: 7, kind: input, shape index: {}]   ;;  %s8521_s8 = inlined_call_operand.vmem [shape: f32[1,128], index: 8, kind: input, shape index: {}]   ;;  %s8522_s9 = inlined_call_operand.vmem [shape: f32[8,128], index: 9, kind: output, shape index: {}]  }
   0x1   :  { %v255_v0 = vld [vmem:[%s8513_s1 + $0x8] sm:$0xff]  ;;  %v257_v2 = vld [vmem:[%s8513_s1 + $0x18] sm:$0xff]  ;;  %394 = vmatprep.mubr.f32.mxu0 %v8523_v3  ;;  %507 = vmatprep.mubr.f32.mxu1 %v8523_v3  ;;  %v254_v6 = vld [vmem:[%s8513_s1] sm:$0xff]  ;;  %vm6538_vm4 = vmmov 0  }
   0x2   :  { %v259_v1 = vld [vmem:[%s8513_s1 + $0x28] sm:$0xff]  ;;  %v261_v5 = vld [vmem:[%s8513_s1 + $0x38] sm:$0xff]  ;;  %v258_v7 = vld [vmem:[%s8513_s1 + $0x20] sm:$0xff] }
   0x3   :  { %v4599_v4 = vpack.c.bf16 %v259_v1, %v255_v0  ;;  %v4609_v8 = vpack.c.bf16 %v261_v5, %v257_v2  ;;  %v4601_v9 = vpack.c.bf16 %v258_v7, %v254_v6  ;;  %v256_v10 = vld [vmem:[%s8513_s1 + $0x10] sm:$0xff]  ;;  %v263_v12 = vld [vmem:[%s8513_s1 + $0x48] sm:$0xff]  ;;  %vm6622_vm2 = vmpackc.low %vm317_vm0, %vm6536_vm1 }
   0x4   :  { %v260_v11 = vld [vmem:[%s8513_s1 + $0x30] sm:$0xff]  ;;  %v267_v14 = vld [vmem:[%s8513_s1 + $0x68] sm:$0xf]  ;;  %v265_v16 = vld [vmem:[%s8513_s1 + $0x58] sm:$0xff] }
   0x5   :  { %4600 = vmatprep.subr.bf16.mxu0 %v4599_v4  ;;  %v4611_v13 = vpack.c.bf16 %v260_v11, %v256_v10  ;;  %4610 = vmatprep.subr.bf16.mxu1 %v4609_v8  ;;  %v4603_v17 = vpack.c.bf16 %v267_v14, %v263_v12  ;;  %v269_v18 = vld [vmem:[%s8513_s1 + $0x78] sm:$0xf]  ;;  %v262_v19 = vld [vmem:[%s8513_s1 + $0x40] sm:$0xff]  ;;  %v264_v23 = vld [vmem:[%s8513_s1 + $0x50] sm:$0xff] }
   0x6   :  { %4602 = vmatpush1.bf16.msra.mxu0 %v4601_v9  ;;  %v266_v20 = vld [vmem:[%s8513_s1 + $0x60] sm:$0xf]  ;;  %v4613_v21 = vpack.c.bf16 %v269_v18, %v265_v16  ;;  %v268_v24 = vld [vmem:[%s8513_s1 + $0x70] sm:$0xf]  ;;  %v33_v26 = vld [vmem:[%s8514_s2 + $0x8] sm:$0xff] }
   0x7   :  { %4612 = vmatpush1.bf16.msra.mxu1 %v4611_v13  ;;  %v4606_v22 = vpack.c.bf16 %v266_v20, %v262_v19  ;;  %4605 = vmatprep.subr.msk.bf16.mxu0 %vm6622_vm2, %v4603_v17  ;;  %v4616_v25 = vpack.c.bf16 %v268_v24, %v264_v23  ;;  %v37_v27 = vld [vmem:[%s8514_s2 + $0x28] sm:$0xff]  ;;  %v35_v28 = vld [vmem:[%s8514_s2 + $0x18] sm:$0xff]  ;;  %v32_v31 = vld [vmem:[%s8514_s2] sm:$0xff] }
   0x8   :  { %4615 = vmatprep.subr.msk.bf16.mxu1 %vm6622_vm2, %v4613_v21  ;;  %v6657_v29 = vpack.c.bf16 %v37_v27, %v33_v26  ;;  %v39_v30 = vld [vmem:[%s8514_s2 + $0x38] sm:$0xff]  ;;  %v36_v32 = vld [vmem:[%s8514_s2 + $0x20] sm:$0xff]  ;;  %v34_v36 = vld [vmem:[%s8514_s2 + $0x10] sm:$0xff] }
   0x9   :  { %v246_v33 = vld [vmem:[%s8515_s0] sm:$0xff]  ;;  %v6673_v34 = vpack.c.bf16 %v39_v30, %v35_v28  ;;  %v6675_v35 = vpack.c.bf16 %v36_v32, %v32_v31  ;;  %v38_v37 = vld [vmem:[%s8514_s2 + $0x30] sm:$0xff]  ;;  %v41_v39 = vld [vmem:[%s8514_s2 + $0x48] sm:$0xff] }
   0xa   :  { %8727 = vst [vmem:[#allocation2_spill] sm:$0xff] %v6657_v29  ;;  %4608 = vmatpush1.bf16.msk.msra.mxu0 %vm6622_vm2, %v4606_v22  ;;  %v6686_v38 = vpack.c.bf16 %v38_v37, %v34_v36  ;;  %v45_v40 = vld [vmem:[%s8514_s2 + $0x68] sm:$0xff]  ;;  %v43_v41 = vld [vmem:[%s8514_s2 + $0x58] sm:$0xff]  ;;  %v40_v44 = vld [vmem:[%s8514_s2 + $0x40] sm:$0xff] }
   0xb   :  { %8728 = vst [vmem:[#allocation3_spill] sm:$0xff] %v6673_v34  ;;  %4618 = vmatpush1.bf16.msk.msra.mxu1 %vm6622_vm2, %v4616_v25  ;;  %4620 = vmatprep.subr.bf16.mxu0 %v6657_v29  ;;  %v6698_v42 = vpack.c.bf16 %v45_v40, %v41_v39  ;;  %v47_v43 = vld [vmem:[%s8514_s2 + $0x78] sm:$0xff]  ;;  %v44_v45 = vld [vmem:[%s8514_s2 + $0x60] sm:$0xff]  ;;  %v247_v46 = vld [vmem:[%s8515_s0 + $0x8] sm:$0xff] }
   0xc   :  { %4652 = vmatprep.subr.bf16.mxu1 %v6673_v34  ;;  %v6713_v47 = vpack.c.bf16 %v47_v43, %v43_v41  ;;  %v42_v48 = vld [vmem:[%s8514_s2 + $0x50] sm:$0xff]  ;;  %v6723_v50 = vpack.c.bf16 %v44_v45, %v40_v44  ;;  %v49_v51 = vld [vmem:[%s8514_s2 + $0x88] sm:$0xff]  ;;  %v51_v53 = vld [vmem:[%s8514_s2 + $0x98] sm:$0xff] }
   0xd   :  { %4480 = vmatmul.mubr.msk.f32.vlgmr.msra.gmra.mrb[0].mxu0 %vm292_vm3, %v246_v33  ;;  %v46_v49 = vld [vmem:[%s8514_s2 + $0x70] sm:$0xff]  ;;  %v53_v52 = vld [vmem:[%s8514_s2 + $0xa8] sm:$0xff]  ;;  %v55_v55 = vld [vmem:[%s8514_s2 + $0xb8] sm:$0xff] }
   0xe   :  { %4490 = vmatmul.mubr.msk.f32.vlgmr.msra.gmra.mrb[0].mxu1 %vm292_vm3, %v246_v33  ;;  %4622 = vmatpush1.bf16.msra.mxu0 %v6675_v35  ;;  %v6736_v54 = vpack.c.bf16 %v46_v49, %v42_v48  ;;  %v48_v56 = vld [vmem:[%s8514_s2 + $0x80] sm:$0xff]  ;;  %v6749_v58 = vpack.c.bf16 %v53_v52, %v49_v51  ;;  %v50_v59 = vld [vmem:[%s8514_s2 + $0x90] sm:$0xff]  ;;  %v6759_v61 = vpack.c.bf16 %v55_v55, %v51_v53  ;;  %v57_v62 = vld [vmem:[%s8514_s2 + $0xc8] sm:$0xff] }
   0xf   :  { %4654 = vmatpush1.bf16.msra.mxu1 %v6686_v38  ;;  %400 = vmatprep.mubr.f32.mxu0 %v8523_v3  ;;  %v52_v57 = vld [vmem:[%s8514_s2 + $0xa0] sm:$0xff]  ;;  %v54_v60 = vld [vmem:[%s8514_s2 + $0xb0] sm:$0xff]  ;;  %v61_v63 = vld [vmem:[%s8514_s2 + $0xe8] sm:$0xff] }
  0x10   :  { %513 = vmatprep.mubr.f32.mxu1 %v8523_v3  ;;  %4624 = vmatprep.subr.bf16.mxu0 %v6698_v42  ;;  %8729 = vst [vmem:[#allocation4_spill] sm:$0xff] %v6749_v58  ;;  %8730 = vst [vmem:[#allocation5_spill] sm:$0xff] %v6759_v61  ;;  %v248_v0 = vld [vmem:[%s8515_s0 + $0x10] sm:$0xff]  ;;  %v6772_v1 = vpack.c.bf16 %v52_v57, %v48_v56  ;;  %v59_v2 = vld [vmem:[%s8514_s2 + $0xd8] sm:$0xff]  ;;  %v6782_v5 = vpack.c.bf16 %v54_v60, %v50_v59 }
  0x11   :  { %4481 = vmatmul.mubr.msk.f32.gmra.mrb[2].mxu0 %vm292_vm3, %v247_v46  ;;  %4656 = vmatprep.subr.bf16.mxu1 %v6713_v47  ;;  %v63_v4 = vld [vmem:[%s8514_s2 + $0xf8] sm:$0xff]  ;;  %v56_v6 = vld [vmem:[%s8514_s2 + $0xc0] sm:$0xff]  ;;  %v6792_v8 = vpack.c.bf16 %v61_v63, %v57_v62  ;;  %v58_v9 = vld [vmem:[%s8514_s2 + $0xd0] sm:$0xff] }
  0x12   :  { %4491 = vmatmul.mubr.msk.f32.gmra.mrb[2].mxu1 %vm292_vm3, %v247_v46  ;;  %4626 = vmatpush1.bf16.msra.mxu0 %v6723_v50  ;;  %8731 = vst [vmem:[#allocation6_spill] sm:$0xff] %v6772_v1  ;;  %8732 = vst [vmem:[#allocation7_spill] sm:$0xff] %v6782_v5  ;;  %v60_v7 = vld [vmem:[%s8514_s2 + $0xe0] sm:$0xff]  ;;  %v62_v10 = vld [vmem:[%s8514_s2 + $0xf0] sm:$0xff]  ;;  %v6802_v11 = vpack.c.bf16 %v63_v4, %v59_v2 }
  0x13   :  { %4658 = vmatpush1.bf16.msra.mxu1 %v6736_v54  ;;  %406 = vmatprep.mubr.f32.mxu0 %v8523_v3  ;;  %8733 = vst [vmem:[#allocation8_spill] sm:$0xff] %v6792_v8  ;;  %v65_v12 = vld [vmem:[%s8514_s2 + $0x108] sm:$0xff]  ;;  %v249_v14 = vld [vmem:[%s8515_s0 + $0x18] sm:$0xff]  ;;  %v6815_v15 = vpack.c.bf16 %v60_v7, %v56_v6  ;;  %v6825_v18 = vpack.c.bf16 %v62_v10, %v58_v9  ;;  %v64_v19 = vld [vmem:[%s8514_s2 + $0x100] sm:$0xff] }
  0x14   :  { %519 = vmatprep.mubr.f32.mxu1 %v8523_v3  ;;  %4628 = vmatprep.subr.bf16.mxu0 %v6749_v58  ;;  %8734 = vst [vmem:[#allocation9_spill] sm:$0xff] %v6802_v11  ;;  %v69_v13 = vld [vmem:[%s8514_s2 + $0x128] sm:$0xff]  ;;  %v67_v16 = vld [vmem:[%s8514_s2 + $0x118] sm:$0xff]  ;;  %v68_v20 = vld [vmem:[%s8514_s2 + $0x120] sm:$0xff] }
  0x15   :  { %4482 = vmatmul.mubr.msk.f32.gmra.mrb[4].mxu0 %vm292_vm3, %v248_v0  ;;  %4660 = vmatprep.subr.bf16.mxu1 %v6759_v61  ;;  %8735 = vst [vmem:[#allocation10_spill] sm:$0xff] %v6815_v15  ;;  %v71_v17 = vld [vmem:[%s8514_s2 + $0x138] sm:$0xff]  ;;  %8736 = vst [vmem:[#allocation11_spill] sm:$0xff] %v6825_v18  ;;  %v6835_v21 = vpack.c.bf16 %v69_v13, %v65_v12  ;;  %v66_v22 = vld [vmem:[%s8514_s2 + $0x110] sm:$0xff]  ;;  %v6858_v28 = vpack.c.bf16 %v68_v20, %v64_v19 }
  0x16   :  { %4492 = vmatmul.mubr.msk.f32.gmra.mrb[4].mxu1 %vm292_vm3, %v248_v0  ;;  %4630 = vmatpush1.bf16.msra.mxu0 %v6772_v1  ;;  %v70_v23 = vld [vmem:[%s8514_s2 + $0x130] sm:$0xff]  ;;  %v6845_v24 = vpack.c.bf16 %v71_v17, %v67_v16  ;;  %v73_v25 = vld [vmem:[%s8514_s2 + $0x148] sm:$0xff]  ;;  %v250_v27 = vld [vmem:[%s8515_s0 + $0x20] sm:$0xff] }
  0x17   :  { %4662 = vmatpush1.bf16.msra.mxu1 %v6782_v5  ;;  %412 = vmatprep.mubr.f32.mxu0 %v8523_v3  ;;  %8737 = vst [vmem:[#allocation12_spill] sm:$0xff] %v6835_v21  ;;  %v77_v26 = vld [vmem:[%s8514_s2 + $0x168] sm:$0xff]  ;;  %8739 = vst [vmem:[#allocation14_spill] sm:$0xff] %v6858_v28  ;;  %v75_v30 = vld [vmem:[%s8514_s2 + $0x158] sm:$0xff]  ;;  %v6868_v32 = vpack.c.bf16 %v70_v23, %v66_v22 }
  0x18   :  { %525 = vmatprep.mubr.f32.mxu1 %v8523_v3  ;;  %4632 = vmatprep.subr.bf16.mxu0 %v6792_v8  ;;  %8738 = vst [vmem:[#allocation13_spill] sm:$0xff] %v6845_v24  ;;  %v79_v31 = vld [vmem:[%s8514_s2 + $0x178] sm:$0xff]  ;;  %v72_v33 = vld [vmem:[%s8514_s2 + $0x140] sm:$0xff]  ;;  %v6878_v37 = vpack.c.bf16 %v77_v26, %v73_v25  ;;  %v74_v39 = vld [vmem:[%s8514_s2 + $0x150] sm:$0xff] }
  0x19   :  { %4483 = vmatmul.mubr.msk.f32.gmra.mrb[6].mxu0 %vm292_vm3, %v249_v14  ;;  %4664 = vmatprep.subr.bf16.mxu1 %v6802_v11  ;;  %8740 = vst [vmem:[#allocation15_spill] sm:$0xff] %v6868_v32  ;;  %v76_v36 = vld [vmem:[%s8514_s2 + $0x160] sm:$0xff]  ;;  %v78_v40 = vld [vmem:[%s8514_s2 + $0x170] sm:$0xff]  ;;  %v6888_v41 = vpack.c.bf16 %v79_v31, %v75_v30  ;;  %v81_v43 = vld [vmem:[%s8514_s2 + $0x188] sm:$0xff] }
  0x1a   :  { %4493 = vmatmul.mubr.msk.f32.gmra.mrb[6].mxu1 %vm292_vm3, %v249_v14  ;;  %4634 = vmatpush1.bf16.msra.mxu0 %v6815_v15  ;;  %8741 = vst [vmem:[#allocation16_spill] sm:$0xff] %v6878_v37  ;;  %v85_v44 = vld [vmem:[%s8514_s2 + $0x1a8] sm:$0xff]  ;;  %v6901_v46 = vpack.c.bf16 %v76_v36, %v72_v33  ;;  %v83_v48 = vld [vmem:[%s8514_s2 + $0x198] sm:$0xff]  ;;  %v6911_v51 = vpack.c.bf16 %v78_v40, %v74_v39  ;;  %v80_v52 = vld [vmem:[%s8514_s2 + $0x180] sm:$0xff] }
  0x1b   :  { %4666 = vmatpush1.bf16.msra.mxu1 %v6825_v18  ;;  %418 = vmatprep.mubr.f32.mxu0 %v8523_v3  ;;  %8742 = vst [vmem:[#allocation17_spill] sm:$0xff] %v6888_v41  ;;  %v251_v45 = vld [vmem:[%s8515_s0 + $0x28] sm:$0xff]  ;;  %v87_v49 = vld [vmem:[%s8514_s2 + $0x1b8] sm:$0xff]  ;;  %v84_v53 = vld [vmem:[%s8514_s2 + $0x1a0] sm:$0xff]  ;;  %v6921_v55 = vpack.c.bf16 %v85_v44, %v81_v43 }
  0x1c   :  { %531 = vmatprep.mubr.f32.mxu1 %v8523_v3  ;;  %4636 = vmatprep.subr.bf16.mxu0 %v6835_v21  ;;  %8743 = vst [vmem:[#allocation18_spill] sm:$0xff] %v6901_v46  ;;  %8744 = vst [vmem:[#allocation19_spill] sm:$0xff] %v6911_v51  ;;  %v82_v56 = vld [vmem:[%s8514_s2 + $0x190] sm:$0xff]  ;;  %v6931_v59 = vpack.c.bf16 %v87_v49, %v83_v48  ;;  %v89_v60 = vld [vmem:[%s8514_s2 + $0x1c8] sm:$0xff]  ;;  %v6944_v0 = vpack.c.bf16 %v84_v53, %v80_v52 }
  0x1d   :  { %4484 = vmatmul.mubr.msk.f32.gmra.mrb[8].mxu0 %vm292_vm3, %v250_v27  ;;  %4668 = vmatprep.subr.bf16.mxu1 %v6845_v24  ;;  %8745 = vst [vmem:[#allocation20_spill] sm:$0xff] %v6921_v55  ;;  %v86_v57 = vld [vmem:[%s8514_s2 + $0x1b0] sm:$0xff]  ;;  %v93_v62 = vld [vmem:[%s8514_s2 + $0x1e8] sm:$0xff]  ;;  %v91_v2 = vld [vmem:[%s8514_s2 + $0x1d8] sm:$0xff] }
  0x1e   :  { %4494 = vmatmul.mubr.msk.f32.gmra.mrb[8].mxu1 %vm292_vm3, %v250_v27  ;;  %4638 = vmatpush1.bf16.msra.mxu0 %v6858_v28  ;;  %8746 = vst [vmem:[#allocation21_spill] sm:$0xff] %v6931_v59  ;;  %v252_v63 = vld [vmem:[%s8515_s0 + $0x30] sm:$0xff]  ;;  %8747 = vst [vmem:[#allocation22_spill] sm:$0xff] %v6944_v0  ;;  %v95_v4 = vld [vmem:[%s8514_s2 + $0x1f8] sm:$0xff]  ;;  %v6954_v6 = vpack.c.bf16 %v86_v57, %v82_v56  ;;  %v6964_v10 = vpack.c.bf16 %v93_v62, %v89_v60 }
  0x1f   :  { %4670 = vmatpush1.bf16.msra.mxu1 %v6868_v32  ;;  %424 = vmatprep.mubr.f32.mxu0 %v8523_v3  ;;  %v88_v7 = vld [vmem:[%s8514_s2 + $0x1c0] sm:$0xff]  ;;  %v90_v12 = vld [vmem:[%s8514_s2 + $0x1d0] sm:$0xff]  ;;  %v6974_v14 = vpack.c.bf16 %v95_v4, %v91_v2  ;;  %v161_v16 = vld [vmem:[%s8516_s5 + $0x8] sm:$0xff] }
  0x20   :  { %537 = vmatprep.mubr.f32.mxu1 %v8523_v3  ;;  %4640 = vmatprep.subr.bf16.mxu0 %v6878_v37  ;;  %8748 = vst [vmem:[#allocation23_spill] sm:$0xff] %v6954_v6  ;;  %v92_v9 = vld [vmem:[%s8514_s2 + $0x1e0] sm:$0xff]  ;;  %8749 = vst [vmem:[#allocation24_spill] sm:$0xff] %v6964_v10  ;;  %v94_v13 = vld [vmem:[%s8514_s2 + $0x1f0] sm:$0xff] }
  0x21   :  { %4485 = vmatmul.mubr.msk.f32.gmra.mrb[10].mxu0 %vm292_vm3, %v251_v45  ;;  %4672 = vmatprep.subr.bf16.mxu1 %v6888_v41  ;;  %8750 = vst [vmem:[#allocation25_spill] sm:$0xff] %v6974_v14  ;;  %v165_v17 = vld [vmem:[%s8516_s5 + $0x28] sm:$0xff]  ;;  %v253_v19 = vld [vmem:[%s8515_s0 + $0x38] sm:$0xff]  ;;  %v6987_v20 = vpack.c.bf16 %v92_v9, %v88_v7  ;;  %v6997_v25 = vpack.c.bf16 %v94_v13, %v90_v12  ;;  %v160_v26 = vld [vmem:[%s8516_s5] sm:$0xff] }
  0x22   :  { %4495 = vmatmul.mubr.msk.f32.gmra.mrb[10].mxu1 %vm292_vm3, %v251_v45  ;;  %4642 = vmatpush1.bf16.msra.mxu0 %v6901_v46  ;;  %v163_v22 = vld [vmem:[%s8516_s5 + $0x18] sm:$0xff]  ;;  %v164_v27 = vld [vmem:[%s8516_s5 + $0x20] sm:$0xff]  ;;  %v162_v30 = vld [vmem:[%s8516_s5 + $0x10] sm:$0xff]  ;;  %v7010_v31 = vpack.c.bf16 %v165_v17, %v161_v16 }
  0x23   :  { %4674 = vmatpush1.bf16.msra.mxu1 %v6911_v51  ;;  %430 = vmatprep.mubr.f32.mxu0 %v8523_v3  ;;  %8751 = vst [vmem:[#allocation26_spill] sm:$0xff] %v6987_v20  ;;  %v167_v23 = vld [vmem:[%s8516_s5 + $0x38] sm:$0xff]  ;;  %8752 = vst [vmem:[#allocation27_spill] sm:$0xff] %v6997_v25  ;;  %v166_v33 = vld [vmem:[%s8516_s5 + $0x30] sm:$0xff]  ;;  %v7033_v45 = vpack.c.bf16 %v164_v27, %v160_v26 }
  0x24   :  { %543 = vmatprep.mubr.f32.mxu1 %v8523_v3  ;;  %4644 = vmatprep.subr.bf16.mxu0 %v6921_v55  ;;  %8753 = vst [vmem:[#allocation28_spill] sm:$0xff] %v7010_v31  ;;  %v169_v36 = vld [vmem:[%s8516_s5 + $0x48] sm:$0xff]  ;;  %v7023_v40 = vpack.c.bf16 %v167_v23, %v163_v22  ;;  %v171_v43 = vld [vmem:[%s8516_s5 + $0x58] sm:$0xff]  ;;  %v7037_v48 = vpack.c.bf16 %v166_v33, %v162_v30  ;;  %v168_v52 = vld [vmem:[%s8516_s5 + $0x40] sm:$0xff] }
  0x25   :  { %4486 = vmatmul.mubr.msk.f32.gmra.mrb[12].mxu0 %vm292_vm3, %v252_v63  ;;  %4676 = vmatprep.subr.bf16.mxu1 %v6931_v59  ;;  %v173_v39 = vld [vmem:[%s8516_s5 + $0x68] sm:$0xff]  ;;  %v175_v44 = vld [vmem:[%s8516_s5 + $0x78] sm:$0xff]  ;;  %8755 = vst [vmem:[#allocation30_spill] sm:$0xff] %v7033_v45  ;;  %v172_v53 = vld [vmem:[%s8516_s5 + $0x60] sm:$0xff] }
  0x26   :  { %4496 = vmatmul.mubr.msk.f32.gmra.mrb[12].mxu1 %vm292_vm3, %v252_v63  ;;  %4646 = vmatpush1.bf16.msra.mxu0 %v6944_v0  ;;  %8754 = vst [vmem:[#allocation29_spill] sm:$0xff] %v7023_v40  ;;  %8756 = vst [vmem:[#allocation31_spill] sm:$0xff] %v7037_v48  ;;  %v7039_v49 = vpack.c.bf16 %v173_v39, %v169_v36  ;;  %v170_v56 = vld [vmem:[%s8516_s5 + $0x50] sm:$0xff]  ;;  %v7052_v57 = vpack.c.bf16 %v175_v44, %v171_v43  ;;  %v177_v62 = vld [vmem:[%s8516_s5 + $0x88] sm:$0xff] }
  0x27   :  { %4678 = vmatpush1.bf16.msra.mxu1 %v6954_v6  ;;  %436 = vmatprep.mubr.f32.mxu0 %v8523_v3  ;;  %v174_v60 = vld [vmem:[%s8516_s5 + $0x70] sm:$0xff]  ;;  %v181_v63 = vld [vmem:[%s8516_s5 + $0xa8] sm:$0xff]  ;;  %v179_v2 = vld [vmem:[%s8516_s5 + $0x98] sm:$0xff]  ;;  %v7073_v7 = vpack.c.bf16 %v172_v53, %v168_v52 }
  0x28   :  { %549 = vmatprep.mubr.f32.mxu1 %v8523_v3  ;;  %4648 = vmatprep.subr.bf16.mxu0 %v6964_v10  ;;  %8757 = vst [vmem:[#allocation32_spill] sm:$0xff] %v7039_v49  ;;  %8758 = vst [vmem:[#allocation33_spill] sm:$0xff] %v7052_v57  ;;  %v183_v4 = vld [vmem:[%s8516_s5 + $0xb8] sm:$0xff]  ;;  %v7077_v9 = vpack.c.bf16 %v174_v60, %v170_v56  ;;  %v7079_v12 = vpack.c.bf16 %v181_v63, %v177_v62  ;;  %v176_v13 = vld [vmem:[%s8516_s5 + $0x80] sm:$0xff] }
  0x29   :  { %4487 = vmatmul.mubr.msk.f32.gmra.mrb[14].mxu0 %vm292_vm3, %v253_v19  ;;  %4680 = vmatprep.subr.bf16.mxu1 %v6974_v14  ;;  %8759 = vst [vmem:[#allocation34_spill] sm:$0xff] %v7073_v7  ;;  %v180_v16 = vld [vmem:[%s8516_s5 + $0xa0] sm:$0xff]  ;;  %v178_v17 = vld [vmem:[%s8516_s5 + $0x90] sm:$0xff]  ;;  %v185_v23 = vld [vmem:[%s8516_s5 + $0xc8] sm:$0xff] }
  0x2a   :  { %4497 = vmatmul.mubr.msk.f32.gmra.mrb[14].mxu1 %vm292_vm3, %v253_v19  ;;  %4650 = vmatpush1.bf16.msra.mxu0 %v6987_v20  ;;  %8760 = vst [vmem:[#allocation35_spill] sm:$0xff] %v7077_v9  ;;  %8761 = vst [vmem:[#allocation36_spill] sm:$0xff] %v7079_v12  ;;  %v7091_v19 = vpack.c.bf16 %v183_v4, %v179_v2  ;;  %v182_v22 = vld [vmem:[%s8516_s5 + $0xb0] sm:$0xff]  ;;  %v189_v26 = vld [vmem:[%s8516_s5 + $0xe8] sm:$0xff]  ;;  %v7111_v33 = vpack.c.bf16 %v180_v16, %v176_v13 }
  0x2b   :  { %4682 = vmatpush1.bf16.msra.mxu1 %v6997_v25  ;;  %620 = vmatprep.mubr.f32.mxu0 %v8523_v3  ;;  %v187_v27 = vld [vmem:[%s8516_s5 + $0xd8] sm:$0xff]  ;;  %v7115_v36 = vpack.c.bf16 %v182_v22, %v178_v17  ;;  %v7117_v39 = vpack.c.bf16 %v189_v26, %v185_v23  ;;  %v184_v43 = vld [vmem:[%s8516_s5 + $0xc0] sm:$0xff]  ;;  %v186_v52 = vld [vmem:[%s8516_s5 + $0xd0] sm:$0xff] }
  0x2c   :  { %691 = vmatprep.mubr.f32.mxu1 %v8523_v3  ;;  %4684 = vmatprep.subr.bf16.mxu0 %v7010_v31  ;;  %8762 = vst [vmem:[#allocation37_spill] sm:$0xff] %v7091_v19  ;;  %v191_v30 = vld [vmem:[%s8516_s5 + $0xf8] sm:$0xff]  ;;  %8763 = vst [vmem:[#allocation38_spill] sm:$0xff] %v7111_v33  ;;  %v188_v44 = vld [vmem:[%s8516_s5 + $0xe0] sm:$0xff] }
  0x2d   :  { %621 = vmatmul.mubr.f32.vlgmr.msra.gmra.mrb[0].mxu0 %v8523_v3  ;;  %4716 = vmatprep.subr.bf16.mxu1 %v7023_v40  ;;  %8764 = vst [vmem:[#allocation39_spill] sm:$0xff] %v7115_v36  ;;  %8765 = vst [vmem:[#allocation40_spill] sm:$0xff] %v7117_v39  ;;  %v7129_v53 = vpack.c.bf16 %v191_v30, %v187_v27  ;;  %v190_v56 = vld [vmem:[%s8516_s5 + $0xf0] sm:$0xff]  ;;  %v193_v60 = vld [vmem:[%s8516_s5 + $0x108] sm:$0xff]  ;;  %v7147_v4 = vpack.c.bf16 %v188_v44, %v184_v43 }
  0x2e   :  { %692 = vmatmul.mubr.f32.vlgmr.msra.gmra.mrb[0].mxu1 %v8523_v3  ;;  %4686 = vmatpush1.bf16.msra.mxu0 %v7033_v45  ;;  %v197_v62 = vld [vmem:[%s8516_s5 + $0x128] sm:$0xff]  ;;  %v195_v63 = vld [vmem:[%s8516_s5 + $0x118] sm:$0xff]  ;;  %v7151_v13 = vpack.c.bf16 %v190_v56, %v186_v52  ;;  %v192_v17 = vld [vmem:[%s8516_s5 + $0x100] sm:$0xff] }
  0x2f   :  { %4718 = vmatpush1.bf16.msra.mxu1 %v7037_v48  ;;  %4688 = vmatprep.subr.bf16.mxu0 %v7039_v49  ;;  %8766 = vst [vmem:[#allocation41_spill] sm:$0xff] %v7129_v53  ;;  %v199_v2 = vld [vmem:[%s8516_s5 + $0x138] sm:$0xff]  ;;  %8767 = vst [vmem:[#allocation42_spill] sm:$0xff] %v7147_v4  ;;  %v7153_v16 = vpack.c.bf16 %v197_v62, %v193_v60  ;;  %v196_v22 = vld [vmem:[%s8516_s5 + $0x120] sm:$0xff] }
  0x30   :  { %4720 = vmatprep.subr.bf16.mxu1 %v7052_v57  ;;  %786 = vmatprep.mubr.f32.mxu0 %v8523_v3  ;;  %8768 = vst [vmem:[#allocation43_spill] sm:$0xff] %v7151_v13  ;;  %v7162_v23 = vpack.c.bf16 %v199_v2, %v195_v63  ;;  %v194_v26 = vld [vmem:[%s8516_s5 + $0x110] sm:$0xff]  ;;  %v7171_v30 = vpack.c.bf16 %v196_v22, %v192_v17  ;;  %v201_v44 = vld [vmem:[%s8516_s5 + $0x148] sm:$0xff]  ;;  %v203_v56 = vld [vmem:[%s8516_s5 + $0x158] sm:$0xff] }
  0x31   :  { %857 = vmatprep.mubr.f32.mxu1 %v8523_v3  ;;  %8769 = vst [vmem:[#allocation44_spill] sm:$0xff] %v7153_v16  ;;  %v198_v27 = vld [vmem:[%s8516_s5 + $0x130] sm:$0xff]  ;;  %v205_v52 = vld [vmem:[%s8516_s5 + $0x168] sm:$0xff]  ;;  %v207_v62 = vld [vmem:[%s8516_s5 + $0x178] sm:$0xff] }
  0x32   :  { %4690 = vmatpush1.bf16.msra.mxu0 %v7073_v7  ;;  %8770 = vst [vmem:[#allocation45_spill] sm:$0xff] %v7162_v23  ;;  %8771 = vst [vmem:[#allocation46_spill] sm:$0xff] %v7171_v30  ;;  %v7175_v43 = vpack.c.bf16 %v198_v27, %v194_v26  ;;  %v7189_v60 = vpack.c.bf16 %v205_v52, %v201_v44  ;;  %v200_v63 = vld [vmem:[%s8516_s5 + $0x140] sm:$0xff]  ;;  %v7200_v17 = vpack.c.bf16 %v207_v62, %v203_v56  ;;  %v202_v26 = vld [vmem:[%s8516_s5 + $0x150] sm:$0xff] }
  0x33   :  { %4722 = vmatpush1.bf16.msra.mxu1 %v7077_v9  ;;  %4692 = vmatprep.subr.bf16.mxu0 %v7079_v12  ;;  %v204_v2 = vld [vmem:[%s8516_s5 + $0x160] sm:$0xff]  ;;  %v206_v27 = vld [vmem:[%s8516_s5 + $0x170] sm:$0xff]  ;;  %v209_v52 = vld [vmem:[%s8516_s5 + $0x188] sm:$0xff] }
  0x34   :  { %4724 = vmatprep.subr.bf16.mxu1 %v7091_v19  ;;  %8772 = vst [vmem:[#allocation47_spill] sm:$0xff] %v7175_v43  ;;  %8773 = vst [vmem:[#allocation48_spill] sm:$0xff] %v7189_v60  ;;  %v7202_v22 = vpack.c.bf16 %v204_v2, %v200_v63  ;;  %v7211_v44 = vpack.c.bf16 %v206_v27, %v202_v26  ;;  %v213_v56 = vld [vmem:[%s8516_s5 + $0x1a8] sm:$0xff]  ;;  %v211_v62 = vld [vmem:[%s8516_s5 + $0x198] sm:$0xff] }
  0x35   :  { %8774 = vst [vmem:[#allocation49_spill] sm:$0xff] %v7200_v17  ;;  %v7225_v63 = vpack.c.bf16 %v213_v56, %v209_v52  ;;  %v215_v2 = vld [vmem:[%s8516_s5 + $0x1b8] sm:$0xff]  ;;  %v208_v26 = vld [vmem:[%s8516_s5 + $0x180] sm:$0xff]  ;;  %v210_v52 = vld [vmem:[%s8516_s5 + $0x190] sm:$0xff] }
  0x36   :  { %4694 = vmatpush1.bf16.msra.mxu0 %v7111_v33  ;;  %8775 = vst [vmem:[#allocation50_spill] sm:$0xff] %v7202_v22  ;;  %8776 = vst [vmem:[#allocation51_spill] sm:$0xff] %v7211_v44  ;;  %v212_v27 = vld [vmem:[%s8516_s5 + $0x1a0] sm:$0xff]  ;;  %v7236_v3 = vpack.c.bf16 %v215_v2, %v211_v62  ;;  %v214_v56 = vld [vmem:[%s8516_s5 + $0x1b0] sm:$0xff] }
  0x37   :  { %4726 = vmatpush1.bf16.msra.mxu1 %v7115_v36  ;;  %4696 = vmatprep.subr.bf16.mxu0 %v7117_v39  ;;  %8777 = vst [vmem:[#allocation52_spill] sm:$0xff] %v7225_v63  ;;  %v217_v62 = vld [vmem:[%s8516_s5 + $0x1c8] sm:$0xff] }
  0x38   :  { %4728 = vmatprep.subr.bf16.mxu1 %v7129_v53  ;;  %8778 = vst [vmem:[#allocation53_spill] sm:$0xff] %v7236_v3  ;;  %v221_v2 = vld [vmem:[%s8516_s5 + $0x1e8] sm:$0xff] }
  0x3a   :  { %4698 = vmatpush1.bf16.msra.mxu0 %v7147_v4 }
  0x3b   :  { %4730 = vmatpush1.bf16.msra.mxu1 %v7151_v13  ;;  %4700 = vmatprep.subr.bf16.mxu0 %v7153_v16 }
  0x3c   :  { %4732 = vmatprep.subr.bf16.mxu1 %v7162_v23 }
  0x3e   :  { %4702 = vmatpush1.bf16.msra.mxu0 %v7171_v30 }
  0x3f   :  { %4734 = vmatpush1.bf16.msra.mxu1 %v7175_v43  ;;  %4704 = vmatprep.subr.bf16.mxu0 %v7189_v60 }
  0x40   :  { %4736 = vmatprep.subr.bf16.mxu1 %v7200_v17 }
  0x42   :  { %4706 = vmatpush1.bf16.msra.mxu0 %v7202_v22  ;;  %v7238_v22 = vpack.c.bf16 %v212_v27, %v208_v26  ;;  %v219_v26 = vld [vmem:[%s8516_s5 + $0x1d8] sm:$0xff]  ;;  %v7261_v27 = vpack.c.bf16 %v221_v2, %v217_v62  ;;  %v218_v62 = vld [vmem:[%s8516_s5 + $0x1d0] sm:$0xff] }
  0x43   :  { %4738 = vmatpush1.bf16.msra.mxu1 %v7211_v44  ;;  %4708 = vmatprep.subr.bf16.mxu0 %v7225_v63  ;;  %v7247_v44 = vpack.c.bf16 %v214_v56, %v210_v52  ;;  %v223_v52 = vld [vmem:[%s8516_s5 + $0x1f8] sm:$0xff]  ;;  %v216_v56 = vld [vmem:[%s8516_s5 + $0x1c0] sm:$0xff]  ;;  %v222_v2 = vld [vmem:[%s8516_s5 + $0x1f0] sm:$0xff] }
  0x44   :  { %8779 = vst [vmem:[#allocation54_spill] sm:$0xff] %v7238_v22  ;;  %4740 = vmatprep.subr.bf16.mxu1 %v7236_v3  ;;  %8781 = vst [vmem:[#allocation56_spill] sm:$0xff] %v7261_v27  ;;  %v7272_v3 = vpack.c.bf16 %v223_v52, %v219_v26  ;;  %v101_v26 = vld [vmem:[%s8517_s4 + $0x28] sm:$0xff]  ;;  %v99_v52 = vld [vmem:[%s8517_s4 + $0x18] sm:$0xff] }
  0x45   :  { %8780 = vst [vmem:[#allocation55_spill] sm:$0xff] %v7247_v44 }
  0x46   :  { %4710 = vmatpush1.bf16.msra.mxu0 %v7238_v22  ;;  %v220_v22 = vld [vmem:[%s8516_s5 + $0x1e0] sm:$0xff]  ;;  %8782 = vst [vmem:[#allocation57_spill] sm:$0xff] %v7272_v3 }
  0x47   :  { %4742 = vmatpush1.bf16.msra.mxu1 %v7247_v44  ;;  %v7274_v63 = vpack.c.bf16 %v220_v22, %v216_v56  ;;  %4712 = vmatprep.subr.bf16.mxu0 %v7261_v27  ;;  %v7283_v44 = vpack.c.bf16 %v222_v2, %v218_v62  ;;  %v97_v22 = vld [vmem:[%s8517_s4 + $0x8] sm:$0xff]  ;;  %v103_v62 = vld [vmem:[%s8517_s4 + $0x38] sm:$0xff]  ;;  %v96_v2 = vld [vmem:[%s8517_s4] sm:$0xff] }
  0x48   :  { %4744 = vmatprep.subr.bf16.mxu1 %v7272_v3  ;;  %v7297_v56 = vpack.c.bf16 %v101_v26, %v97_v22  ;;  %v7308_v3 = vpack.c.bf16 %v103_v62, %v99_v52  ;;  %v98_v22 = vld [vmem:[%s8517_s4 + $0x10] sm:$0xff]  ;;  %v109_v52 = vld [vmem:[%s8517_s4 + $0x68] sm:$0xff]  ;;  %v107_v62 = vld [vmem:[%s8517_s4 + $0x58] sm:$0xff] }
  0x49   :  { %8783 = vst [vmem:[#allocation58_spill] sm:$0xff] %v7274_v63  ;;  %8784 = vst [vmem:[#allocation59_spill] sm:$0xff] %v7283_v44  ;;  %v102_v26 = vld [vmem:[%s8517_s4 + $0x30] sm:$0xff] }
  0x4a   :  { %4714 = vmatpush1.bf16.msra.mxu0 %v7274_v63  ;;  %8785 = vst [vmem:[#allocation60_spill] sm:$0xff] %v7297_v56  ;;  %v100_v63 = vld [vmem:[%s8517_s4 + $0x20] sm:$0xff]  ;;  %8786 = vst [vmem:[#allocation61_spill] sm:$0xff] %v7308_v3  ;;  %v7320_v17 = vpack.c.bf16 %v102_v26, %v98_v22  ;;  %v111_v22 = vld [vmem:[%s8517_s4 + $0x78] sm:$0xff] }
  0x4b   :  { %4746 = vmatpush1.bf16.msra.mxu1 %v7283_v44  ;;  %v7310_v27 = vpack.c.bf16 %v100_v63, %v96_v2  ;;  %4748 = vmatprep.subr.bf16.mxu0 %v7297_v56  ;;  %v8788_v44 = vmov 0.0   ;;  %v105_v63 = vld [vmem:[%s8517_s4 + $0x48] sm:$0xff]  ;;  %v104_v26 = vld [vmem:[%s8517_s4 + $0x40] sm:$0xff]  ;;  %v7346_v56 = vpack.c.bf16 %v111_v22, %v107_v62  ;;  %v115_v22 = vld [vmem:[%s8517_s4 + $0x98] sm:$0xff] }
  0x4c   :  { %8789 = vst [vmem:[#allocation63_spill] sm:$0xff] %v7320_v17  ;;  %4780 = vmatprep.subr.bf16.mxu1 %v7308_v3  ;;  %v7335_v2 = vpack.c.bf16 %v109_v52, %v105_v63  ;;  %v108_v3 = vld [vmem:[%s8517_s4 + $0x60] sm:$0xff]  ;;  %v106_v63 = vld [vmem:[%s8517_s4 + $0x50] sm:$0xff]  ;;  %v117_v62 = vld [vmem:[%s8517_s4 + $0xa8] sm:$0xff] }
  0x4d   :  { %8787 = vst [vmem:[#allocation62_spill] sm:$0xff] %v7310_v27  ;;  %787 = vmatmul.mubr.f32.vlgmr.msra.gmra.mrb[16].mxu0 %v8788_v44  ;;  %8791 = vst [vmem:[#allocation65_spill] sm:$0xff] %v7346_v56  ;;  %v7348_v60 = vpack.c.bf16 %v108_v3, %v104_v26  ;;  %v110_v52 = vld [vmem:[%s8517_s4 + $0x70] sm:$0xff]  ;;  %v113_v3 = vld [vmem:[%s8517_s4 + $0x88] sm:$0xff] }
  0x4e   :  { %858 = vmatmul.mubr.f32.vlgmr.msra.gmra.mrb[16].mxu1 %v8788_v44  ;;  %4750 = vmatpush1.bf16.msra.mxu0 %v7310_v27  ;;  %8790 = vst [vmem:[#allocation64_spill] sm:$0xff] %v7335_v2  ;;  %v7373_v26 = vpack.c.bf16 %v117_v62, %v113_v3  ;;  %v114_v3 = vld [vmem:[%s8517_s4 + $0x90] sm:$0xff] }
  0x4f   :  { %4782 = vmatpush1.bf16.msra.mxu1 %v7320_v17  ;;  %8792 = vst [vmem:[#allocation66_spill] sm:$0xff] %v7348_v60  ;;  %928 = vmatprep.mubr.f32.mxu0 %v8788_v44  ;;  %v7359_v17 = vpack.c.bf16 %v110_v52, %v106_v63  ;;  %v119_v63 = vld [vmem:[%s8517_s4 + $0xb8] sm:$0xff]  ;;  %v112_v52 = vld [vmem:[%s8517_s4 + $0x80] sm:$0xff]  ;;  %v118_v62 = vld [vmem:[%s8517_s4 + $0xb0] sm:$0xff] }
  0x50   :  { %999 = vmatprep.mubr.f32.mxu1 %v8788_v44  ;;  %4752 = vmatprep.subr.bf16.mxu0 %v7335_v2  ;;  %8794 = vst [vmem:[#allocation68_spill] sm:$0xff] %v7373_v26  ;;  %v7384_v2 = vpack.c.bf16 %v119_v63, %v115_v22  ;;  %v121_v22 = vld [vmem:[%s8517_s4 + $0xc8] sm:$0xff]  ;;  %v123_v63 = vld [vmem:[%s8517_s4 + $0xd8] sm:$0xff] }
  0x51   :  { %8793 = vst [vmem:[#allocation67_spill] sm:$0xff] %v7359_v17  ;;  %4784 = vmatprep.subr.bf16.mxu1 %v7346_v56  ;;  %v116_v56 = vld [vmem:[%s8517_s4 + $0xa0] sm:$0xff] }
  0x52   :  { %4754 = vmatpush1.bf16.msra.mxu0 %v7348_v60  ;;  %8795 = vst [vmem:[#allocation69_spill] sm:$0xff] %v7384_v2  ;;  %v7386_v27 = vpack.c.bf16 %v116_v56, %v112_v52  ;;  %v125_v56 = vld [vmem:[%s8517_s4 + $0xe8] sm:$0xff] }
  0x53   :  { %4786 = vmatpush1.bf16.msra.mxu1 %v7359_v17  ;;  %4756 = vmatprep.subr.bf16.mxu0 %v7373_v26  ;;  %v7395_v17 = vpack.c.bf16 %v118_v62, %v114_v3  ;;  %v7409_v52 = vpack.c.bf16 %v125_v56, %v121_v22  ;;  %v127_v3 = vld [vmem:[%s8517_s4 + $0xf8] sm:$0xff]  ;;  %v120_v62 = vld [vmem:[%s8517_s4 + $0xc0] sm:$0xff]  ;;  %v122_v22 = vld [vmem:[%s8517_s4 + $0xd0] sm:$0xff] }
  0x54   :  { %8796 = vst [vmem:[#allocation70_spill] sm:$0xff] %v7386_v27  ;;  %4788 = vmatprep.subr.bf16.mxu1 %v7384_v2  ;;  %v124_v2 = vld [vmem:[%s8517_s4 + $0xe0] sm:$0xff]  ;;  %v7420_v26 = vpack.c.bf16 %v127_v3, %v123_v63  ;;  %v126_v56 = vld [vmem:[%s8517_s4 + $0xf0] sm:$0xff]  ;;  %v129_v63 = vld [vmem:[%s8517_s4 + $0x108] sm:$0xff] }
  0x55   :  { %8797 = vst [vmem:[#allocation71_spill] sm:$0xff] %v7395_v17  ;;  %8798 = vst [vmem:[#allocation72_spill] sm:$0xff] %v7409_v52  ;;  %v7422_v60 = vpack.c.bf16 %v124_v2, %v120_v62  ;;  %v133_v2 = vld [vmem:[%s8517_s4 + $0x128] sm:$0xff]  ;;  %v131_v3 = vld [vmem:[%s8517_s4 + $0x118] sm:$0xff] }
  0x56   :  { %4758 = vmatpush1.bf16.msra.mxu0 %v7386_v27  ;;  %8799 = vst [vmem:[#allocation73_spill] sm:$0xff] %v7420_v26  ;;  %v7445_v62 = vpack.c.bf16 %v133_v2, %v129_v63  ;;  %v130_v63 = vld [vmem:[%s8517_s4 + $0x110] sm:$0xff] }
  0x57   :  { %4790 = vmatpush1.bf16.msra.mxu1 %v7395_v17  ;;  %8800 = vst [vmem:[#allocation74_spill] sm:$0xff] %v7422_v60  ;;  %4760 = vmatprep.subr.bf16.mxu0 %v7409_v52  ;;  %v7431_v17 = vpack.c.bf16 %v126_v56, %v122_v22  ;;  %v135_v22 = vld [vmem:[%s8517_s4 + $0x138] sm:$0xff]  ;;  %v128_v56 = vld [vmem:[%s8517_s4 + $0x100] sm:$0xff]  ;;  %v134_v2 = vld [vmem:[%s8517_s4 + $0x130] sm:$0xff] }
  0x58   :  { %4792 = vmatprep.subr.bf16.mxu1 %v7420_v26  ;;  %8802 = vst [vmem:[#allocation76_spill] sm:$0xff] %v7445_v62  ;;  %v132_v26 = vld [vmem:[%s8517_s4 + $0x120] sm:$0xff]  ;;  %v7456_v52 = vpack.c.bf16 %v135_v22, %v131_v3  ;;  %v137_v3 = vld [vmem:[%s8517_s4 + $0x148] sm:$0xff]  ;;  %v139_v22 = vld [vmem:[%s8517_s4 + $0x158] sm:$0xff] }
  0x59   :  { %8801 = vst [vmem:[#allocation75_spill] sm:$0xff] %v7431_v17  ;;  %v7458_v27 = vpack.c.bf16 %v132_v26, %v128_v56  ;;  %v141_v26 = vld [vmem:[%s8517_s4 + $0x168] sm:$0xff] }
  0x5a   :  { %4762 = vmatpush1.bf16.msra.mxu0 %v7422_v60  ;;  %8803 = vst [vmem:[#allocation77_spill] sm:$0xff] %v7456_v52  ;;  %v7481_v56 = vpack.c.bf16 %v141_v26, %v137_v3  ;;  %v138_v3 = vld [vmem:[%s8517_s4 + $0x150] sm:$0xff] }
  0x5b   :  { %4794 = vmatpush1.bf16.msra.mxu1 %v7431_v17  ;;  %8804 = vst [vmem:[#allocation78_spill] sm:$0xff] %v7458_v27  ;;  %4764 = vmatprep.subr.bf16.mxu0 %v7445_v62  ;;  %v7467_v17 = vpack.c.bf16 %v134_v2, %v130_v63  ;;  %v143_v63 = vld [vmem:[%s8517_s4 + $0x178] sm:$0xff]  ;;  %v136_v2 = vld [vmem:[%s8517_s4 + $0x140] sm:$0xff]  ;;  %v142_v26 = vld [vmem:[%s8517_s4 + $0x170] sm:$0xff] }
  0x5c   :  { %4796 = vmatprep.subr.bf16.mxu1 %v7456_v52  ;;  %8806 = vst [vmem:[#allocation80_spill] sm:$0xff] %v7481_v56  ;;  %v140_v52 = vld [vmem:[%s8517_s4 + $0x160] sm:$0xff]  ;;  %v7492_v62 = vpack.c.bf16 %v143_v63, %v139_v22  ;;  %v147_v22 = vld [vmem:[%s8517_s4 + $0x198] sm:$0xff] }
  0x5d   :  { %8805 = vst [vmem:[#allocation79_spill] sm:$0xff] %v7467_v17  ;;  %v7494_v60 = vpack.c.bf16 %v140_v52, %v136_v2  ;;  %v149_v52 = vld [vmem:[%s8517_s4 + $0x1a8] sm:$0xff]  ;;  %v151_v63 = vld [vmem:[%s8517_s4 + $0x1b8] sm:$0xff] }
  0x5e   :  { %4766 = vmatpush1.bf16.msra.mxu0 %v7458_v27  ;;  %8807 = vst [vmem:[#allocation81_spill] sm:$0xff] %v7492_v62  ;;  %v7506_v27 = vpack.c.bf16 %v142_v26, %v138_v3  ;;  %v7520_v43 = vpack.c.bf16 %v151_v63, %v147_v22  ;;  %v144_v3 = vld [vmem:[%s8517_s4 + $0x180] sm:$0xff]  ;;  %v153_v22 = vld [vmem:[%s8517_s4 + $0x1c8] sm:$0xff] }
  0x5f   :  { %4798 = vmatpush1.bf16.msra.mxu1 %v7467_v17  ;;  %8808 = vst [vmem:[#allocation82_spill] sm:$0xff] %v7494_v60  ;;  %v145_v17 = vld [vmem:[%s8517_s4 + $0x188] sm:$0xff]  ;;  %4768 = vmatprep.subr.bf16.mxu0 %v7481_v56  ;;  %v148_v26 = vld [vmem:[%s8517_s4 + $0x1a0] sm:$0xff]  ;;  %v146_v56 = vld [vmem:[%s8517_s4 + $0x190] sm:$0xff] }
  0x60   :  { %8809 = vst [vmem:[#allocation83_spill] sm:$0xff] %v7506_v27  ;;  %4800 = vmatprep.subr.bf16.mxu1 %v7492_v62  ;;  %v7518_v2 = vpack.c.bf16 %v149_v52, %v145_v17  ;;  %8811 = vst [vmem:[#allocation85_spill] sm:$0xff] %v7520_v43  ;;  %v7533_v17 = vpack.c.bf16 %v148_v26, %v144_v3  ;;  %v150_v52 = vld [vmem:[%s8517_s4 + $0x1b0] sm:$0xff]  ;;  %v157_v63 = vld [vmem:[%s8517_s4 + $0x1e8] sm:$0xff] }
  0x61   :  { %v7548_v3 = vpack.c.bf16 %v157_v63, %v153_v22  ;;  %v155_v26 = vld [vmem:[%s8517_s4 + $0x1d8] sm:$0xff]  ;;  %v152_v62 = vld [vmem:[%s8517_s4 + $0x1c0] sm:$0xff]  ;;  %v158_v22 = vld [vmem:[%s8517_s4 + $0x1f0] sm:$0xff] }
  0x62   :  { %8810 = vst [vmem:[#allocation84_spill] sm:$0xff] %v7518_v2  ;;  %4770 = vmatpush1.bf16.msra.mxu0 %v7494_v60  ;;  %8812 = vst [vmem:[#allocation86_spill] sm:$0xff] %v7533_v17  ;;  %v7546_v60 = vpack.c.bf16 %v150_v52, %v146_v56  ;;  %v156_v56 = vld [vmem:[%s8517_s4 + $0x1e0] sm:$0xff]  ;;  %v154_v52 = vld [vmem:[%s8517_s4 + $0x1d0] sm:$0xff] }
  0x63   :  { %4802 = vmatpush1.bf16.msra.mxu1 %v7506_v27  ;;  %4772 = vmatprep.subr.bf16.mxu0 %v7518_v2  ;;  %8814 = vst [vmem:[#allocation88_spill] sm:$0xff] %v7548_v3  ;;  %v159_v27 = vld [vmem:[%s8517_s4 + $0x1f8] sm:$0xff]  ;;  %v7572_v63 = vpack.c.bf16 %v156_v56, %v152_v62  ;;  %v270_v56 = vld [vmem:[%s8518_s3] sm:$0xf] }
  0x64   :  { %4804 = vmatprep.subr.bf16.mxu1 %v7520_v43  ;;  %8813 = vst [vmem:[#allocation87_spill] sm:$0xff] %v7546_v60  ;;  %v7559_v30 = vpack.c.bf16 %v159_v27, %v155_v26  ;;  %v7574_v27 = vpack.c.bf16 %v158_v22, %v154_v52  ;;  %v226_v26 = vlaneseq }
  0x65   :  { %8816 = vst [vmem:[#allocation90_spill] sm:$0xff] %v7572_v63 }
  0x66   :  { %8815 = vst [vmem:[#allocation89_spill] sm:$0xff] %v7559_v30  ;;  %4774 = vmatpush1.bf16.msra.mxu0 %v7533_v17  ;;  %8817 = vst [vmem:[#allocation91_spill] sm:$0xff] %v7574_v27  ;;  %v7582_v17 = vshrl.u32 %v226_v26, 7 }
  0x67   :  { %4806 = vmatpush1.bf16.msra.mxu1 %v7546_v60  ;;  %4776 = vmatprep.subr.bf16.mxu0 %v7548_v3 }
  0x68   :  { %4808 = vmatprep.subr.bf16.mxu1 %v7559_v30  ;;  %8818 = vst [vmem:[#allocation92_spill] sm:$0xff] %v7582_v17  ;;  %v8621_v62 = vsub.s32 0, %v7582_v17  ;;  %v8622_v52 = vsub.s32 1, %v7582_v17  ;;  %v8631_v26 = vsub.s32 2, %v7582_v17 }
  0x6a   :  { %4778 = vmatpush1.bf16.msra.mxu0 %v7572_v63  ;;  %v7591_v22 = vrot.slane %v270_v56, %v8621_v62  ;;  %v7602_v2 = vrot.slane %v270_v56, %v8631_v26 }
  0x6b   :  { %4810 = vmatpush1.bf16.msra.mxu1 %v7574_v27  ;;  %4812 = vmatprep.subr.bf16.mxu0 %v6657_v29  ;;  %v7595_v29 = vrot.slane %v270_v56, %v8622_v52  ;;  %v8638_v52 = vsub.s32 3, %v7582_v17 }
  0x6c   :  { %4844 = vmatprep.subr.bf16.mxu1 %v6673_v34  ;;  %8819 = vst [vmem:[#allocation93_spill] sm:$0xff] %v7591_v22  ;;  %8821 = vst [vmem:[#allocation95_spill] sm:$0xff] %v7602_v2 }
  0x6d   :  { %8820 = vst [vmem:[#allocation94_spill] sm:$0xff] %v7595_v29 }
 0x100   :  { %v622_v34 = vpop.f32.mrb[0].mxu0 }
 0x101   :  { %v6179_v27 = vadd.f32 %v622_v34, %v7591_v22  ;;  %v693_v63 = vpop.f32.mrb[0].mxu1  ;;  %v624_v30 = vpop.f32.mrb[1].mxu0  ;;  %v7608_v34 = vrot.slane %v270_v56, %v8638_v52  ;;  %v8837_v52 = vld [vmem:[#allocation58_spill] sm:$0xff] }
 0x102   :  { %v6180_v3 = vadd.f32 %v624_v30, %v7595_v29  ;;  %v695_v60 = vpop.f32.mrb[1].mxu1  ;;  %v6195_v23 = vadd.f32 %v693_v63, %v7602_v2 }
 0x103   :  { %v4498_v43 = vmul.f32 -1.442695, %v6179_v27  ;;  %v6196_v30 = vadd.f32 %v695_v60, %v7608_v34 }
 0x104   :  { %v4499_v62 = vmul.f32 -1.442695, %v6180_v3  ;;  %v4500_v22 = vmul.f32 -1.442695, %v6195_v23 }
 0x105   :  { %6279 = vpow2.f32 %v4498_v43 }
 0x106   :  { %6281 = vpow2.f32 %v4499_v62 }
 0x107   :  { %6283 = vpow2.f32 %v4500_v22  ;;  %v8826_v22 = vld [vmem:[#allocation47_spill] sm:$0xff] }
 0x108   :  { %6285 = vtanh.f32 %v6196_v30  ;;  %v8828_v30 = vld [vmem:[#allocation49_spill] sm:$0xff] }
 0x10f   :  { %v6280_v29 = vpop.eup %6279 }
 0x110   :  { %v707_v27 = vadd.f32 1.0, %v6280_v29  ;;  %v6282_v16 = vpop.eup %6281 }
 0x111   :  { %v708_v3 = vadd.f32 1.0, %v6282_v16  ;;  %v6284_v43 = vpop.eup %6283  ;;  %v8823_v16 = vld [vmem:[#allocation44_spill] sm:$0xff] }
 0x112   :  { %6287 = vrcp.f32 %v707_v27  ;;  %v6286_v26 = vpop.eup %6285  ;;  %v709_v2 = vadd.f32 1.0, %v6284_v43  ;;  %v8829_v27 = vld [vmem:[#allocation50_spill] sm:$0xff]  ;;  %v8831_v43 = vld [vmem:[#allocation52_spill] sm:$0xff] }
 0x113   :  { %6289 = vrcp.f32 %v708_v3  ;;  %v8830_v3 = vld [vmem:[#allocation51_spill] sm:$0xff] }
 0x114   :  { %6291 = vrcp.f32 %v709_v2  ;;  %v8824_v2 = vld [vmem:[#allocation45_spill] sm:$0xff] }
 0x11c   :  { %v6288_v62 = vpop.eup %6287 }
 0x11d   :  { %v718_v13 = vmul.f32 %v6288_v62, %v6286_v26  ;;  %v6290_v63 = vpop.eup %6289  ;;  %v8827_v26 = vld [vmem:[#allocation48_spill] sm:$0xff]  ;;  %v8832_v62 = vld [vmem:[#allocation53_spill] sm:$0xff] }
 0x11e   :  { %v717_v17 = vmul.f32 0.0, %v6290_v63  ;;  %v6292_v23 = vpop.eup %6291  ;;  %v8833_v63 = vld [vmem:[#allocation54_spill] sm:$0xff] }
 0x120   :  { %v7611_v56 = vadd.f32 %v718_v13, %v717_v17  ;;  %v8822_v13 = vld [vmem:[#allocation43_spill] sm:$0xff]  ;;  %v8825_v17 = vld [vmem:[#allocation46_spill] sm:$0xff] }
 0x122   :  { %6293 = vtanh.f32 %v7611_v56 }
 0x12c   :  { %v6294_v29 = vpop.eup %6293 }
 0x12d   :  { %v721_v60 = vmul.f32 %v6294_v29, %v6292_v23  ;;  %v8834_v23 = vld [vmem:[#allocation55_spill] sm:$0xff]  ;;  %v8835_v29 = vld [vmem:[#allocation56_spill] sm:$0xff] }
 0x12f   :  { %929 = vmatmul.mubr.f32.vlgmr.msra.gmra.mrb[16].mxu0 %v721_v60  ;;  %1000 = vmatmul.mubr.f32.vlgmr.msra.gmra.mrb[16].mxu1 %v721_v60 }
 0x130   :  { %4814 = vmatpush1.bf16.msra.mxu0 %v6675_v35  ;;  %4846 = vmatpush1.bf16.msra.mxu1 %v6686_v38 }
 0x131   :  { %4816 = vmatprep.subr.bf16.mxu0 %v6698_v42  ;;  %4848 = vmatprep.subr.bf16.mxu1 %v6713_v47 }
 0x132   :  { %1098 = vmatprep.mubr.f32.mxu0 %v8788_v44  ;;  %1169 = vmatprep.mubr.f32.mxu1 %v8788_v44 }
 0x134   :  { %4818 = vmatpush1.bf16.msra.mxu0 %v6723_v50  ;;  %4850 = vmatpush1.bf16.msra.mxu1 %v6736_v54 }
 0x135   :  { %4820 = vmatprep.subr.bf16.mxu0 %v6749_v58  ;;  %4852 = vmatprep.subr.bf16.mxu1 %v6759_v61 }
 0x138   :  { %4822 = vmatpush1.bf16.msra.mxu0 %v6772_v1  ;;  %4854 = vmatpush1.bf16.msra.mxu1 %v6782_v5 }
 0x139   :  { %4824 = vmatprep.subr.bf16.mxu0 %v6792_v8  ;;  %4856 = vmatprep.subr.bf16.mxu1 %v6802_v11 }
 0x13c   :  { %4826 = vmatpush1.bf16.msra.mxu0 %v6815_v15  ;;  %4858 = vmatpush1.bf16.msra.mxu1 %v6825_v18 }
 0x13d   :  { %4828 = vmatprep.subr.bf16.mxu0 %v6835_v21  ;;  %4860 = vmatprep.subr.bf16.mxu1 %v6845_v24 }
 0x140   :  { %4830 = vmatpush1.bf16.msra.mxu0 %v6858_v28  ;;  %4862 = vmatpush1.bf16.msra.mxu1 %v6868_v32 }
 0x141   :  { %4832 = vmatprep.subr.bf16.mxu0 %v6878_v37  ;;  %4864 = vmatprep.subr.bf16.mxu1 %v6888_v41 }
 0x144   :  { %4834 = vmatpush1.bf16.msra.mxu0 %v6901_v46  ;;  %4866 = vmatpush1.bf16.msra.mxu1 %v6911_v51 }
 0x145   :  { %4836 = vmatprep.subr.bf16.mxu0 %v6921_v55  ;;  %4868 = vmatprep.subr.bf16.mxu1 %v6931_v59 }
 0x148   :  { %4838 = vmatpush1.bf16.msra.mxu0 %v6944_v0  ;;  %4870 = vmatpush1.bf16.msra.mxu1 %v6954_v6 }
 0x149   :  { %4840 = vmatprep.subr.bf16.mxu0 %v6964_v10  ;;  %4872 = vmatprep.subr.bf16.mxu1 %v6974_v14 }
 0x14c   :  { %4842 = vmatpush1.bf16.msra.mxu0 %v6987_v20  ;;  %4874 = vmatpush1.bf16.msra.mxu1 %v6997_v25 }
 0x14d   :  { %4876 = vmatprep.subr.bf16.mxu0 %v7010_v31  ;;  %4908 = vmatprep.subr.bf16.mxu1 %v7023_v40 }
 0x14f   :  { %1099 = vmatmul.mubr.f32.vlgmr.msra.gmra.mrb[2].mxu0 %v721_v60  ;;  %1170 = vmatmul.mubr.f32.vlgmr.msra.gmra.mrb[2].mxu1 %v721_v60  ;;  %v8836_v60 = vld [vmem:[#allocation57_spill] sm:$0xff] }
 0x150   :  { %4878 = vmatpush1.bf16.msra.mxu0 %v7033_v45  ;;  %4910 = vmatpush1.bf16.msra.mxu1 %v7037_v48 }
 0x151   :  { %4880 = vmatprep.subr.bf16.mxu0 %v7039_v49  ;;  %4912 = vmatprep.subr.bf16.mxu1 %v7052_v57 }
 0x152   :  { %1264 = vmatprep.mubr.f32.mxu0 %v8788_v44  ;;  %1335 = vmatprep.mubr.f32.mxu1 %v8788_v44 }
 0x154   :  { %4882 = vmatpush1.bf16.msra.mxu0 %v7073_v7  ;;  %4914 = vmatpush1.bf16.msra.mxu1 %v7077_v9 }
 0x155   :  { %4884 = vmatprep.subr.bf16.mxu0 %v7079_v12  ;;  %4916 = vmatprep.subr.bf16.mxu1 %v7091_v19 }
 0x158   :  { %4886 = vmatpush1.bf16.msra.mxu0 %v7111_v33  ;;  %4918 = vmatpush1.bf16.msra.mxu1 %v7115_v36 }
 0x159   :  { %4888 = vmatprep.subr.bf16.mxu0 %v7117_v39  ;;  %4920 = vmatprep.subr.bf16.mxu1 %v7129_v53 }
 0x15c   :  { %4890 = vmatpush1.bf16.msra.mxu0 %v7147_v4  ;;  %4922 = vmatpush1.bf16.msra.mxu1 %v8822_v13 }
 0x15d   :  { %4892 = vmatprep.subr.bf16.mxu0 %v8823_v16  ;;  %4924 = vmatprep.subr.bf16.mxu1 %v8824_v2 }
 0x160   :  { %4894 = vmatpush1.bf16.msra.mxu0 %v8825_v17  ;;  %4926 = vmatpush1.bf16.msra.mxu1 %v8826_v22 }
 0x161   :  { %4896 = vmatprep.subr.bf16.mxu0 %v8827_v26  ;;  %4928 = vmatprep.subr.bf16.mxu1 %v8828_v30  ;;  %v8838_v26 = vld [vmem:[#allocation59_spill] sm:$0xff]  ;;  %v8839_v30 = vld [vmem:[#allocation60_spill] sm:$0xff] }
 0x164   :  { %4898 = vmatpush1.bf16.msra.mxu0 %v8829_v27  ;;  %4930 = vmatpush1.bf16.msra.mxu1 %v8830_v3  ;;  %v8840_v27 = vld [vmem:[#allocation61_spill] sm:$0xff] }
 0x165   :  { %4900 = vmatprep.subr.bf16.mxu0 %v8831_v43  ;;  %4932 = vmatprep.subr.bf16.mxu1 %v8832_v62  ;;  %v224_v62 = vld [vmem:[%s8519_s6] sm:$0xf]  ;;  %v8841_v43 = vld [vmem:[#allocation92_spill] sm:$0xff] }
 0x166   :  { %v8846_v16 = vsub.s32 2, %v8841_v43 }
 0x168   :  { %4902 = vmatpush1.bf16.msra.mxu0 %v8833_v63  ;;  %4934 = vmatpush1.bf16.msra.mxu1 %v8834_v23  ;;  %v8842_v63 = vsub.s32 0, %v8841_v43  ;;  %v7697_v13 = vrot.slane %v224_v62, %v8846_v16 }
 0x169   :  { %4904 = vmatprep.subr.bf16.mxu0 %v8835_v29  ;;  %4936 = vmatprep.subr.bf16.mxu1 %v8836_v60  ;;  %v8844_v29 = vsub.s32 1, %v8841_v43 }
 0x16a   :  { %v7687_v3 = vrot.slane %v224_v62, %v8842_v63  ;;  %8847 = vst [vmem:[#allocation97_spill] sm:$0xff] %v7697_v13  ;;  %v8848_v63 = vsub.s32 3, %v8841_v43 }
 0x16b   :  { %v7691_v23 = vrot.slane %v224_v62, %v8844_v29 }
 0x16c   :  { %4906 = vmatpush1.bf16.msra.mxu0 %v8837_v52  ;;  %4938 = vmatpush1.bf16.msra.mxu1 %v8838_v26  ;;  %8843 = vst [vmem:[#allocation92_spill] sm:$0xff] %v7687_v3  ;;  %v7701_v29 = vrot.slane %v224_v62, %v8848_v63 }
 0x16d   :  { %4940 = vmatprep.subr.bf16.mxu0 %v8839_v30  ;;  %4972 = vmatprep.subr.bf16.mxu1 %v8840_v27  ;;  %8845 = vst [vmem:[#allocation96_spill] sm:$0xff] %v7691_v23 }
 0x16e   :  { %8849 = vst [vmem:[#allocation98_spill] sm:$0xff] %v7701_v29 }
 0x202   :  { %v930_v60 = vpop.f32.mrb[16].mxu0  ;;  %v1001_v52 = vpop.f32.mrb[16].mxu1 }
 0x203   :  { %v1006_v26 = vadd.f32 %v930_v60, %v7687_v3  ;;  %v932_v22 = vpop.f32.mrb[17].mxu0  ;;  %v1003_v30 = vpop.f32.mrb[17].mxu1  ;;  %v1008_v4 = vadd.f32 %v1001_v52, %v7697_v13 }
 0x204   :  { %v1007_v27 = vadd.f32 %v932_v22, %v7691_v23  ;;  %v1009_v60 = vadd.f32 %v1003_v30, %v7701_v29 }
 0x205   :  { %v4501_v17 = vmul.f32 -1.442695, %v1006_v26  ;;  %v4503_v3 = vmul.f32 -1.442695, %v1008_v4  ;;  %v8850_v4 = vld [vmem:[#allocation93_spill] sm:$0xff] }
 0x206   :  { %v4502_v2 = vmul.f32 -1.442695, %v1007_v27 }
 0x207   :  { %6295 = vpow2.f32 %v4501_v17 }
 0x208   :  { %6297 = vpow2.f32 %v4502_v2 }
 0x209   :  { %6299 = vtanh.f32 %v1009_v60 }
 0x20a   :  { %6301 = vpow2.f32 %v4503_v3  ;;  %v8851_v3 = vld [vmem:[#allocation94_spill] sm:$0xff] }
 0x211   :  { %v6296_v53 = vpop.eup %6295 }
 0x212   :  { %v1019_v39 = vadd.f32 1.0, %v6296_v53  ;;  %v6298_v22 = vpop.eup %6297 }
 0x213   :  { %v1020_v17 = vadd.f32 1.0, %v6298_v22  ;;  %v6300_v16 = vpop.eup %6299 }
 0x214   :  { %6303 = vrcp.f32 %v1019_v39  ;;  %v6302_v26 = vpop.eup %6301 }
 0x215   :  { %6305 = vrcp.f32 %v1020_v17  ;;  %v1021_v62 = vadd.f32 1.0, %v6302_v26 }
 0x217   :  { %6307 = vrcp.f32 %v1021_v62 }
 0x21e   :  { %v6304_v2 = vpop.eup %6303 }
 0x21f   :  { %v1030_v27 = vmul.f32 %v6304_v2, %v6300_v16  ;;  %v6306_v43 = vpop.eup %6305  ;;  %v8852_v16 = vld [vmem:[#allocation95_spill] sm:$0xff] }
 0x220   :  { %v1029_v63 = vmul.f32 0.0, %v6306_v43 }
 0x221   :  { %v6308_v2 = vpop.eup %6307 }
 0x222   :  { %v1100_v23 = vpop.f32.mrb[2].mxu0  ;;  %v1171_v52 = vpop.f32.mrb[2].mxu1  ;;  %v7705_v13 = vadd.f32 %v1030_v27, %v1029_v63 }
 0x223   :  { %v6181_v30 = vadd.f32 %v1100_v23, %v8850_v4  ;;  %v1102_v53 = vpop.f32.mrb[3].mxu0  ;;  %v1173_v60 = vpop.f32.mrb[3].mxu1  ;;  %v6197_v26 = vadd.f32 %v1171_v52, %v8852_v16  ;;  %v8855_v52 = vld [vmem:[#allocation64_spill] sm:$0xff] }
 0x224   :  { %v6182_v39 = vadd.f32 %v1102_v53, %v8851_v3  ;;  %6309 = vtanh.f32 %v7705_v13  ;;  %v6198_v43 = vadd.f32 %v1173_v60, %v7608_v34  ;;  %v8853_v53 = vld [vmem:[#allocation62_spill] sm:$0xff] }
 0x225   :  { %v4504_v22 = vmul.f32 -1.442695, %v6181_v30  ;;  %v4506_v63 = vmul.f32 -1.442695, %v6197_v26  ;;  %v8854_v30 = vld [vmem:[#allocation63_spill] sm:$0xff]  ;;  %v8857_v60 = vld [vmem:[#allocation66_spill] sm:$0xff] }
 0x226   :  { %v4505_v17 = vmul.f32 -1.442695, %v6182_v39  ;;  %v8860_v26 = vld [vmem:[#allocation69_spill] sm:$0xff] }
 0x227   :  { %6311 = vpow2.f32 %v4504_v22  ;;  %v8856_v22 = vld [vmem:[#allocation65_spill] sm:$0xff] }
 0x228   :  { %6313 = vpow2.f32 %v4505_v17  ;;  %v8859_v17 = vld [vmem:[#allocation68_spill] sm:$0xff] }
 0x229   :  { %6315 = vtanh.f32 %v6198_v43 }
 0x22a   :  { %6317 = vpow2.f32 %v4506_v63  ;;  %v8864_v63 = vld [vmem:[#allocation73_spill] sm:$0xff] }
 0x22e   :  { %v6310_v27 = vpop.eup %6309 }
 0x22f   :  { %v1033_v29 = vmul.f32 %v6310_v27, %v6308_v2  ;;  %v8861_v2 = vld [vmem:[#allocation70_spill] sm:$0xff]  ;;  %v8863_v27 = vld [vmem:[#allocation72_spill] sm:$0xff] }
 0x231   :  { %v6312_v23 = vpop.eup %6311  ;;  %1265 = vmatmul.mubr.f32.vlgmr.msra.gmra.mrb[18].mxu0 %v1033_v29  ;;  %1336 = vmatmul.mubr.f32.vlgmr.msra.gmra.mrb[18].mxu1 %v1033_v29  ;;  %v8858_v29 = vld [vmem:[#allocation67_spill] sm:$0xff] }
 0x232   :  { %v1185_v4 = vadd.f32 1.0, %v6312_v23  ;;  %v6314_v62 = vpop.eup %6313  ;;  %4942 = vmatpush1.bf16.msra.mxu0 %v8853_v53  ;;  %4974 = vmatpush1.bf16.msra.mxu1 %v8854_v30 }
 0x233   :  { %v1186_v39 = vadd.f32 1.0, %v6314_v62  ;;  %4944 = vmatprep.subr.bf16.mxu0 %v8855_v52  ;;  %4976 = vmatprep.subr.bf16.mxu1 %v8856_v22  ;;  %v6316_v43 = vpop.eup %6315  ;;  %v8865_v22 = vld [vmem:[#allocation74_spill] sm:$0xff]  ;;  %v8867_v52 = vld [vmem:[#allocation76_spill] sm:$0xff] }
 0x234   :  { %6319 = vrcp.f32 %v1185_v4  ;;  %1406 = vmatprep.mubr.f32.mxu0 %v8788_v44  ;;  %1477 = vmatprep.mubr.f32.mxu1 %v8788_v44  ;;  %v8862_v4 = vld [vmem:[#allocation71_spill] sm:$0xff]  ;;  %v6318_v23 = vpop.eup %6317 }
 0x235   :  { %6321 = vrcp.f32 %v1186_v39 }
 0x236   :  { %4946 = vmatpush1.bf16.msra.mxu0 %v8857_v60  ;;  %4978 = vmatpush1.bf16.msra.mxu1 %v8858_v29  ;;  %v8866_v60 = vld [vmem:[#allocation75_spill] sm:$0xff] }
 0x237   :  { %4948 = vmatprep.subr.bf16.mxu0 %v8859_v17  ;;  %4980 = vmatprep.subr.bf16.mxu1 %v8860_v26  ;;  %v1187_v17 = vadd.f32 1.0, %v6318_v23  ;;  %v8868_v26 = vld [vmem:[#allocation77_spill] sm:$0xff]  ;;  %v8873_v23 = vld [vmem:[#allocation82_spill] sm:$0xff] }
 0x239   :  { %6323 = vrcp.f32 %v1187_v17  ;;  %v8880_v17 = vld [vmem:[#allocation89_spill] sm:$0xff] }
 0x23a   :  { %4950 = vmatpush1.bf16.msra.mxu0 %v8861_v2  ;;  %4982 = vmatpush1.bf16.msra.mxu1 %v8862_v4 }
 0x23b   :  { %4952 = vmatprep.subr.bf16.mxu0 %v8863_v27  ;;  %4984 = vmatprep.subr.bf16.mxu1 %v8864_v63  ;;  %v8869_v27 = vld [vmem:[#allocation78_spill] sm:$0xff]  ;;  %v8870_v63 = vld [vmem:[#allocation79_spill] sm:$0xff] }
 0x23e   :  { %v6320_v62 = vpop.eup %6319  ;;  %4954 = vmatpush1.bf16.msra.mxu0 %v8865_v22  ;;  %4986 = vmatpush1.bf16.msra.mxu1 %v8866_v60 }
 0x23f   :  { %v1196_v39 = vmul.f32 %v6320_v62, %v6316_v43  ;;  %v6322_v29 = vpop.eup %6321  ;;  %4956 = vmatprep.subr.bf16.mxu0 %v8867_v52  ;;  %4988 = vmatprep.subr.bf16.mxu1 %v8868_v26  ;;  %v8871_v43 = vld [vmem:[#allocation80_spill] sm:$0xff]  ;;  %v8872_v62 = vld [vmem:[#allocation81_spill] sm:$0xff]  ;;  %v8874_v52 = vld [vmem:[#allocation83_spill] sm:$0xff] }
 0x240   :  { %v1195_v4 = vmul.f32 %v6322_v29, %v7611_v56  ;;  %v8875_v26 = vld [vmem:[#allocation84_spill] sm:$0xff]  ;;  %v8876_v56 = vld [vmem:[#allocation85_spill] sm:$0xff]  ;;  %v8877_v29 = vld [vmem:[#allocation86_spill] sm:$0xff] }
 0x242   :  { %v7731_v2 = vadd.f32 %v1196_v39, %v1195_v4  ;;  %4958 = vmatpush1.bf16.msra.mxu0 %v8869_v27  ;;  %4990 = vmatpush1.bf16.msra.mxu1 %v8870_v63  ;;  %v8878_v4 = vld [vmem:[#allocation87_spill] sm:$0xff]  ;;  %v8879_v39 = vld [vmem:[#allocation88_spill] sm:$0xff]  ;;  %v8881_v63 = vld [vmem:[#allocation90_spill] sm:$0xff] }
 0x243   :  { %4960 = vmatprep.subr.bf16.mxu0 %v8871_v43  ;;  %4992 = vmatprep.subr.bf16.mxu1 %v8872_v62  ;;  %v6324_v43 = vpop.eup %6323  ;;  %v8882_v27 = vld [vmem:[#allocation91_spill] sm:$0xff] }
 0x244   :  { %6325 = vtanh.f32 %v7731_v2 }
 0x246   :  { %4962 = vmatpush1.bf16.msra.mxu0 %v8873_v23  ;;  %4994 = vmatpush1.bf16.msra.mxu1 %v8874_v52  ;;  %v8883_v52 = vld [vmem:[#allocation2_spill] sm:$0xff] }
 0x247   :  { %4964 = vmatprep.subr.bf16.mxu0 %v8875_v26  ;;  %4996 = vmatprep.subr.bf16.mxu1 %v8876_v56  ;;  %v8884_v26 = vld [vmem:[#allocation3_spill] sm:$0xff] }
 0x24a   :  { %4966 = vmatpush1.bf16.msra.mxu0 %v8877_v29  ;;  %4998 = vmatpush1.bf16.msra.mxu1 %v8878_v4 }
 0x24b   :  { %4968 = vmatprep.subr.bf16.mxu0 %v8879_v39  ;;  %5000 = vmatprep.subr.bf16.mxu1 %v8880_v17 }
 0x24e   :  { %v6326_v62 = vpop.eup %6325  ;;  %4970 = vmatpush1.bf16.msra.mxu0 %v8881_v63  ;;  %5002 = vmatpush1.bf16.msra.mxu1 %v8882_v27 }
 0x24f   :  { %v1199_v23 = vmul.f32 %v6326_v62, %v6324_v43  ;;  %5004 = vmatprep.subr.bf16.mxu0 %v8883_v52  ;;  %5036 = vmatprep.subr.bf16.mxu1 %v8884_v26  ;;  %v8885_v43 = vld [vmem:[#allocation40_spill] sm:$0xff]  ;;  %v8886_v62 = vld [vmem:[#allocation41_spill] sm:$0xff] }
 0x251   :  { %1407 = vmatmul.mubr.f32.vlgmr.msra.gmra.mrb[18].mxu0 %v1199_v23  ;;  %1478 = vmatmul.mubr.f32.vlgmr.msra.gmra.mrb[18].mxu1 %v1199_v23 }
 0x252   :  { %5006 = vmatpush1.bf16.msra.mxu0 %v6675_v35  ;;  %5038 = vmatpush1.bf16.msra.mxu1 %v6686_v38 }
 0x253   :  { %5008 = vmatprep.subr.bf16.mxu0 %v6698_v42  ;;  %5040 = vmatprep.subr.bf16.mxu1 %v6713_v47 }
 0x254   :  { %1576 = vmatprep.mubr.f32.mxu0 %v8788_v44  ;;  %1647 = vmatprep.mubr.f32.mxu1 %v8788_v44 }
 0x256   :  { %5010 = vmatpush1.bf16.msra.mxu0 %v6723_v50  ;;  %5042 = vmatpush1.bf16.msra.mxu1 %v6736_v54 }
 0x257   :  { %5012 = vmatprep.subr.bf16.mxu0 %v6749_v58  ;;  %5044 = vmatprep.subr.bf16.mxu1 %v6759_v61 }
 0x25a   :  { %5014 = vmatpush1.bf16.msra.mxu0 %v6772_v1  ;;  %5046 = vmatpush1.bf16.msra.mxu1 %v6782_v5 }
 0x25b   :  { %5016 = vmatprep.subr.bf16.mxu0 %v6792_v8  ;;  %5048 = vmatprep.subr.bf16.mxu1 %v6802_v11 }
 0x25e   :  { %5018 = vmatpush1.bf16.msra.mxu0 %v6815_v15  ;;  %5050 = vmatpush1.bf16.msra.mxu1 %v6825_v18 }
 0x25f   :  { %5020 = vmatprep.subr.bf16.mxu0 %v6835_v21  ;;  %5052 = vmatprep.subr.bf16.mxu1 %v6845_v24 }
 0x262   :  { %5022 = vmatpush1.bf16.msra.mxu0 %v6858_v28  ;;  %5054 = vmatpush1.bf16.msra.mxu1 %v6868_v32 }
 0x263   :  { %5024 = vmatprep.subr.bf16.mxu0 %v6878_v37  ;;  %5056 = vmatprep.subr.bf16.mxu1 %v6888_v41 }
 0x266   :  { %5026 = vmatpush1.bf16.msra.mxu0 %v6901_v46  ;;  %5058 = vmatpush1.bf16.msra.mxu1 %v6911_v51 }
 0x267   :  { %5028 = vmatprep.subr.bf16.mxu0 %v6921_v55  ;;  %5060 = vmatprep.subr.bf16.mxu1 %v6931_v59 }
 0x26a   :  { %5030 = vmatpush1.bf16.msra.mxu0 %v6944_v0  ;;  %5062 = vmatpush1.bf16.msra.mxu1 %v6954_v6 }
 0x26b   :  { %5032 = vmatprep.subr.bf16.mxu0 %v6964_v10  ;;  %5064 = vmatprep.subr.bf16.mxu1 %v6974_v14 }
 0x26e   :  { %5034 = vmatpush1.bf16.msra.mxu0 %v6987_v20  ;;  %5066 = vmatpush1.bf16.msra.mxu1 %v6997_v25  ;;  %v8910_v25 = vld [vmem:[#allocation98_spill] sm:$0xff] }
 0x26f   :  { %5068 = vmatprep.subr.bf16.mxu0 %v7010_v31  ;;  %5100 = vmatprep.subr.bf16.mxu1 %v7023_v40  ;;  %v8908_v40 = vld [vmem:[#allocation96_spill] sm:$0xff] }
 0x271   :  { %1577 = vmatmul.mubr.f32.vlgmr.msra.gmra.mrb[4].mxu0 %v1199_v23  ;;  %1648 = vmatmul.mubr.f32.vlgmr.msra.gmra.mrb[4].mxu1 %v1199_v23  ;;  %v8887_v23 = vld [vmem:[#allocation42_spill] sm:$0xff] }
 0x272   :  { %5070 = vmatpush1.bf16.msra.mxu0 %v7033_v45  ;;  %5102 = vmatpush1.bf16.msra.mxu1 %v7037_v48  ;;  %v8907_v48 = vld [vmem:[#allocation92_spill] sm:$0xff] }
 0x273   :  { %5072 = vmatprep.subr.bf16.mxu0 %v7039_v49  ;;  %5104 = vmatprep.subr.bf16.mxu1 %v7052_v57  ;;  %v8888_v57 = vld [vmem:[#allocation43_spill] sm:$0xff]  ;;  %v8889_v49 = vld [vmem:[#allocation44_spill] sm:$0xff] }
 0x274   :  { %1742 = vmatprep.mubr.f32.mxu0 %v8788_v44  ;;  %1813 = vmatprep.mubr.f32.mxu1 %v8788_v44 }
 0x276   :  { %5074 = vmatpush1.bf16.msra.mxu0 %v7073_v7  ;;  %5106 = vmatpush1.bf16.msra.mxu1 %v7077_v9  ;;  %v8890_v7 = vld [vmem:[#allocation45_spill] sm:$0xff]  ;;  %v8891_v9 = vld [vmem:[#allocation46_spill] sm:$0xff] }
 0x277   :  { %5076 = vmatprep.subr.bf16.mxu0 %v7079_v12  ;;  %5108 = vmatprep.subr.bf16.mxu1 %v7091_v19  ;;  %v8892_v12 = vld [vmem:[#allocation47_spill] sm:$0xff]  ;;  %v8893_v19 = vld [vmem:[#allocation48_spill] sm:$0xff] }
 0x27a   :  { %5078 = vmatpush1.bf16.msra.mxu0 %v7111_v33  ;;  %5110 = vmatpush1.bf16.msra.mxu1 %v7115_v36  ;;  %v8894_v33 = vld [vmem:[#allocation49_spill] sm:$0xff]  ;;  %v8895_v36 = vld [vmem:[#allocation50_spill] sm:$0xff] }
 0x27b   :  { %5080 = vmatprep.subr.bf16.mxu0 %v8885_v43  ;;  %5112 = vmatprep.subr.bf16.mxu1 %v8886_v62  ;;  %v8896_v43 = vld [vmem:[#allocation51_spill] sm:$0xff]  ;;  %v8897_v62 = vld [vmem:[#allocation52_spill] sm:$0xff] }
 0x27e   :  { %5082 = vmatpush1.bf16.msra.mxu0 %v8887_v23  ;;  %5114 = vmatpush1.bf16.msra.mxu1 %v8888_v57  ;;  %v8898_v23 = vld [vmem:[#allocation53_spill] sm:$0xff]  ;;  %v8899_v57 = vld [vmem:[#allocation54_spill] sm:$0xff] }
 0x27f   :  { %5084 = vmatprep.subr.bf16.mxu0 %v8889_v49  ;;  %5116 = vmatprep.subr.bf16.mxu1 %v8890_v7  ;;  %v8900_v49 = vld [vmem:[#allocation55_spill] sm:$0xff]  ;;  %v8901_v7 = vld [vmem:[#allocation56_spill] sm:$0xff] }
 0x282   :  { %5086 = vmatpush1.bf16.msra.mxu0 %v8891_v9  ;;  %5118 = vmatpush1.bf16.msra.mxu1 %v8892_v12  ;;  %v8902_v9 = vld [vmem:[#allocation57_spill] sm:$0xff]  ;;  %v8903_v12 = vld [vmem:[#allocation58_spill] sm:$0xff] }
 0x283   :  { %5088 = vmatprep.subr.bf16.mxu0 %v8893_v19  ;;  %5120 = vmatprep.subr.bf16.mxu1 %v8894_v33  ;;  %v8904_v19 = vld [vmem:[#allocation59_spill] sm:$0xff]  ;;  %v8905_v33 = vld [vmem:[#allocation60_spill] sm:$0xff] }
 0x286   :  { %5090 = vmatpush1.bf16.msra.mxu0 %v8895_v36  ;;  %5122 = vmatpush1.bf16.msra.mxu1 %v8896_v43  ;;  %v8906_v36 = vld [vmem:[#allocation61_spill] sm:$0xff] }
 0x287   :  { %5092 = vmatprep.subr.bf16.mxu0 %v8897_v62  ;;  %5124 = vmatprep.subr.bf16.mxu1 %v8898_v23 }
 0x28a   :  { %5094 = vmatpush1.bf16.msra.mxu0 %v8899_v57  ;;  %5126 = vmatpush1.bf16.msra.mxu1 %v8900_v49 }
 0x28b   :  { %5096 = vmatprep.subr.bf16.mxu0 %v8901_v7  ;;  %5128 = vmatprep.subr.bf16.mxu1 %v8902_v9  ;;  %v8909_v9 = vld [vmem:[#allocation97_spill] sm:$0xff] }
 0x28e   :  { %5098 = vmatpush1.bf16.msra.mxu0 %v8903_v12  ;;  %5130 = vmatpush1.bf16.msra.mxu1 %v8904_v19 }
 0x28f   :  { %5132 = vmatprep.subr.bf16.mxu0 %v8905_v33  ;;  %5164 = vmatprep.subr.bf16.mxu1 %v8906_v36 }
 0x324   :  { %v1408_v43 = vpop.f32.mrb[18].mxu0  ;;  %v1479_v62 = vpop.f32.mrb[18].mxu1 }
 0x325   :  { %v1484_v23 = vadd.f32 %v1408_v43, %v8907_v48  ;;  %v1410_v45 = vpop.f32.mrb[19].mxu0  ;;  %v1481_v57 = vpop.f32.mrb[19].mxu1  ;;  %v1486_v12 = vadd.f32 %v1479_v62, %v8909_v9 }
 0x326   :  { %v1485_v49 = vadd.f32 %v1410_v45, %v8908_v40  ;;  %v1487_v19 = vadd.f32 %v1481_v57, %v8910_v25 }
 0x327   :  { %v4507_v31 = vmul.f32 -1.442695, %v1484_v23  ;;  %v4509_v20 = vmul.f32 -1.442695, %v1486_v12  ;;  %v8911_v12 = vld [vmem:[#allocation93_spill] sm:$0xff] }
 0x328   :  { %v4508_v7 = vmul.f32 -1.442695, %v1485_v49 }
 0x329   :  { %6327 = vpow2.f32 %v4507_v31 }
 0x32a   :  { %6329 = vpow2.f32 %v4508_v7 }
 0x32b   :  { %6331 = vtanh.f32 %v1487_v19 }
 0x32c   :  { %6333 = vpow2.f32 %v4509_v20 }
 0x333   :  { %v6328_v33 = vpop.eup %6327 }
 0x334   :  { %v1497_v14 = vadd.f32 1.0, %v6328_v33  ;;  %v6330_v36 = vpop.eup %6329 }
 0x335   :  { %v1498_v43 = vadd.f32 1.0, %v6330_v36  ;;  %v6332_v48 = vpop.eup %6331 }
 0x336   :  { %6335 = vrcp.f32 %v1497_v14  ;;  %v6334_v10 = vpop.eup %6333 }
 0x337   :  { %6337 = vrcp.f32 %v1498_v43  ;;  %v1499_v31 = vadd.f32 1.0, %v6334_v10 }
 0x339   :  { %6339 = vrcp.f32 %v1499_v31 }
 0x340   :  { %v6336_v45 = vpop.eup %6335 }
 0x341   :  { %v1508_v23 = vmul.f32 %v6336_v45, %v6332_v48  ;;  %v6338_v49 = vpop.eup %6337 }
 0x342   :  { %v1507_v7 = vmul.f32 %v6338_v49, %v7705_v13 }
 0x343   :  { %v6340_v48 = vpop.eup %6339 }
 0x344   :  { %v1578_v62 = vpop.f32.mrb[4].mxu0  ;;  %v1649_v9 = vpop.f32.mrb[4].mxu1  ;;  %v7823_v57 = vadd.f32 %v1508_v23, %v1507_v7 }
 0x345   :  { %v6183_v33 = vadd.f32 %v1578_v62, %v8911_v12  ;;  %v1580_v19 = vpop.f32.mrb[5].mxu0  ;;  %v1651_v25 = vpop.f32.mrb[5].mxu1  ;;  %v6199_v10 = vadd.f32 %v1649_v9, %v8852_v16  ;;  %v8912_v9 = vld [vmem:[#allocation64_spill] sm:$0xff] }
 0x346   :  { %v6184_v14 = vadd.f32 %v1580_v19, %v8851_v3  ;;  %6341 = vtanh.f32 %v7823_v57  ;;  %v6200_v13 = vadd.f32 %v1651_v25, %v7608_v34  ;;  %v8914_v25 = vld [vmem:[#allocation66_spill] sm:$0xff]  ;;  %v8915_v19 = vld [vmem:[#allocation67_spill] sm:$0xff] }
 0x347   :  { %v4510_v20 = vmul.f32 -1.442695, %v6183_v33  ;;  %v4512_v45 = vmul.f32 -1.442695, %v6199_v10  ;;  %v8913_v33 = vld [vmem:[#allocation65_spill] sm:$0xff]  ;;  %v8919_v10 = vld [vmem:[#allocation71_spill] sm:$0xff] }
 0x348   :  { %v4511_v36 = vmul.f32 -1.442695, %v6184_v14  ;;  %v8916_v14 = vld [vmem:[#allocation68_spill] sm:$0xff] }
 0x349   :  { %6343 = vpow2.f32 %v4510_v20  ;;  %v8917_v20 = vld [vmem:[#allocation69_spill] sm:$0xff] }
 0x34a   :  { %6345 = vpow2.f32 %v4511_v36  ;;  %v8918_v36 = vld [vmem:[#allocation70_spill] sm:$0xff] }
 0x34b   :  { %6347 = vtanh.f32 %v6200_v13  ;;  %v8920_v13 = vld [vmem:[#allocation72_spill] sm:$0xff] }
 0x34c   :  { %6349 = vpow2.f32 %v4512_v45 }
 0x350   :  { %v6342_v43 = vpop.eup %6341 }
 0x351   :  { %v1511_v23 = vmul.f32 %v6342_v43, %v6340_v48  ;;  %v8921_v43 = vld [vmem:[#allocation73_spill] sm:$0xff] }
 0x353   :  { %v6344_v49 = vpop.eup %6343  ;;  %1743 = vmatmul.mubr.f32.vlgmr.msra.gmra.mrb[20].mxu0 %v1511_v23  ;;  %1814 = vmatmul.mubr.f32.vlgmr.msra.gmra.mrb[20].mxu1 %v1511_v23 }
 0x354   :  { %v1663_v7 = vadd.f32 1.0, %v6344_v49  ;;  %v6346_v31 = vpop.eup %6345  ;;  %5134 = vmatpush1.bf16.msra.mxu0 %v8853_v53  ;;  %5166 = vmatpush1.bf16.msra.mxu1 %v8854_v30 }
 0x355   :  { %v1664_v62 = vadd.f32 1.0, %v6346_v31  ;;  %5136 = vmatprep.subr.bf16.mxu0 %v8912_v9  ;;  %5168 = vmatprep.subr.bf16.mxu1 %v8913_v33  ;;  %v6348_v48 = vpop.eup %6347 }
 0x356   :  { %6351 = vrcp.f32 %v1663_v7  ;;  %1884 = vmatprep.mubr.f32.mxu0 %v8788_v44  ;;  %1955 = vmatprep.mubr.f32.mxu1 %v8788_v44  ;;  %v6350_v45 = vpop.eup %6349 }
 0x357   :  { %6353 = vrcp.f32 %v1664_v62  ;;  %v1665_v31 = vadd.f32 1.0, %v6350_v45  ;;  %v8922_v62 = vld [vmem:[#allocation76_spill] sm:$0xff]  ;;  %v8928_v45 = vld [vmem:[#allocation82_spill] sm:$0xff] }
 0x358   :  { %5138 = vmatpush1.bf16.msra.mxu0 %v8914_v25  ;;  %5170 = vmatpush1.bf16.msra.mxu1 %v8915_v19 }
 0x359   :  { %5140 = vmatprep.subr.bf16.mxu0 %v8916_v14  ;;  %5172 = vmatprep.subr.bf16.mxu1 %v8917_v20  ;;  %v8923_v20 = vld [vmem:[#allocation77_spill] sm:$0xff]  ;;  %6355 = vrcp.f32 %v1665_v31 }
 0x35a   :  { %v8932_v31 = vld [vmem:[#allocation25_spill] sm:$0xff] }
 0x35c   :  { %5142 = vmatpush1.bf16.msra.mxu0 %v8918_v36  ;;  %5174 = vmatpush1.bf16.msra.mxu1 %v8919_v10 }
 0x35d   :  { %5144 = vmatprep.subr.bf16.mxu0 %v8920_v13  ;;  %5176 = vmatprep.subr.bf16.mxu1 %v8921_v43  ;;  %v8924_v13 = vld [vmem:[#allocation78_spill] sm:$0xff]  ;;  %v8925_v43 = vld [vmem:[#allocation79_spill] sm:$0xff] }
 0x360   :  { %v6352_v23 = vpop.eup %6351  ;;  %5146 = vmatpush1.bf16.msra.mxu0 %v8865_v22  ;;  %5178 = vmatpush1.bf16.msra.mxu1 %v8866_v60 }
 0x361   :  { %v1674_v49 = vmul.f32 %v6352_v23, %v6348_v48  ;;  %v6354_v7 = vpop.eup %6353  ;;  %5148 = vmatprep.subr.bf16.mxu0 %v8922_v62  ;;  %5180 = vmatprep.subr.bf16.mxu1 %v8923_v20  ;;  %v8926_v48 = vld [vmem:[#allocation80_spill] sm:$0xff]  ;;  %v8927_v23 = vld [vmem:[#allocation81_spill] sm:$0xff]  ;;  %v8929_v62 = vld [vmem:[#allocation83_spill] sm:$0xff] }
 0x362   :  { %v1673_v10 = vmul.f32 %v6354_v7, %v7731_v2  ;;  %v8930_v20 = vld [vmem:[#allocation84_spill] sm:$0xff] }
 0x363   :  { %v6356_v2 = vpop.eup %6355  ;;  %v8931_v7 = vld [vmem:[#allocation24_spill] sm:$0xff] }
 0x364   :  { %v7849_v36 = vadd.f32 %v1674_v49, %v1673_v10  ;;  %5150 = vmatpush1.bf16.msra.mxu0 %v8924_v13  ;;  %5182 = vmatpush1.bf16.msra.mxu1 %v8925_v43 }
 0x365   :  { %5152 = vmatprep.subr.bf16.mxu0 %v8926_v48  ;;  %5184 = vmatprep.subr.bf16.mxu1 %v8927_v23 }
 0x366   :  { %6357 = vtanh.f32 %v7849_v36 }
 0x368   :  { %5154 = vmatpush1.bf16.msra.mxu0 %v8928_v45  ;;  %5186 = vmatpush1.bf16.msra.mxu1 %v8929_v62 }
 0x369   :  { %5156 = vmatprep.subr.bf16.mxu0 %v8930_v20  ;;  %5188 = vmatprep.subr.bf16.mxu1 %v8876_v56 }
 0x36c   :  { %5158 = vmatpush1.bf16.msra.mxu0 %v8877_v29  ;;  %5190 = vmatpush1.bf16.msra.mxu1 %v8878_v4 }
 0x36d   :  { %5160 = vmatprep.subr.bf16.mxu0 %v8879_v39  ;;  %5192 = vmatprep.subr.bf16.mxu1 %v8880_v17 }
 0x370   :  { %v6358_v10 = vpop.eup %6357  ;;  %5162 = vmatpush1.bf16.msra.mxu0 %v8881_v63  ;;  %5194 = vmatpush1.bf16.msra.mxu1 %v8882_v27 }
 0x371   :  { %5196 = vmatprep.subr.bf16.mxu0 %v8883_v52  ;;  %5228 = vmatprep.subr.bf16.mxu1 %v8884_v26  ;;  %v1677_v49 = vmul.f32 %v6358_v10, %v6356_v2  ;;  %v8933_v2 = vld [vmem:[#allocation26_spill] sm:$0xff]  ;;  %v8934_v10 = vld [vmem:[#allocation27_spill] sm:$0xff] }
 0x373   :  { %1885 = vmatmul.mubr.f32.vlgmr.msra.gmra.mrb[20].mxu0 %v1677_v49  ;;  %1956 = vmatmul.mubr.f32.vlgmr.msra.gmra.mrb[20].mxu1 %v1677_v49 }
 0x374   :  { %5198 = vmatpush1.bf16.msra.mxu0 %v6675_v35  ;;  %5230 = vmatpush1.bf16.msra.mxu1 %v6686_v38 }
 0x375   :  { %5200 = vmatprep.subr.bf16.mxu0 %v6698_v42  ;;  %5232 = vmatprep.subr.bf16.mxu1 %v6713_v47 }
 0x376   :  { %2054 = vmatprep.mubr.f32.mxu0 %v8788_v44  ;;  %2125 = vmatprep.mubr.f32.mxu1 %v8788_v44 }
 0x378   :  { %5202 = vmatpush1.bf16.msra.mxu0 %v6723_v50  ;;  %5234 = vmatpush1.bf16.msra.mxu1 %v6736_v54 }
 0x379   :  { %5204 = vmatprep.subr.bf16.mxu0 %v6749_v58  ;;  %5236 = vmatprep.subr.bf16.mxu1 %v6759_v61 }
 0x37c   :  { %5206 = vmatpush1.bf16.msra.mxu0 %v6772_v1  ;;  %5238 = vmatpush1.bf16.msra.mxu1 %v6782_v5 }
 0x37d   :  { %5208 = vmatprep.subr.bf16.mxu0 %v6792_v8  ;;  %5240 = vmatprep.subr.bf16.mxu1 %v6802_v11 }
 0x380   :  { %5210 = vmatpush1.bf16.msra.mxu0 %v6815_v15  ;;  %5242 = vmatpush1.bf16.msra.mxu1 %v6825_v18 }
 0x381   :  { %5212 = vmatprep.subr.bf16.mxu0 %v6835_v21  ;;  %5244 = vmatprep.subr.bf16.mxu1 %v6845_v24 }
 0x384   :  { %5214 = vmatpush1.bf16.msra.mxu0 %v6858_v28  ;;  %5246 = vmatpush1.bf16.msra.mxu1 %v6868_v32  ;;  %v8971_v28 = vld [vmem:[#allocation98_spill] sm:$0xff] }
 0x385   :  { %5216 = vmatprep.subr.bf16.mxu0 %v6878_v37  ;;  %5248 = vmatprep.subr.bf16.mxu1 %v6888_v41  ;;  %v8935_v41 = vld [vmem:[#allocation28_spill] sm:$0xff] }
 0x388   :  { %5218 = vmatpush1.bf16.msra.mxu0 %v6901_v46  ;;  %5250 = vmatpush1.bf16.msra.mxu1 %v6911_v51  ;;  %v8936_v46 = vld [vmem:[#allocation29_spill] sm:$0xff]  ;;  %v8969_v51 = vld [vmem:[#allocation92_spill] sm:$0xff] }
 0x389   :  { %5220 = vmatprep.subr.bf16.mxu0 %v6921_v55  ;;  %5252 = vmatprep.subr.bf16.mxu1 %v6931_v59  ;;  %v8937_v55 = vld [vmem:[#allocation30_spill] sm:$0xff]  ;;  %v8938_v59 = vld [vmem:[#allocation31_spill] sm:$0xff] }
 0x38c   :  { %5222 = vmatpush1.bf16.msra.mxu0 %v6944_v0  ;;  %5254 = vmatpush1.bf16.msra.mxu1 %v6954_v6  ;;  %v8939_v0 = vld [vmem:[#allocation32_spill] sm:$0xff]  ;;  %v8940_v6 = vld [vmem:[#allocation33_spill] sm:$0xff] }
 0x38d   :  { %5224 = vmatprep.subr.bf16.mxu0 %v8931_v7  ;;  %5256 = vmatprep.subr.bf16.mxu1 %v8932_v31  ;;  %v8950_v31 = vld [vmem:[#allocation43_spill] sm:$0xff]  ;;  %v8951_v7 = vld [vmem:[#allocation44_spill] sm:$0xff] }
 0x390   :  { %5226 = vmatpush1.bf16.msra.mxu0 %v8933_v2  ;;  %5258 = vmatpush1.bf16.msra.mxu1 %v8934_v10  ;;  %v8941_v2 = vld [vmem:[#allocation34_spill] sm:$0xff]  ;;  %v8942_v10 = vld [vmem:[#allocation35_spill] sm:$0xff] }
 0x391   :  { %5260 = vmatprep.subr.bf16.mxu0 %v8935_v41  ;;  %5292 = vmatprep.subr.bf16.mxu1 %v8936_v46  ;;  %v8943_v41 = vld [vmem:[#allocation36_spill] sm:$0xff]  ;;  %v8944_v46 = vld [vmem:[#allocation37_spill] sm:$0xff] }
 0x393   :  { %2055 = vmatmul.mubr.f32.vlgmr.msra.gmra.mrb[6].mxu0 %v1677_v49  ;;  %2126 = vmatmul.mubr.f32.vlgmr.msra.gmra.mrb[6].mxu1 %v1677_v49  ;;  %v8945_v49 = vld [vmem:[#allocation38_spill] sm:$0xff] }
 0x394   :  { %5262 = vmatpush1.bf16.msra.mxu0 %v8937_v55  ;;  %5294 = vmatpush1.bf16.msra.mxu1 %v8938_v59  ;;  %v8946_v55 = vld [vmem:[#allocation39_spill] sm:$0xff]  ;;  %v8947_v59 = vld [vmem:[#allocation40_spill] sm:$0xff] }
 0x395   :  { %5264 = vmatprep.subr.bf16.mxu0 %v8939_v0  ;;  %5296 = vmatprep.subr.bf16.mxu1 %v8940_v6  ;;  %v8948_v0 = vld [vmem:[#allocation41_spill] sm:$0xff]  ;;  %v8949_v6 = vld [vmem:[#allocation42_spill] sm:$0xff] }
 0x396   :  { %2220 = vmatprep.mubr.f32.mxu0 %v8788_v44  ;;  %2291 = vmatprep.mubr.f32.mxu1 %v8788_v44 }
 0x398   :  { %5266 = vmatpush1.bf16.msra.mxu0 %v8941_v2  ;;  %5298 = vmatpush1.bf16.msra.mxu1 %v8942_v10  ;;  %v8952_v2 = vld [vmem:[#allocation45_spill] sm:$0xff]  ;;  %v8953_v10 = vld [vmem:[#allocation46_spill] sm:$0xff] }
 0x399   :  { %5268 = vmatprep.subr.bf16.mxu0 %v8943_v41  ;;  %5300 = vmatprep.subr.bf16.mxu1 %v8944_v46  ;;  %v8954_v41 = vld [vmem:[#allocation47_spill] sm:$0xff]  ;;  %v8955_v46 = vld [vmem:[#allocation48_spill] sm:$0xff] }
 0x39c   :  { %5270 = vmatpush1.bf16.msra.mxu0 %v8945_v49  ;;  %5302 = vmatpush1.bf16.msra.mxu1 %v8946_v55  ;;  %v8956_v49 = vld [vmem:[#allocation49_spill] sm:$0xff]  ;;  %v8957_v55 = vld [vmem:[#allocation50_spill] sm:$0xff] }
 0x39d   :  { %5272 = vmatprep.subr.bf16.mxu0 %v8947_v59  ;;  %5304 = vmatprep.subr.bf16.mxu1 %v8948_v0  ;;  %v8958_v59 = vld [vmem:[#allocation51_spill] sm:$0xff]  ;;  %v8959_v0 = vld [vmem:[#allocation52_spill] sm:$0xff] }
 0x3a0   :  { %5274 = vmatpush1.bf16.msra.mxu0 %v8949_v6  ;;  %5306 = vmatpush1.bf16.msra.mxu1 %v8950_v31  ;;  %v8960_v6 = vld [vmem:[#allocation53_spill] sm:$0xff]  ;;  %v8961_v31 = vld [vmem:[#allocation54_spill] sm:$0xff] }
 0x3a1   :  { %5276 = vmatprep.subr.bf16.mxu0 %v8951_v7  ;;  %5308 = vmatprep.subr.bf16.mxu1 %v8952_v2  ;;  %v8962_v7 = vld [vmem:[#allocation55_spill] sm:$0xff]  ;;  %v8963_v2 = vld [vmem:[#allocation56_spill] sm:$0xff] }
 0x3a4   :  { %5278 = vmatpush1.bf16.msra.mxu0 %v8953_v10  ;;  %5310 = vmatpush1.bf16.msra.mxu1 %v8954_v41  ;;  %v8964_v10 = vld [vmem:[#allocation57_spill] sm:$0xff]  ;;  %v8965_v41 = vld [vmem:[#allocation58_spill] sm:$0xff] }
 0x3a5   :  { %5280 = vmatprep.subr.bf16.mxu0 %v8955_v46  ;;  %5312 = vmatprep.subr.bf16.mxu1 %v8956_v49  ;;  %v8966_v46 = vld [vmem:[#allocation59_spill] sm:$0xff]  ;;  %v8967_v49 = vld [vmem:[#allocation60_spill] sm:$0xff] }
 0x3a8   :  { %5282 = vmatpush1.bf16.msra.mxu0 %v8957_v55  ;;  %5314 = vmatpush1.bf16.msra.mxu1 %v8958_v59  ;;  %v8968_v55 = vld [vmem:[#allocation61_spill] sm:$0xff] }
 0x3a9   :  { %5284 = vmatprep.subr.bf16.mxu0 %v8959_v0  ;;  %5316 = vmatprep.subr.bf16.mxu1 %v8960_v6 }
 0x3ac   :  { %5286 = vmatpush1.bf16.msra.mxu0 %v8961_v31  ;;  %5318 = vmatpush1.bf16.msra.mxu1 %v8962_v7 }
 0x3ad   :  { %5288 = vmatprep.subr.bf16.mxu0 %v8963_v2  ;;  %5320 = vmatprep.subr.bf16.mxu1 %v8964_v10  ;;  %v8970_v10 = vld [vmem:[#allocation97_spill] sm:$0xff] }
 0x3b0   :  { %5290 = vmatpush1.bf16.msra.mxu0 %v8965_v41  ;;  %5322 = vmatpush1.bf16.msra.mxu1 %v8966_v46 }
 0x3b1   :  { %5324 = vmatprep.subr.bf16.mxu0 %v8967_v49  ;;  %5356 = vmatprep.subr.bf16.mxu1 %v8968_v55 }
 0x446   :  { %v1886_v59 = vpop.f32.mrb[20].mxu0  ;;  %v1957_v0 = vpop.f32.mrb[20].mxu1 }
 0x447   :  { %v1962_v6 = vadd.f32 %v1886_v59, %v8969_v51  ;;  %v1888_v37 = vpop.f32.mrb[21].mxu0  ;;  %v1959_v31 = vpop.f32.mrb[21].mxu1  ;;  %v1964_v41 = vadd.f32 %v1957_v0, %v8970_v10 }
 0x448   :  { %v1963_v7 = vadd.f32 %v1888_v37, %v8908_v40  ;;  %v1965_v46 = vadd.f32 %v1959_v31, %v8971_v28 }
 0x449   :  { %v4513_v32 = vmul.f32 -1.442695, %v1962_v6  ;;  %v4515_v24 = vmul.f32 -1.442695, %v1964_v41 }
 0x44a   :  { %v4514_v2 = vmul.f32 -1.442695, %v1963_v7 }
 0x44b   :  { %6359 = vpow2.f32 %v4513_v32 }
 0x44c   :  { %6361 = vpow2.f32 %v4514_v2 }
 0x44d   :  { %6363 = vtanh.f32 %v1965_v46 }
 0x44e   :  { %6365 = vpow2.f32 %v4515_v24 }
 0x455   :  { %v6360_v49 = vpop.eup %6359 }
 0x456   :  { %v1975_v21 = vadd.f32 1.0, %v6360_v49  ;;  %v6362_v55 = vpop.eup %6361 }
 0x457   :  { %v1976_v59 = vadd.f32 1.0, %v6362_v55  ;;  %v6364_v51 = vpop.eup %6363 }
 0x458   :  { %6367 = vrcp.f32 %v1975_v21  ;;  %v6366_v18 = vpop.eup %6365 }
 0x459   :  { %6369 = vrcp.f32 %v1976_v59  ;;  %v1977_v32 = vadd.f32 1.0, %v6366_v18 }
 0x45b   :  { %6371 = vrcp.f32 %v1977_v32 }
 0x462   :  { %v6368_v37 = vpop.eup %6367 }
 0x463   :  { %v1986_v6 = vmul.f32 %v6368_v37, %v6364_v51  ;;  %v6370_v7 = vpop.eup %6369 }
 0x464   :  { %v1985_v2 = vmul.f32 %v6370_v7, %v7823_v57 }
 0x465   :  { %v6372_v51 = vpop.eup %6371 }
 0x466   :  { %v2056_v0 = vpop.f32.mrb[6].mxu0  ;;  %v2127_v10 = vpop.f32.mrb[6].mxu1  ;;  %v7941_v31 = vadd.f32 %v1986_v6, %v1985_v2 }
 0x467   :  { %v6185_v41 = vadd.f32 %v2056_v0, %v8911_v12  ;;  %v2058_v46 = vpop.f32.mrb[7].mxu0  ;;  %v2129_v49 = vpop.f32.mrb[7].mxu1  ;;  %v6201_v18 = vadd.f32 %v2127_v10, %v8852_v16  ;;  %v8972_v10 = vld [vmem:[#allocation69_spill] sm:$0xff] }
 0x468   :  { %v6186_v21 = vadd.f32 %v2058_v46, %v8851_v3  ;;  %6373 = vtanh.f32 %v7941_v31  ;;  %v6202_v57 = vadd.f32 %v2129_v49, %v7608_v34  ;;  %v8974_v46 = vld [vmem:[#allocation71_spill] sm:$0xff] }
 0x469   :  { %v4516_v24 = vmul.f32 -1.442695, %v6185_v41  ;;  %v4518_v37 = vmul.f32 -1.442695, %v6201_v18  ;;  %v8973_v41 = vld [vmem:[#allocation70_spill] sm:$0xff] }
 0x46a   :  { %v4517_v55 = vmul.f32 -1.442695, %v6186_v21  ;;  %v8975_v21 = vld [vmem:[#allocation72_spill] sm:$0xff] }
 0x46b   :  { %6375 = vpow2.f32 %v4516_v24  ;;  %v8976_v24 = vld [vmem:[#allocation73_spill] sm:$0xff] }
 0x46c   :  { %6377 = vpow2.f32 %v4517_v55 }
 0x46d   :  { %6379 = vtanh.f32 %v6202_v57 }
 0x46e   :  { %6381 = vpow2.f32 %v4518_v37  ;;  %v8977_v37 = vld [vmem:[#allocation76_spill] sm:$0xff] }
 0x472   :  { %v6374_v59 = vpop.eup %6373 }
 0x473   :  { %v1989_v6 = vmul.f32 %v6374_v59, %v6372_v51 }
 0x475   :  { %v6376_v7 = vpop.eup %6375  ;;  %2221 = vmatmul.mubr.f32.vlgmr.msra.gmra.mrb[22].mxu0 %v1989_v6  ;;  %2292 = vmatmul.mubr.f32.vlgmr.msra.gmra.mrb[22].mxu1 %v1989_v6  ;;  %v8978_v6 = vld [vmem:[#allocation77_spill] sm:$0xff] }
 0x476   :  { %v2141_v2 = vadd.f32 1.0, %v6376_v7  ;;  %v6378_v32 = vpop.eup %6377  ;;  %5326 = vmatpush1.bf16.msra.mxu0 %v8853_v53  ;;  %5358 = vmatpush1.bf16.msra.mxu1 %v8854_v30 }
 0x477   :  { %v2142_v0 = vadd.f32 1.0, %v6378_v32  ;;  %5328 = vmatprep.subr.bf16.mxu0 %v8912_v9  ;;  %5360 = vmatprep.subr.bf16.mxu1 %v8913_v33  ;;  %v6380_v49 = vpop.eup %6379 }
 0x478   :  { %6383 = vrcp.f32 %v2141_v2  ;;  %2362 = vmatprep.mubr.f32.mxu0 %v8788_v44  ;;  %2433 = vmatprep.mubr.f32.mxu1 %v8788_v44  ;;  %v6382_v55 = vpop.eup %6381 }
 0x479   :  { %6385 = vrcp.f32 %v2142_v0  ;;  %v2143_v59 = vadd.f32 1.0, %v6382_v55  ;;  %v8980_v55 = vld [vmem:[#allocation12_spill] sm:$0xff] }
 0x47a   :  { %5330 = vmatpush1.bf16.msra.mxu0 %v8914_v25  ;;  %5362 = vmatpush1.bf16.msra.mxu1 %v8915_v19 }
 0x47b   :  { %5332 = vmatprep.subr.bf16.mxu0 %v8916_v14  ;;  %5364 = vmatprep.subr.bf16.mxu1 %v8972_v10  ;;  %6387 = vrcp.f32 %v2143_v59  ;;  %v8984_v59 = vld [vmem:[#allocation16_spill] sm:$0xff] }
 0x47e   :  { %5334 = vmatpush1.bf16.msra.mxu0 %v8973_v41  ;;  %5366 = vmatpush1.bf16.msra.mxu1 %v8974_v46 }
 0x47f   :  { %5336 = vmatprep.subr.bf16.mxu0 %v8975_v21  ;;  %5368 = vmatprep.subr.bf16.mxu1 %v8976_v24 }
 0x482   :  { %v6384_v18 = vpop.eup %6383  ;;  %5338 = vmatpush1.bf16.msra.mxu0 %v8865_v22  ;;  %5370 = vmatpush1.bf16.msra.mxu1 %v8866_v60 }
 0x483   :  { %v2152_v51 = vmul.f32 %v6384_v18, %v6380_v49  ;;  %v6386_v57 = vpop.eup %6385  ;;  %5340 = vmatprep.subr.bf16.mxu0 %v8977_v37  ;;  %5372 = vmatprep.subr.bf16.mxu1 %v8978_v6  ;;  %v8979_v49 = vld [vmem:[#allocation11_spill] sm:$0xff]  ;;  %v8981_v18 = vld [vmem:[#allocation13_spill] sm:$0xff] }
 0x484   :  { %v2151_v7 = vmul.f32 %v6386_v57, %v7849_v36  ;;  %v8983_v57 = vld [vmem:[#allocation15_spill] sm:$0xff] }
 0x485   :  { %v6388_v36 = vpop.eup %6387 }
 0x486   :  { %v7967_v2 = vadd.f32 %v2152_v51, %v2151_v7  ;;  %5342 = vmatpush1.bf16.msra.mxu0 %v8924_v13  ;;  %5374 = vmatpush1.bf16.msra.mxu1 %v8925_v43  ;;  %v8982_v51 = vld [vmem:[#allocation14_spill] sm:$0xff]  ;;  %v8985_v7 = vld [vmem:[#allocation17_spill] sm:$0xff] }
 0x487   :  { %5344 = vmatprep.subr.bf16.mxu0 %v8926_v48  ;;  %5376 = vmatprep.subr.bf16.mxu1 %v8927_v23 }
 0x488   :  { %6389 = vtanh.f32 %v7967_v2 }
 0x48a   :  { %5346 = vmatpush1.bf16.msra.mxu0 %v8928_v45  ;;  %5378 = vmatpush1.bf16.msra.mxu1 %v8929_v62 }
 0x48b   :  { %5348 = vmatprep.subr.bf16.mxu0 %v8930_v20  ;;  %5380 = vmatprep.subr.bf16.mxu1 %v8876_v56 }
 0x48e   :  { %5350 = vmatpush1.bf16.msra.mxu0 %v8877_v29  ;;  %5382 = vmatpush1.bf16.msra.mxu1 %v8878_v4 }
 0x48f   :  { %5352 = vmatprep.subr.bf16.mxu0 %v8879_v39  ;;  %5384 = vmatprep.subr.bf16.mxu1 %v8880_v17 }
 0x492   :  { %v6390_v32 = vpop.eup %6389  ;;  %5354 = vmatpush1.bf16.msra.mxu0 %v8881_v63  ;;  %5386 = vmatpush1.bf16.msra.mxu1 %v8882_v27 }
 0x493   :  { %v2155_v0 = vmul.f32 %v6390_v32, %v6388_v36  ;;  %5388 = vmatprep.subr.bf16.mxu0 %v8883_v52  ;;  %5420 = vmatprep.subr.bf16.mxu1 %v8884_v26  ;;  %v8986_v36 = vld [vmem:[#allocation18_spill] sm:$0xff]  ;;  %v8987_v32 = vld [vmem:[#allocation19_spill] sm:$0xff] }
 0x495   :  { %2363 = vmatmul.mubr.f32.vlgmr.msra.gmra.mrb[22].mxu0 %v2155_v0  ;;  %2434 = vmatmul.mubr.f32.vlgmr.msra.gmra.mrb[22].mxu1 %v2155_v0 }
 0x496   :  { %5390 = vmatpush1.bf16.msra.mxu0 %v6675_v35  ;;  %5422 = vmatpush1.bf16.msra.mxu1 %v6686_v38 }
 0x497   :  { %5392 = vmatprep.subr.bf16.mxu0 %v6698_v42  ;;  %5424 = vmatprep.subr.bf16.mxu1 %v6713_v47 }
 0x498   :  { %2532 = vmatprep.mubr.f32.mxu0 %v8788_v44  ;;  %2603 = vmatprep.mubr.f32.mxu1 %v8788_v44 }
 0x49a   :  { %5394 = vmatpush1.bf16.msra.mxu0 %v6723_v50  ;;  %5426 = vmatpush1.bf16.msra.mxu1 %v6736_v54 }
 0x49b   :  { %5396 = vmatprep.subr.bf16.mxu0 %v6749_v58  ;;  %5428 = vmatprep.subr.bf16.mxu1 %v6759_v61 }
 0x49e   :  { %5398 = vmatpush1.bf16.msra.mxu0 %v6772_v1  ;;  %5430 = vmatpush1.bf16.msra.mxu1 %v6782_v5 }
 0x49f   :  { %5400 = vmatprep.subr.bf16.mxu0 %v6792_v8  ;;  %5432 = vmatprep.subr.bf16.mxu1 %v6802_v11  ;;  %v8988_v11 = vld [vmem:[#allocation20_spill] sm:$0xff] }
 0x4a2   :  { %5402 = vmatpush1.bf16.msra.mxu0 %v6815_v15  ;;  %5434 = vmatpush1.bf16.msra.mxu1 %v8979_v49  ;;  %v8989_v15 = vld [vmem:[#allocation21_spill] sm:$0xff]  ;;  %v8990_v49 = vld [vmem:[#allocation22_spill] sm:$0xff] }
 0x4a3   :  { %5404 = vmatprep.subr.bf16.mxu0 %v8980_v55  ;;  %5436 = vmatprep.subr.bf16.mxu1 %v8981_v18  ;;  %v8991_v55 = vld [vmem:[#allocation23_spill] sm:$0xff]  ;;  %v8992_v18 = vld [vmem:[#allocation24_spill] sm:$0xff] }
 0x4a6   :  { %5406 = vmatpush1.bf16.msra.mxu0 %v8982_v51  ;;  %5438 = vmatpush1.bf16.msra.mxu1 %v8983_v57  ;;  %v8993_v51 = vld [vmem:[#allocation25_spill] sm:$0xff]  ;;  %v8994_v57 = vld [vmem:[#allocation26_spill] sm:$0xff] }
 0x4a7   :  { %5408 = vmatprep.subr.bf16.mxu0 %v8984_v59  ;;  %5440 = vmatprep.subr.bf16.mxu1 %v8985_v7  ;;  %v8995_v59 = vld [vmem:[#allocation27_spill] sm:$0xff]  ;;  %v8996_v7 = vld [vmem:[#allocation28_spill] sm:$0xff] }
 0x4aa   :  { %5410 = vmatpush1.bf16.msra.mxu0 %v8986_v36  ;;  %5442 = vmatpush1.bf16.msra.mxu1 %v8987_v32  ;;  %v8997_v36 = vld [vmem:[#allocation29_spill] sm:$0xff]  ;;  %v9030_v32 = vld [vmem:[#allocation92_spill] sm:$0xff] }
 0x4ab   :  { %5412 = vmatprep.subr.bf16.mxu0 %v8988_v11  ;;  %5444 = vmatprep.subr.bf16.mxu1 %v8989_v15  ;;  %v8998_v11 = vld [vmem:[#allocation30_spill] sm:$0xff]  ;;  %v8999_v15 = vld [vmem:[#allocation31_spill] sm:$0xff] }
 0x4ae   :  { %5414 = vmatpush1.bf16.msra.mxu0 %v8990_v49  ;;  %5446 = vmatpush1.bf16.msra.mxu1 %v8991_v55  ;;  %v9000_v49 = vld [vmem:[#allocation32_spill] sm:$0xff]  ;;  %v9001_v55 = vld [vmem:[#allocation33_spill] sm:$0xff] }
 0x4af   :  { %5416 = vmatprep.subr.bf16.mxu0 %v8992_v18  ;;  %5448 = vmatprep.subr.bf16.mxu1 %v8993_v51  ;;  %v9011_v51 = vld [vmem:[#allocation43_spill] sm:$0xff]  ;;  %v9012_v18 = vld [vmem:[#allocation44_spill] sm:$0xff] }
 0x4b2   :  { %5418 = vmatpush1.bf16.msra.mxu0 %v8994_v57  ;;  %5450 = vmatpush1.bf16.msra.mxu1 %v8995_v59  ;;  %v9002_v57 = vld [vmem:[#allocation34_spill] sm:$0xff]  ;;  %v9003_v59 = vld [vmem:[#allocation35_spill] sm:$0xff] }
 0x4b3   :  { %5452 = vmatprep.subr.bf16.mxu0 %v8996_v7  ;;  %5484 = vmatprep.subr.bf16.mxu1 %v8997_v36  ;;  %v9004_v7 = vld [vmem:[#allocation36_spill] sm:$0xff]  ;;  %v9005_v36 = vld [vmem:[#allocation37_spill] sm:$0xff] }
 0x4b5   :  { %2533 = vmatmul.mubr.f32.vlgmr.msra.gmra.mrb[8].mxu0 %v2155_v0  ;;  %2604 = vmatmul.mubr.f32.vlgmr.msra.gmra.mrb[8].mxu1 %v2155_v0  ;;  %v9006_v0 = vld [vmem:[#allocation38_spill] sm:$0xff] }
 0x4b6   :  { %5454 = vmatpush1.bf16.msra.mxu0 %v8998_v11  ;;  %5486 = vmatpush1.bf16.msra.mxu1 %v8999_v15  ;;  %v9007_v11 = vld [vmem:[#allocation39_spill] sm:$0xff]  ;;  %v9008_v15 = vld [vmem:[#allocation40_spill] sm:$0xff] }
 0x4b7   :  { %5456 = vmatprep.subr.bf16.mxu0 %v9000_v49  ;;  %5488 = vmatprep.subr.bf16.mxu1 %v9001_v55  ;;  %v9009_v49 = vld [vmem:[#allocation41_spill] sm:$0xff]  ;;  %v9010_v55 = vld [vmem:[#allocation42_spill] sm:$0xff] }
 0x4b8   :  { %2698 = vmatprep.mubr.f32.mxu0 %v8788_v44  ;;  %2769 = vmatprep.mubr.f32.mxu1 %v8788_v44 }
 0x4ba   :  { %5458 = vmatpush1.bf16.msra.mxu0 %v9002_v57  ;;  %5490 = vmatpush1.bf16.msra.mxu1 %v9003_v59  ;;  %v9013_v57 = vld [vmem:[#allocation45_spill] sm:$0xff]  ;;  %v9014_v59 = vld [vmem:[#allocation46_spill] sm:$0xff] }
 0x4bb   :  { %5460 = vmatprep.subr.bf16.mxu0 %v9004_v7  ;;  %5492 = vmatprep.subr.bf16.mxu1 %v9005_v36  ;;  %v9015_v7 = vld [vmem:[#allocation47_spill] sm:$0xff]  ;;  %v9016_v36 = vld [vmem:[#allocation48_spill] sm:$0xff] }
 0x4be   :  { %5462 = vmatpush1.bf16.msra.mxu0 %v9006_v0  ;;  %5494 = vmatpush1.bf16.msra.mxu1 %v9007_v11  ;;  %v9017_v0 = vld [vmem:[#allocation49_spill] sm:$0xff]  ;;  %v9018_v11 = vld [vmem:[#allocation50_spill] sm:$0xff] }
 0x4bf   :  { %5464 = vmatprep.subr.bf16.mxu0 %v9008_v15  ;;  %5496 = vmatprep.subr.bf16.mxu1 %v9009_v49  ;;  %v9019_v15 = vld [vmem:[#allocation51_spill] sm:$0xff]  ;;  %v9020_v49 = vld [vmem:[#allocation52_spill] sm:$0xff] }
 0x4c2   :  { %5466 = vmatpush1.bf16.msra.mxu0 %v9010_v55  ;;  %5498 = vmatpush1.bf16.msra.mxu1 %v9011_v51  ;;  %v9021_v55 = vld [vmem:[#allocation53_spill] sm:$0xff]  ;;  %v9022_v51 = vld [vmem:[#allocation54_spill] sm:$0xff] }
 0x4c3   :  { %5468 = vmatprep.subr.bf16.mxu0 %v9012_v18  ;;  %5500 = vmatprep.subr.bf16.mxu1 %v9013_v57  ;;  %v9023_v18 = vld [vmem:[#allocation55_spill] sm:$0xff]  ;;  %v9024_v57 = vld [vmem:[#allocation56_spill] sm:$0xff] }
 0x4c6   :  { %5470 = vmatpush1.bf16.msra.mxu0 %v9014_v59  ;;  %5502 = vmatpush1.bf16.msra.mxu1 %v9015_v7  ;;  %v9025_v59 = vld [vmem:[#allocation57_spill] sm:$0xff]  ;;  %v9026_v7 = vld [vmem:[#allocation58_spill] sm:$0xff] }
 0x4c7   :  { %5472 = vmatprep.subr.bf16.mxu0 %v9016_v36  ;;  %5504 = vmatprep.subr.bf16.mxu1 %v9017_v0  ;;  %v9027_v36 = vld [vmem:[#allocation59_spill] sm:$0xff]  ;;  %v9028_v0 = vld [vmem:[#allocation60_spill] sm:$0xff] }
 0x4ca   :  { %5474 = vmatpush1.bf16.msra.mxu0 %v9018_v11  ;;  %5506 = vmatpush1.bf16.msra.mxu1 %v9019_v15  ;;  %v9029_v11 = vld [vmem:[#allocation61_spill] sm:$0xff] }
 0x4cb   :  { %5476 = vmatprep.subr.bf16.mxu0 %v9020_v49  ;;  %5508 = vmatprep.subr.bf16.mxu1 %v9021_v55 }
 0x4ce   :  { %5478 = vmatpush1.bf16.msra.mxu0 %v9022_v51  ;;  %5510 = vmatpush1.bf16.msra.mxu1 %v9023_v18 }
 0x4cf   :  { %5480 = vmatprep.subr.bf16.mxu0 %v9024_v57  ;;  %5512 = vmatprep.subr.bf16.mxu1 %v9025_v59  ;;  %v9031_v59 = vld [vmem:[#allocation97_spill] sm:$0xff] }
 0x4d2   :  { %5482 = vmatpush1.bf16.msra.mxu0 %v9026_v7  ;;  %5514 = vmatpush1.bf16.msra.mxu1 %v9027_v36 }
 0x4d3   :  { %5516 = vmatprep.subr.bf16.mxu0 %v9028_v0  ;;  %5548 = vmatprep.subr.bf16.mxu1 %v9029_v11 }
 0x568   :  { %v2364_v15 = vpop.f32.mrb[22].mxu0  ;;  %v2435_v49 = vpop.f32.mrb[22].mxu1 }
 0x569   :  { %v2440_v55 = vadd.f32 %v2364_v15, %v9030_v32  ;;  %v2366_v8 = vpop.f32.mrb[23].mxu0  ;;  %v2437_v51 = vpop.f32.mrb[23].mxu1  ;;  %v2442_v7 = vadd.f32 %v2435_v49, %v9031_v59 }
 0x56a   :  { %v2441_v18 = vadd.f32 %v2366_v8, %v8908_v40  ;;  %v2443_v36 = vadd.f32 %v2437_v51, %v8971_v28 }
 0x56b   :  { %v4519_v5 = vmul.f32 -1.442695, %v2440_v55  ;;  %v4521_v1 = vmul.f32 -1.442695, %v2442_v7 }
 0x56c   :  { %v4520_v57 = vmul.f32 -1.442695, %v2441_v18 }
 0x56d   :  { %6391 = vpow2.f32 %v4519_v5 }
 0x56e   :  { %6393 = vpow2.f32 %v4520_v57 }
 0x56f   :  { %6395 = vtanh.f32 %v2443_v36 }
 0x570   :  { %6397 = vpow2.f32 %v4521_v1 }
 0x577   :  { %v6392_v0 = vpop.eup %6391 }
 0x578   :  { %v2453_v61 = vadd.f32 1.0, %v6392_v0  ;;  %v6394_v11 = vpop.eup %6393 }
 0x579   :  { %v2454_v15 = vadd.f32 1.0, %v6394_v11  ;;  %v6396_v32 = vpop.eup %6395 }
 0x57a   :  { %6399 = vrcp.f32 %v2453_v61  ;;  %v6398_v58 = vpop.eup %6397 }
 0x57b   :  { %6401 = vrcp.f32 %v2454_v15  ;;  %v2455_v5 = vadd.f32 1.0, %v6398_v58 }
 0x57d   :  { %6403 = vrcp.f32 %v2455_v5 }
 0x584   :  { %v6400_v8 = vpop.eup %6399 }
 0x585   :  { %v2464_v55 = vmul.f32 %v6400_v8, %v6396_v32  ;;  %v6402_v18 = vpop.eup %6401 }
 0x586   :  { %v2463_v57 = vmul.f32 %v6402_v18, %v7941_v31 }
 0x587   :  { %v6404_v31 = vpop.eup %6403 }
 0x588   :  { %v2534_v49 = vpop.f32.mrb[8].mxu0  ;;  %v2605_v59 = vpop.f32.mrb[8].mxu1  ;;  %v8059_v51 = vadd.f32 %v2464_v55, %v2463_v57 }
 0x589   :  { %v6187_v7 = vadd.f32 %v2534_v49, %v8911_v12  ;;  %v2536_v36 = vpop.f32.mrb[9].mxu0  ;;  %v2607_v0 = vpop.f32.mrb[9].mxu1  ;;  %v6203_v58 = vadd.f32 %v2605_v59, %v8852_v16 }
 0x58a   :  { %v6188_v61 = vadd.f32 %v2536_v36, %v8851_v3  ;;  %6405 = vtanh.f32 %v8059_v51  ;;  %v6204_v32 = vadd.f32 %v2607_v0, %v7608_v34 }
 0x58b   :  { %v4522_v1 = vmul.f32 -1.442695, %v6187_v7  ;;  %v4524_v8 = vmul.f32 -1.442695, %v6203_v58 }
 0x58c   :  { %v4523_v11 = vmul.f32 -1.442695, %v6188_v61 }
 0x58d   :  { %6407 = vpow2.f32 %v4522_v1 }
 0x58e   :  { %6409 = vpow2.f32 %v4523_v11 }
 0x58f   :  { %6411 = vtanh.f32 %v6204_v32 }
 0x590   :  { %6413 = vpow2.f32 %v4524_v8  ;;  %v9033_v8 = vld [vmem:[#allocation5_spill] sm:$0xff] }
 0x594   :  { %v6406_v15 = vpop.eup %6405 }
 0x595   :  { %v2467_v55 = vmul.f32 %v6406_v15, %v6404_v31  ;;  %v9032_v15 = vld [vmem:[#allocation4_spill] sm:$0xff] }
 0x597   :  { %v6408_v18 = vpop.eup %6407  ;;  %2699 = vmatmul.mubr.f32.vlgmr.msra.gmra.mrb[24].mxu0 %v2467_v55  ;;  %2770 = vmatmul.mubr.f32.vlgmr.msra.gmra.mrb[24].mxu1 %v2467_v55  ;;  %v9034_v55 = vld [vmem:[#allocation6_spill] sm:$0xff] }
 0x598   :  { %v2619_v57 = vadd.f32 1.0, %v6408_v18  ;;  %v6410_v5 = vpop.eup %6409  ;;  %5518 = vmatpush1.bf16.msra.mxu0 %v8853_v53  ;;  %5550 = vmatpush1.bf16.msra.mxu1 %v8854_v30  ;;  %v9035_v18 = vld [vmem:[#allocation7_spill] sm:$0xff] }
 0x599   :  { %v2620_v49 = vadd.f32 1.0, %v6410_v5  ;;  %5520 = vmatprep.subr.bf16.mxu0 %v8912_v9  ;;  %5552 = vmatprep.subr.bf16.mxu1 %v8913_v33  ;;  %v6412_v59 = vpop.eup %6411  ;;  %v9037_v5 = vld [vmem:[#allocation9_spill] sm:$0xff] }
 0x59a   :  { %6415 = vrcp.f32 %v2619_v57  ;;  %2840 = vmatprep.mubr.f32.mxu0 %v8788_v44  ;;  %2911 = vmatprep.mubr.f32.mxu1 %v8788_v44  ;;  %v6414_v7 = vpop.eup %6413  ;;  %v9036_v57 = vld [vmem:[#allocation8_spill] sm:$0xff] }
 0x59b   :  { %6417 = vrcp.f32 %v2620_v49  ;;  %v2621_v1 = vadd.f32 1.0, %v6414_v7  ;;  %v9038_v49 = vld [vmem:[#allocation10_spill] sm:$0xff]  ;;  %v9040_v7 = vld [vmem:[#allocation12_spill] sm:$0xff] }
 0x59c   :  { %5522 = vmatpush1.bf16.msra.mxu0 %v8914_v25  ;;  %5554 = vmatpush1.bf16.msra.mxu1 %v8915_v19 }
 0x59d   :  { %5524 = vmatprep.subr.bf16.mxu0 %v8916_v14  ;;  %5556 = vmatprep.subr.bf16.mxu1 %v8972_v10  ;;  %6419 = vrcp.f32 %v2621_v1  ;;  %v9044_v1 = vld [vmem:[#allocation16_spill] sm:$0xff] }
 0x5a0   :  { %5526 = vmatpush1.bf16.msra.mxu0 %v8973_v41  ;;  %5558 = vmatpush1.bf16.msra.mxu1 %v8974_v46 }
 0x5a1   :  { %5528 = vmatprep.subr.bf16.mxu0 %v8975_v21  ;;  %5560 = vmatprep.subr.bf16.mxu1 %v8976_v24 }
 0x5a4   :  { %v6416_v36 = vpop.eup %6415  ;;  %5530 = vmatpush1.bf16.msra.mxu0 %v8865_v22  ;;  %5562 = vmatpush1.bf16.msra.mxu1 %v8866_v60 }
 0x5a5   :  { %v2630_v0 = vmul.f32 %v6416_v36, %v6412_v59  ;;  %v6418_v61 = vpop.eup %6417  ;;  %5532 = vmatprep.subr.bf16.mxu0 %v8977_v37  ;;  %5564 = vmatprep.subr.bf16.mxu1 %v8978_v6  ;;  %v9039_v59 = vld [vmem:[#allocation11_spill] sm:$0xff]  ;;  %v9041_v36 = vld [vmem:[#allocation13_spill] sm:$0xff] }
 0x5a6   :  { %v2629_v11 = vmul.f32 %v6418_v61, %v7967_v2  ;;  %v9043_v61 = vld [vmem:[#allocation15_spill] sm:$0xff] }
 0x5a7   :  { %v6420_v2 = vpop.eup %6419 }
 0x5a8   :  { %v8085_v58 = vadd.f32 %v2630_v0, %v2629_v11  ;;  %5534 = vmatpush1.bf16.msra.mxu0 %v8924_v13  ;;  %5566 = vmatpush1.bf16.msra.mxu1 %v8925_v43  ;;  %v9042_v0 = vld [vmem:[#allocation14_spill] sm:$0xff]  ;;  %v9045_v11 = vld [vmem:[#allocation17_spill] sm:$0xff] }
 0x5a9   :  { %5536 = vmatprep.subr.bf16.mxu0 %v8926_v48  ;;  %5568 = vmatprep.subr.bf16.mxu1 %v8927_v23 }
 0x5aa   :  { %6421 = vtanh.f32 %v8085_v58 }
 0x5ac   :  { %5538 = vmatpush1.bf16.msra.mxu0 %v8928_v45  ;;  %5570 = vmatpush1.bf16.msra.mxu1 %v8929_v62 }
 0x5ad   :  { %5540 = vmatprep.subr.bf16.mxu0 %v8930_v20  ;;  %5572 = vmatprep.subr.bf16.mxu1 %v8876_v56 }
 0x5b0   :  { %5542 = vmatpush1.bf16.msra.mxu0 %v8877_v29  ;;  %5574 = vmatpush1.bf16.msra.mxu1 %v8878_v4 }
 0x5b1   :  { %5544 = vmatprep.subr.bf16.mxu0 %v8879_v39  ;;  %5576 = vmatprep.subr.bf16.mxu1 %v8880_v17 }
 0x5b4   :  { %v6422_v31 = vpop.eup %6421  ;;  %5546 = vmatpush1.bf16.msra.mxu0 %v8881_v63  ;;  %5578 = vmatpush1.bf16.msra.mxu1 %v8882_v27 }
 0x5b5   :  { %5580 = vmatprep.subr.bf16.mxu0 %v8883_v52  ;;  %5612 = vmatprep.subr.bf16.mxu1 %v8884_v26  ;;  %v2633_v32 = vmul.f32 %v6422_v31, %v6420_v2  ;;  %v9046_v2 = vld [vmem:[#allocation18_spill] sm:$0xff]  ;;  %v9047_v31 = vld [vmem:[#allocation19_spill] sm:$0xff] }
 0x5b7   :  { %2841 = vmatmul.mubr.f32.vlgmr.msra.gmra.mrb[24].mxu0 %v2633_v32  ;;  %2912 = vmatmul.mubr.f32.vlgmr.msra.gmra.mrb[24].mxu1 %v2633_v32 }
 0x5b8   :  { %5582 = vmatpush1.bf16.msra.mxu0 %v6675_v35  ;;  %5614 = vmatpush1.bf16.msra.mxu1 %v6686_v38 }
 0x5b9   :  { %5584 = vmatprep.subr.bf16.mxu0 %v6698_v42  ;;  %5616 = vmatprep.subr.bf16.mxu1 %v6713_v47 }
 0x5ba   :  { %3010 = vmatprep.mubr.f32.mxu0 %v8788_v44  ;;  %3081 = vmatprep.mubr.f32.mxu1 %v8788_v44 }
 0x5bc   :  { %5586 = vmatpush1.bf16.msra.mxu0 %v6723_v50  ;;  %5618 = vmatpush1.bf16.msra.mxu1 %v6736_v54 }
 0x5bd   :  { %5588 = vmatprep.subr.bf16.mxu0 %v9032_v15  ;;  %5620 = vmatprep.subr.bf16.mxu1 %v9033_v8 }
 0x5c0   :  { %5590 = vmatpush1.bf16.msra.mxu0 %v9034_v55  ;;  %5622 = vmatpush1.bf16.msra.mxu1 %v9035_v18 }
 0x5c1   :  { %5592 = vmatprep.subr.bf16.mxu0 %v9036_v57  ;;  %5624 = vmatprep.subr.bf16.mxu1 %v9037_v5  ;;  %v9048_v5 = vld [vmem:[#allocation20_spill] sm:$0xff] }
 0x5c4   :  { %5594 = vmatpush1.bf16.msra.mxu0 %v9038_v49  ;;  %5626 = vmatpush1.bf16.msra.mxu1 %v9039_v59  ;;  %v9049_v49 = vld [vmem:[#allocation21_spill] sm:$0xff]  ;;  %v9050_v59 = vld [vmem:[#allocation22_spill] sm:$0xff] }
 0x5c5   :  { %5596 = vmatprep.subr.bf16.mxu0 %v9040_v7  ;;  %5628 = vmatprep.subr.bf16.mxu1 %v9041_v36  ;;  %v9051_v7 = vld [vmem:[#allocation23_spill] sm:$0xff]  ;;  %v9052_v36 = vld [vmem:[#allocation24_spill] sm:$0xff] }
 0x5c8   :  { %5598 = vmatpush1.bf16.msra.mxu0 %v9042_v0  ;;  %5630 = vmatpush1.bf16.msra.mxu1 %v9043_v61  ;;  %v9053_v0 = vld [vmem:[#allocation25_spill] sm:$0xff]  ;;  %v9054_v61 = vld [vmem:[#allocation26_spill] sm:$0xff] }
 0x5c9   :  { %5600 = vmatprep.subr.bf16.mxu0 %v9044_v1  ;;  %5632 = vmatprep.subr.bf16.mxu1 %v9045_v11  ;;  %v9055_v1 = vld [vmem:[#allocation27_spill] sm:$0xff]  ;;  %v9056_v11 = vld [vmem:[#allocation28_spill] sm:$0xff] }
 0x5cc   :  { %5602 = vmatpush1.bf16.msra.mxu0 %v9046_v2  ;;  %5634 = vmatpush1.bf16.msra.mxu1 %v9047_v31  ;;  %v9057_v2 = vld [vmem:[#allocation29_spill] sm:$0xff]  ;;  %v9090_v31 = vld [vmem:[#allocation92_spill] sm:$0xff] }
 0x5cd   :  { %5604 = vmatprep.subr.bf16.mxu0 %v9048_v5  ;;  %5636 = vmatprep.subr.bf16.mxu1 %v9049_v49  ;;  %v9058_v5 = vld [vmem:[#allocation30_spill] sm:$0xff]  ;;  %v9059_v49 = vld [vmem:[#allocation31_spill] sm:$0xff] }
 0x5d0   :  { %5606 = vmatpush1.bf16.msra.mxu0 %v9050_v59  ;;  %5638 = vmatpush1.bf16.msra.mxu1 %v9051_v7  ;;  %v9060_v59 = vld [vmem:[#allocation32_spill] sm:$0xff]  ;;  %v9061_v7 = vld [vmem:[#allocation33_spill] sm:$0xff] }
 0x5d1   :  { %5608 = vmatprep.subr.bf16.mxu0 %v9052_v36  ;;  %5640 = vmatprep.subr.bf16.mxu1 %v9053_v0  ;;  %v9071_v0 = vld [vmem:[#allocation43_spill] sm:$0xff]  ;;  %v9072_v36 = vld [vmem:[#allocation44_spill] sm:$0xff] }
 0x5d4   :  { %5610 = vmatpush1.bf16.msra.mxu0 %v9054_v61  ;;  %5642 = vmatpush1.bf16.msra.mxu1 %v9055_v1  ;;  %v9062_v61 = vld [vmem:[#allocation34_spill] sm:$0xff]  ;;  %v9063_v1 = vld [vmem:[#allocation35_spill] sm:$0xff] }
 0x5d5   :  { %5644 = vmatprep.subr.bf16.mxu0 %v9056_v11  ;;  %5676 = vmatprep.subr.bf16.mxu1 %v9057_v2  ;;  %v9064_v11 = vld [vmem:[#allocation36_spill] sm:$0xff]  ;;  %v9065_v2 = vld [vmem:[#allocation37_spill] sm:$0xff] }
 0x5d7   :  { %3011 = vmatmul.mubr.f32.vlgmr.msra.gmra.mrb[10].mxu0 %v2633_v32  ;;  %3082 = vmatmul.mubr.f32.vlgmr.msra.gmra.mrb[10].mxu1 %v2633_v32  ;;  %v9066_v32 = vld [vmem:[#allocation38_spill] sm:$0xff] }
 0x5d8   :  { %5646 = vmatpush1.bf16.msra.mxu0 %v9058_v5  ;;  %5678 = vmatpush1.bf16.msra.mxu1 %v9059_v49  ;;  %v9067_v5 = vld [vmem:[#allocation39_spill] sm:$0xff]  ;;  %v9068_v49 = vld [vmem:[#allocation40_spill] sm:$0xff] }
 0x5d9   :  { %5648 = vmatprep.subr.bf16.mxu0 %v9060_v59  ;;  %5680 = vmatprep.subr.bf16.mxu1 %v9061_v7  ;;  %v9069_v59 = vld [vmem:[#allocation41_spill] sm:$0xff]  ;;  %v9070_v7 = vld [vmem:[#allocation42_spill] sm:$0xff] }
 0x5da   :  { %3176 = vmatprep.mubr.f32.mxu0 %v8788_v44  ;;  %3247 = vmatprep.mubr.f32.mxu1 %v8788_v44 }
 0x5dc   :  { %5650 = vmatpush1.bf16.msra.mxu0 %v9062_v61  ;;  %5682 = vmatpush1.bf16.msra.mxu1 %v9063_v1  ;;  %v9073_v61 = vld [vmem:[#allocation45_spill] sm:$0xff]  ;;  %v9074_v1 = vld [vmem:[#allocation46_spill] sm:$0xff] }
 0x5dd   :  { %5652 = vmatprep.subr.bf16.mxu0 %v9064_v11  ;;  %5684 = vmatprep.subr.bf16.mxu1 %v9065_v2  ;;  %v9075_v11 = vld [vmem:[#allocation47_spill] sm:$0xff]  ;;  %v9076_v2 = vld [vmem:[#allocation48_spill] sm:$0xff] }
 0x5e0   :  { %5654 = vmatpush1.bf16.msra.mxu0 %v9066_v32  ;;  %5686 = vmatpush1.bf16.msra.mxu1 %v9067_v5  ;;  %v9077_v32 = vld [vmem:[#allocation49_spill] sm:$0xff]  ;;  %v9078_v5 = vld [vmem:[#allocation50_spill] sm:$0xff] }
 0x5e1   :  { %5656 = vmatprep.subr.bf16.mxu0 %v9068_v49  ;;  %5688 = vmatprep.subr.bf16.mxu1 %v9069_v59  ;;  %v9079_v49 = vld [vmem:[#allocation51_spill] sm:$0xff]  ;;  %v9080_v59 = vld [vmem:[#allocation52_spill] sm:$0xff] }
 0x5e4   :  { %5658 = vmatpush1.bf16.msra.mxu0 %v9070_v7  ;;  %5690 = vmatpush1.bf16.msra.mxu1 %v9071_v0  ;;  %v9081_v7 = vld [vmem:[#allocation53_spill] sm:$0xff]  ;;  %v9082_v0 = vld [vmem:[#allocation54_spill] sm:$0xff] }
 0x5e5   :  { %5660 = vmatprep.subr.bf16.mxu0 %v9072_v36  ;;  %5692 = vmatprep.subr.bf16.mxu1 %v9073_v61  ;;  %v9083_v36 = vld [vmem:[#allocation55_spill] sm:$0xff]  ;;  %v9084_v61 = vld [vmem:[#allocation56_spill] sm:$0xff] }
 0x5e8   :  { %5662 = vmatpush1.bf16.msra.mxu0 %v9074_v1  ;;  %5694 = vmatpush1.bf16.msra.mxu1 %v9075_v11  ;;  %v9085_v1 = vld [vmem:[#allocation57_spill] sm:$0xff]  ;;  %v9086_v11 = vld [vmem:[#allocation58_spill] sm:$0xff] }
 0x5e9   :  { %5664 = vmatprep.subr.bf16.mxu0 %v9076_v2  ;;  %5696 = vmatprep.subr.bf16.mxu1 %v9077_v32  ;;  %v9087_v2 = vld [vmem:[#allocation59_spill] sm:$0xff]  ;;  %v9088_v32 = vld [vmem:[#allocation60_spill] sm:$0xff] }
 0x5ec   :  { %5666 = vmatpush1.bf16.msra.mxu0 %v9078_v5  ;;  %5698 = vmatpush1.bf16.msra.mxu1 %v9079_v49  ;;  %v9089_v5 = vld [vmem:[#allocation61_spill] sm:$0xff] }
 0x5ed   :  { %5668 = vmatprep.subr.bf16.mxu0 %v9080_v59  ;;  %5700 = vmatprep.subr.bf16.mxu1 %v9081_v7 }
 0x5f0   :  { %5670 = vmatpush1.bf16.msra.mxu0 %v9082_v0  ;;  %5702 = vmatpush1.bf16.msra.mxu1 %v9083_v36 }
 0x5f1   :  { %5672 = vmatprep.subr.bf16.mxu0 %v9084_v61  ;;  %5704 = vmatprep.subr.bf16.mxu1 %v9085_v1  ;;  %v9091_v1 = vld [vmem:[#allocation97_spill] sm:$0xff] }
 0x5f4   :  { %5674 = vmatpush1.bf16.msra.mxu0 %v9086_v11  ;;  %5706 = vmatpush1.bf16.msra.mxu1 %v9087_v2 }
 0x5f5   :  { %5708 = vmatprep.subr.bf16.mxu0 %v9088_v32  ;;  %5740 = vmatprep.subr.bf16.mxu1 %v9089_v5 }
 0x68a   :  { %v2842_v49 = vpop.f32.mrb[24].mxu0  ;;  %v2913_v59 = vpop.f32.mrb[24].mxu1 }
 0x68b   :  { %v2918_v7 = vadd.f32 %v2842_v49, %v9090_v31  ;;  %v2844_v57 = vpop.f32.mrb[25].mxu0  ;;  %v2915_v0 = vpop.f32.mrb[25].mxu1  ;;  %v2920_v11 = vadd.f32 %v2913_v59, %v9091_v1 }
 0x68c   :  { %v2919_v36 = vadd.f32 %v2844_v57, %v8908_v40  ;;  %v2921_v2 = vadd.f32 %v2915_v0, %v8971_v28 }
 0x68d   :  { %v4525_v18 = vmul.f32 -1.442695, %v2918_v7  ;;  %v4527_v55 = vmul.f32 -1.442695, %v2920_v11 }
 0x68e   :  { %v4526_v61 = vmul.f32 -1.442695, %v2919_v36 }
 0x68f   :  { %6423 = vpow2.f32 %v4525_v18 }
 0x690   :  { %6425 = vpow2.f32 %v4526_v61 }
 0x691   :  { %6427 = vtanh.f32 %v2921_v2 }
 0x692   :  { %6429 = vpow2.f32 %v4527_v55 }
 0x699   :  { %v6424_v32 = vpop.eup %6423 }
 0x69a   :  { %v2931_v8 = vadd.f32 1.0, %v6424_v32  ;;  %v6426_v5 = vpop.eup %6425 }
 0x69b   :  { %v2932_v49 = vadd.f32 1.0, %v6426_v5  ;;  %v6428_v31 = vpop.eup %6427 }
 0x69c   :  { %6431 = vrcp.f32 %v2931_v8  ;;  %v6430_v15 = vpop.eup %6429 }
 0x69d   :  { %6433 = vrcp.f32 %v2932_v49  ;;  %v2933_v18 = vadd.f32 1.0, %v6430_v15 }
 0x69f   :  { %6435 = vrcp.f32 %v2933_v18 }
 0x6a6   :  { %v6432_v57 = vpop.eup %6431 }
 0x6a7   :  { %v2942_v7 = vmul.f32 %v6432_v57, %v6428_v31  ;;  %v6434_v36 = vpop.eup %6433 }
 0x6a8   :  { %v2941_v61 = vmul.f32 %v6434_v36, %v8059_v51 }
 0x6a9   :  { %v6436_v51 = vpop.eup %6435 }
 0x6aa   :  { %v3012_v59 = vpop.f32.mrb[10].mxu0  ;;  %v3083_v1 = vpop.f32.mrb[10].mxu1  ;;  %v8177_v0 = vadd.f32 %v2942_v7, %v2941_v61 }
 0x6ab   :  { %v6189_v11 = vadd.f32 %v3012_v59, %v8911_v12  ;;  %v3014_v2 = vpop.f32.mrb[11].mxu0  ;;  %v3085_v32 = vpop.f32.mrb[11].mxu1  ;;  %v6205_v15 = vadd.f32 %v3083_v1, %v8852_v16 }
 0x6ac   :  { %v6190_v8 = vadd.f32 %v3014_v2, %v8851_v3  ;;  %6437 = vtanh.f32 %v8177_v0  ;;  %v6206_v31 = vadd.f32 %v3085_v32, %v7608_v34 }
 0x6ad   :  { %v4528_v55 = vmul.f32 -1.442695, %v6189_v11  ;;  %v4530_v57 = vmul.f32 -1.442695, %v6205_v15 }
 0x6ae   :  { %v4529_v5 = vmul.f32 -1.442695, %v6190_v8 }
 0x6af   :  { %6439 = vpow2.f32 %v4528_v55 }
 0x6b0   :  { %6441 = vpow2.f32 %v4529_v5 }
 0x6b1   :  { %6443 = vtanh.f32 %v6206_v31 }
 0x6b2   :  { %6445 = vpow2.f32 %v4530_v57  ;;  %v9093_v57 = vld [vmem:[#allocation5_spill] sm:$0xff] }
 0x6b6   :  { %v6438_v49 = vpop.eup %6437 }
 0x6b7   :  { %v2945_v7 = vmul.f32 %v6438_v49, %v6436_v51  ;;  %v9092_v49 = vld [vmem:[#allocation4_spill] sm:$0xff] }
 0x6b9   :  { %v6440_v36 = vpop.eup %6439  ;;  %3177 = vmatmul.mubr.f32.vlgmr.msra.gmra.mrb[26].mxu0 %v2945_v7  ;;  %3248 = vmatmul.mubr.f32.vlgmr.msra.gmra.mrb[26].mxu1 %v2945_v7  ;;  %v9094_v7 = vld [vmem:[#allocation6_spill] sm:$0xff] }
 0x6ba   :  { %v3097_v61 = vadd.f32 1.0, %v6440_v36  ;;  %v6442_v18 = vpop.eup %6441  ;;  %5710 = vmatpush1.bf16.msra.mxu0 %v8853_v53  ;;  %5742 = vmatpush1.bf16.msra.mxu1 %v8854_v30  ;;  %v9095_v36 = vld [vmem:[#allocation7_spill] sm:$0xff] }
 0x6bb   :  { %v3098_v59 = vadd.f32 1.0, %v6442_v18  ;;  %5712 = vmatprep.subr.bf16.mxu0 %v8912_v9  ;;  %5744 = vmatprep.subr.bf16.mxu1 %v8913_v33  ;;  %v6444_v1 = vpop.eup %6443  ;;  %v9097_v18 = vld [vmem:[#allocation9_spill] sm:$0xff] }
 0x6bc   :  { %6447 = vrcp.f32 %v3097_v61  ;;  %3318 = vmatprep.mubr.f32.mxu0 %v8788_v44  ;;  %3389 = vmatprep.mubr.f32.mxu1 %v8788_v44  ;;  %v6446_v11 = vpop.eup %6445  ;;  %v9096_v61 = vld [vmem:[#allocation8_spill] sm:$0xff] }
 0x6bd   :  { %6449 = vrcp.f32 %v3098_v59  ;;  %v3099_v55 = vadd.f32 1.0, %v6446_v11  ;;  %v9098_v59 = vld [vmem:[#allocation10_spill] sm:$0xff]  ;;  %v9100_v11 = vld [vmem:[#allocation12_spill] sm:$0xff] }
 0x6be   :  { %5714 = vmatpush1.bf16.msra.mxu0 %v8914_v25  ;;  %5746 = vmatpush1.bf16.msra.mxu1 %v8915_v19 }
 0x6bf   :  { %5716 = vmatprep.subr.bf16.mxu0 %v8916_v14  ;;  %5748 = vmatprep.subr.bf16.mxu1 %v8972_v10  ;;  %6451 = vrcp.f32 %v3099_v55  ;;  %v9104_v55 = vld [vmem:[#allocation16_spill] sm:$0xff] }
 0x6c2   :  { %5718 = vmatpush1.bf16.msra.mxu0 %v8973_v41  ;;  %5750 = vmatpush1.bf16.msra.mxu1 %v8974_v46 }
 0x6c3   :  { %5720 = vmatprep.subr.bf16.mxu0 %v8975_v21  ;;  %5752 = vmatprep.subr.bf16.mxu1 %v8976_v24 }
 0x6c6   :  { %v6448_v2 = vpop.eup %6447  ;;  %5722 = vmatpush1.bf16.msra.mxu0 %v8865_v22  ;;  %5754 = vmatpush1.bf16.msra.mxu1 %v8866_v60 }
 0x6c7   :  { %v3108_v32 = vmul.f32 %v6448_v2, %v6444_v1  ;;  %v6450_v8 = vpop.eup %6449  ;;  %5724 = vmatprep.subr.bf16.mxu0 %v8977_v37  ;;  %5756 = vmatprep.subr.bf16.mxu1 %v8978_v6  ;;  %v9099_v1 = vld [vmem:[#allocation11_spill] sm:$0xff]  ;;  %v9101_v2 = vld [vmem:[#allocation13_spill] sm:$0xff] }
 0x6c8   :  { %v3107_v5 = vmul.f32 %v6450_v8, %v8085_v58  ;;  %v9103_v8 = vld [vmem:[#allocation15_spill] sm:$0xff] }
 0x6c9   :  { %v6452_v58 = vpop.eup %6451 }
 0x6ca   :  { %v8203_v15 = vadd.f32 %v3108_v32, %v3107_v5  ;;  %5726 = vmatpush1.bf16.msra.mxu0 %v8924_v13  ;;  %5758 = vmatpush1.bf16.msra.mxu1 %v8925_v43  ;;  %v9102_v32 = vld [vmem:[#allocation14_spill] sm:$0xff]  ;;  %v9105_v5 = vld [vmem:[#allocation17_spill] sm:$0xff] }
 0x6cb   :  { %5728 = vmatprep.subr.bf16.mxu0 %v8926_v48  ;;  %5760 = vmatprep.subr.bf16.mxu1 %v8927_v23 }
 0x6cc   :  { %6453 = vtanh.f32 %v8203_v15 }
 0x6ce   :  { %5730 = vmatpush1.bf16.msra.mxu0 %v8928_v45  ;;  %5762 = vmatpush1.bf16.msra.mxu1 %v8929_v62 }
 0x6cf   :  { %5732 = vmatprep.subr.bf16.mxu0 %v8930_v20  ;;  %5764 = vmatprep.subr.bf16.mxu1 %v8876_v56 }
 0x6d2   :  { %5734 = vmatpush1.bf16.msra.mxu0 %v8877_v29  ;;  %5766 = vmatpush1.bf16.msra.mxu1 %v8878_v4 }
 0x6d3   :  { %5736 = vmatprep.subr.bf16.mxu0 %v8879_v39  ;;  %5768 = vmatprep.subr.bf16.mxu1 %v8880_v17 }
 0x6d6   :  { %v6454_v51 = vpop.eup %6453  ;;  %5738 = vmatpush1.bf16.msra.mxu0 %v8881_v63  ;;  %5770 = vmatpush1.bf16.msra.mxu1 %v8882_v27 }
 0x6d7   :  { %v3111_v31 = vmul.f32 %v6454_v51, %v6452_v58  ;;  %5772 = vmatprep.subr.bf16.mxu0 %v8883_v52  ;;  %5804 = vmatprep.subr.bf16.mxu1 %v8884_v26  ;;  %v9106_v58 = vld [vmem:[#allocation18_spill] sm:$0xff]  ;;  %v9107_v51 = vld [vmem:[#allocation19_spill] sm:$0xff] }
 0x6d9   :  { %3319 = vmatmul.mubr.f32.vlgmr.msra.gmra.mrb[26].mxu0 %v3111_v31  ;;  %3390 = vmatmul.mubr.f32.vlgmr.msra.gmra.mrb[26].mxu1 %v3111_v31 }
 0x6da   :  { %5774 = vmatpush1.bf16.msra.mxu0 %v6675_v35  ;;  %5806 = vmatpush1.bf16.msra.mxu1 %v6686_v38 }
 0x6db   :  { %5776 = vmatprep.subr.bf16.mxu0 %v6698_v42  ;;  %5808 = vmatprep.subr.bf16.mxu1 %v6713_v47 }
 0x6dc   :  { %3488 = vmatprep.mubr.f32.mxu0 %v8788_v44  ;;  %3559 = vmatprep.mubr.f32.mxu1 %v8788_v44 }
 0x6de   :  { %5778 = vmatpush1.bf16.msra.mxu0 %v6723_v50  ;;  %5810 = vmatpush1.bf16.msra.mxu1 %v6736_v54 }
 0x6df   :  { %5780 = vmatprep.subr.bf16.mxu0 %v9092_v49  ;;  %5812 = vmatprep.subr.bf16.mxu1 %v9093_v57 }
 0x6e2   :  { %5782 = vmatpush1.bf16.msra.mxu0 %v9094_v7  ;;  %5814 = vmatpush1.bf16.msra.mxu1 %v9095_v36 }
 0x6e3   :  { %5784 = vmatprep.subr.bf16.mxu0 %v9096_v61  ;;  %5816 = vmatprep.subr.bf16.mxu1 %v9097_v18  ;;  %v9108_v18 = vld [vmem:[#allocation20_spill] sm:$0xff] }
 0x6e6   :  { %5786 = vmatpush1.bf16.msra.mxu0 %v9098_v59  ;;  %5818 = vmatpush1.bf16.msra.mxu1 %v9099_v1  ;;  %v9109_v59 = vld [vmem:[#allocation21_spill] sm:$0xff]  ;;  %v9110_v1 = vld [vmem:[#allocation22_spill] sm:$0xff] }
 0x6e7   :  { %5788 = vmatprep.subr.bf16.mxu0 %v9100_v11  ;;  %5820 = vmatprep.subr.bf16.mxu1 %v9101_v2  ;;  %v9111_v11 = vld [vmem:[#allocation23_spill] sm:$0xff]  ;;  %v9112_v2 = vld [vmem:[#allocation24_spill] sm:$0xff] }
 0x6ea   :  { %5790 = vmatpush1.bf16.msra.mxu0 %v9102_v32  ;;  %5822 = vmatpush1.bf16.msra.mxu1 %v9103_v8  ;;  %v9113_v32 = vld [vmem:[#allocation25_spill] sm:$0xff]  ;;  %v9114_v8 = vld [vmem:[#allocation26_spill] sm:$0xff] }
 0x6eb   :  { %5792 = vmatprep.subr.bf16.mxu0 %v9104_v55  ;;  %5824 = vmatprep.subr.bf16.mxu1 %v9105_v5  ;;  %v9115_v55 = vld [vmem:[#allocation27_spill] sm:$0xff]  ;;  %v9116_v5 = vld [vmem:[#allocation28_spill] sm:$0xff] }
 0x6ee   :  { %5794 = vmatpush1.bf16.msra.mxu0 %v9106_v58  ;;  %5826 = vmatpush1.bf16.msra.mxu1 %v9107_v51  ;;  %v9117_v58 = vld [vmem:[#allocation29_spill] sm:$0xff]  ;;  %v9150_v51 = vld [vmem:[#allocation92_spill] sm:$0xff] }
 0x6ef   :  { %5796 = vmatprep.subr.bf16.mxu0 %v9108_v18  ;;  %5828 = vmatprep.subr.bf16.mxu1 %v9109_v59  ;;  %v9118_v18 = vld [vmem:[#allocation30_spill] sm:$0xff]  ;;  %v9119_v59 = vld [vmem:[#allocation31_spill] sm:$0xff] }
 0x6f2   :  { %5798 = vmatpush1.bf16.msra.mxu0 %v9110_v1  ;;  %5830 = vmatpush1.bf16.msra.mxu1 %v9111_v11  ;;  %v9120_v1 = vld [vmem:[#allocation32_spill] sm:$0xff]  ;;  %v9121_v11 = vld [vmem:[#allocation33_spill] sm:$0xff] }
 0x6f3   :  { %5800 = vmatprep.subr.bf16.mxu0 %v9112_v2  ;;  %5832 = vmatprep.subr.bf16.mxu1 %v9113_v32  ;;  %v9131_v32 = vld [vmem:[#allocation43_spill] sm:$0xff]  ;;  %v9132_v2 = vld [vmem:[#allocation44_spill] sm:$0xff] }
 0x6f6   :  { %5802 = vmatpush1.bf16.msra.mxu0 %v9114_v8  ;;  %5834 = vmatpush1.bf16.msra.mxu1 %v9115_v55  ;;  %v9122_v8 = vld [vmem:[#allocation34_spill] sm:$0xff]  ;;  %v9123_v55 = vld [vmem:[#allocation35_spill] sm:$0xff] }
 0x6f7   :  { %5836 = vmatprep.subr.bf16.mxu0 %v9116_v5  ;;  %5868 = vmatprep.subr.bf16.mxu1 %v9117_v58  ;;  %v9124_v5 = vld [vmem:[#allocation36_spill] sm:$0xff]  ;;  %v9125_v58 = vld [vmem:[#allocation37_spill] sm:$0xff] }
 0x6f9   :  { %3489 = vmatmul.mubr.f32.vlgmr.msra.gmra.mrb[12].mxu0 %v3111_v31  ;;  %3560 = vmatmul.mubr.f32.vlgmr.msra.gmra.mrb[12].mxu1 %v3111_v31  ;;  %v9126_v31 = vld [vmem:[#allocation38_spill] sm:$0xff] }
 0x6fa   :  { %5838 = vmatpush1.bf16.msra.mxu0 %v9118_v18  ;;  %5870 = vmatpush1.bf16.msra.mxu1 %v9119_v59  ;;  %v9127_v18 = vld [vmem:[#allocation39_spill] sm:$0xff]  ;;  %v9128_v59 = vld [vmem:[#allocation40_spill] sm:$0xff] }
 0x6fb   :  { %5840 = vmatprep.subr.bf16.mxu0 %v9120_v1  ;;  %5872 = vmatprep.subr.bf16.mxu1 %v9121_v11  ;;  %v9129_v1 = vld [vmem:[#allocation41_spill] sm:$0xff]  ;;  %v9130_v11 = vld [vmem:[#allocation42_spill] sm:$0xff] }
 0x6fc   :  { %3654 = vmatprep.mubr.f32.mxu0 %v8788_v44  ;;  %3725 = vmatprep.mubr.f32.mxu1 %v8788_v44 }
 0x6fe   :  { %5842 = vmatpush1.bf16.msra.mxu0 %v9122_v8  ;;  %5874 = vmatpush1.bf16.msra.mxu1 %v9123_v55  ;;  %v9133_v8 = vld [vmem:[#allocation45_spill] sm:$0xff]  ;;  %v9134_v55 = vld [vmem:[#allocation46_spill] sm:$0xff] }
 0x6ff   :  { %5844 = vmatprep.subr.bf16.mxu0 %v9124_v5  ;;  %5876 = vmatprep.subr.bf16.mxu1 %v9125_v58  ;;  %v9135_v5 = vld [vmem:[#allocation47_spill] sm:$0xff]  ;;  %v9136_v58 = vld [vmem:[#allocation48_spill] sm:$0xff] }
 0x702   :  { %5846 = vmatpush1.bf16.msra.mxu0 %v9126_v31  ;;  %5878 = vmatpush1.bf16.msra.mxu1 %v9127_v18  ;;  %v9137_v31 = vld [vmem:[#allocation49_spill] sm:$0xff]  ;;  %v9138_v18 = vld [vmem:[#allocation50_spill] sm:$0xff] }
 0x703   :  { %5848 = vmatprep.subr.bf16.mxu0 %v9128_v59  ;;  %5880 = vmatprep.subr.bf16.mxu1 %v9129_v1  ;;  %v9139_v59 = vld [vmem:[#allocation51_spill] sm:$0xff]  ;;  %v9140_v1 = vld [vmem:[#allocation52_spill] sm:$0xff] }
 0x706   :  { %5850 = vmatpush1.bf16.msra.mxu0 %v9130_v11  ;;  %5882 = vmatpush1.bf16.msra.mxu1 %v9131_v32  ;;  %v9141_v11 = vld [vmem:[#allocation53_spill] sm:$0xff]  ;;  %v9142_v32 = vld [vmem:[#allocation54_spill] sm:$0xff] }
 0x707   :  { %5852 = vmatprep.subr.bf16.mxu0 %v9132_v2  ;;  %5884 = vmatprep.subr.bf16.mxu1 %v9133_v8  ;;  %v9143_v2 = vld [vmem:[#allocation55_spill] sm:$0xff]  ;;  %v9144_v8 = vld [vmem:[#allocation56_spill] sm:$0xff] }
 0x70a   :  { %5854 = vmatpush1.bf16.msra.mxu0 %v9134_v55  ;;  %5886 = vmatpush1.bf16.msra.mxu1 %v9135_v5  ;;  %v9145_v55 = vld [vmem:[#allocation57_spill] sm:$0xff]  ;;  %v9146_v5 = vld [vmem:[#allocation58_spill] sm:$0xff] }
 0x70b   :  { %5856 = vmatprep.subr.bf16.mxu0 %v9136_v58  ;;  %5888 = vmatprep.subr.bf16.mxu1 %v9137_v31  ;;  %v9147_v58 = vld [vmem:[#allocation59_spill] sm:$0xff]  ;;  %v9148_v31 = vld [vmem:[#allocation60_spill] sm:$0xff] }
 0x70e   :  { %5858 = vmatpush1.bf16.msra.mxu0 %v9138_v18  ;;  %5890 = vmatpush1.bf16.msra.mxu1 %v9139_v59  ;;  %v9149_v18 = vld [vmem:[#allocation61_spill] sm:$0xff] }
 0x70f   :  { %5860 = vmatprep.subr.bf16.mxu0 %v9140_v1  ;;  %5892 = vmatprep.subr.bf16.mxu1 %v9141_v11 }
 0x712   :  { %5862 = vmatpush1.bf16.msra.mxu0 %v9142_v32  ;;  %5894 = vmatpush1.bf16.msra.mxu1 %v9143_v2 }
 0x713   :  { %5864 = vmatprep.subr.bf16.mxu0 %v9144_v8  ;;  %5896 = vmatprep.subr.bf16.mxu1 %v9145_v55  ;;  %v9151_v55 = vld [vmem:[#allocation97_spill] sm:$0xff] }
 0x716   :  { %5866 = vmatpush1.bf16.msra.mxu0 %v9146_v5  ;;  %5898 = vmatpush1.bf16.msra.mxu1 %v9147_v58 }
 0x717   :  { %5900 = vmatprep.subr.bf16.mxu0 %v9148_v31  ;;  %5932 = vmatprep.subr.bf16.mxu1 %v9149_v18 }
 0x7ac   :  { %v3320_v59 = vpop.f32.mrb[26].mxu0  ;;  %v3391_v1 = vpop.f32.mrb[26].mxu1 }
 0x7ad   :  { %v3396_v11 = vadd.f32 %v3320_v59, %v9150_v51  ;;  %v3322_v61 = vpop.f32.mrb[27].mxu0  ;;  %v3393_v32 = vpop.f32.mrb[27].mxu1  ;;  %v3398_v5 = vadd.f32 %v3391_v1, %v9151_v55 }
 0x7ae   :  { %v3397_v2 = vadd.f32 %v3322_v61, %v8908_v40  ;;  %v3399_v58 = vadd.f32 %v3393_v32, %v8971_v28 }
 0x7af   :  { %v4531_v36 = vmul.f32 -1.442695, %v3396_v11  ;;  %v4533_v7 = vmul.f32 -1.442695, %v3398_v5 }
 0x7b0   :  { %v4532_v8 = vmul.f32 -1.442695, %v3397_v2 }
 0x7b1   :  { %6455 = vpow2.f32 %v4531_v36 }
 0x7b2   :  { %6457 = vpow2.f32 %v4532_v8 }
 0x7b3   :  { %6459 = vtanh.f32 %v3399_v58 }
 0x7b4   :  { %6461 = vpow2.f32 %v4533_v7 }
 0x7bb   :  { %v6456_v31 = vpop.eup %6455 }
 0x7bc   :  { %v3409_v57 = vadd.f32 1.0, %v6456_v31  ;;  %v6458_v18 = vpop.eup %6457 }
 0x7bd   :  { %v3410_v59 = vadd.f32 1.0, %v6458_v18  ;;  %v6460_v51 = vpop.eup %6459 }
 0x7be   :  { %6463 = vrcp.f32 %v3409_v57  ;;  %v6462_v49 = vpop.eup %6461 }
 0x7bf   :  { %6465 = vrcp.f32 %v3410_v59  ;;  %v3411_v36 = vadd.f32 1.0, %v6462_v49 }
 0x7c1   :  { %6467 = vrcp.f32 %v3411_v36 }
 0x7c8   :  { %v6464_v61 = vpop.eup %6463 }
 0x7c9   :  { %v3420_v11 = vmul.f32 %v6464_v61, %v6460_v51  ;;  %v6466_v2 = vpop.eup %6465 }
 0x7ca   :  { %v3419_v8 = vmul.f32 %v6466_v2, %v8177_v0 }
 0x7cb   :  { %v6468_v0 = vpop.eup %6467 }
 0x7cc   :  { %v3490_v1 = vpop.f32.mrb[12].mxu0  ;;  %v3561_v55 = vpop.f32.mrb[12].mxu1  ;;  %v8295_v32 = vadd.f32 %v3420_v11, %v3419_v8 }
 0x7cd   :  { %v6191_v5 = vadd.f32 %v3490_v1, %v8911_v12  ;;  %v3492_v58 = vpop.f32.mrb[13].mxu0  ;;  %v3563_v31 = vpop.f32.mrb[13].mxu1  ;;  %v6207_v49 = vadd.f32 %v3561_v55, %v8852_v16 }
 0x7ce   :  { %v6192_v57 = vadd.f32 %v3492_v58, %v8851_v3  ;;  %6469 = vtanh.f32 %v8295_v32  ;;  %v6208_v51 = vadd.f32 %v3563_v31, %v7608_v34 }
 0x7cf   :  { %v4534_v7 = vmul.f32 -1.442695, %v6191_v5  ;;  %v4536_v61 = vmul.f32 -1.442695, %v6207_v49 }
 0x7d0   :  { %v4535_v18 = vmul.f32 -1.442695, %v6192_v57 }
 0x7d1   :  { %6471 = vpow2.f32 %v4534_v7 }
 0x7d2   :  { %6473 = vpow2.f32 %v4535_v18 }
 0x7d3   :  { %6475 = vtanh.f32 %v6208_v51 }
 0x7d4   :  { %6477 = vpow2.f32 %v4536_v61  ;;  %v9159_v61 = vld [vmem:[#allocation11_spill] sm:$0xff] }
 0x7d8   :  { %v6470_v59 = vpop.eup %6469 }
 0x7d9   :  { %v3423_v11 = vmul.f32 %v6470_v59, %v6468_v0  ;;  %v9154_v59 = vld [vmem:[#allocation6_spill] sm:$0xff] }
 0x7db   :  { %v6472_v2 = vpop.eup %6471  ;;  %3655 = vmatmul.mubr.f32.vlgmr.msra.gmra.mrb[28].mxu0 %v3423_v11  ;;  %3726 = vmatmul.mubr.f32.vlgmr.msra.gmra.mrb[28].mxu1 %v3423_v11  ;;  %v9160_v11 = vld [vmem:[#allocation12_spill] sm:$0xff] }
 0x7dc   :  { %v3575_v8 = vadd.f32 1.0, %v6472_v2  ;;  %v6474_v36 = vpop.eup %6473  ;;  %5902 = vmatpush1.bf16.msra.mxu0 %v8853_v53  ;;  %5934 = vmatpush1.bf16.msra.mxu1 %v8854_v30  ;;  %v9163_v2 = vld [vmem:[#allocation15_spill] sm:$0xff] }
 0x7dd   :  { %v3576_v1 = vadd.f32 1.0, %v6474_v36  ;;  %5904 = vmatprep.subr.bf16.mxu0 %v8912_v9  ;;  %5936 = vmatprep.subr.bf16.mxu1 %v8913_v33  ;;  %v6476_v55 = vpop.eup %6475  ;;  %v9165_v36 = vld [vmem:[#allocation17_spill] sm:$0xff] }
 0x7de   :  { %6479 = vrcp.f32 %v3575_v8  ;;  %3796 = vmatprep.mubr.f32.mxu0 %v8788_v44  ;;  %3867 = vmatprep.mubr.f32.mxu1 %v8788_v44  ;;  %v6478_v5 = vpop.eup %6477  ;;  %v9164_v8 = vld [vmem:[#allocation16_spill] sm:$0xff] }
 0x7df   :  { %6481 = vrcp.f32 %v3576_v1  ;;  %v3577_v7 = vadd.f32 1.0, %v6478_v5  ;;  %v9166_v1 = vld [vmem:[#allocation18_spill] sm:$0xff]  ;;  %v9168_v5 = vld [vmem:[#allocation20_spill] sm:$0xff] }
 0x7e0   :  { %5906 = vmatpush1.bf16.msra.mxu0 %v8914_v25  ;;  %5938 = vmatpush1.bf16.msra.mxu1 %v8915_v19 }
 0x7e1   :  { %5908 = vmatprep.subr.bf16.mxu0 %v8916_v14  ;;  %5940 = vmatprep.subr.bf16.mxu1 %v8972_v10  ;;  %6483 = vrcp.f32 %v3577_v7  ;;  %v9172_v7 = vld [vmem:[#allocation24_spill] sm:$0xff] }
 0x7e4   :  { %5910 = vmatpush1.bf16.msra.mxu0 %v8973_v41  ;;  %5942 = vmatpush1.bf16.msra.mxu1 %v8974_v46 }
 0x7e5   :  { %5912 = vmatprep.subr.bf16.mxu0 %v8975_v21  ;;  %5944 = vmatprep.subr.bf16.mxu1 %v8976_v24 }
 0x7e8   :  { %v6480_v58 = vpop.eup %6479  ;;  %5914 = vmatpush1.bf16.msra.mxu0 %v8865_v22  ;;  %5946 = vmatpush1.bf16.msra.mxu1 %v8866_v60 }
 0x7e9   :  { %v3586_v31 = vmul.f32 %v6480_v58, %v6476_v55  ;;  %v6482_v57 = vpop.eup %6481  ;;  %5916 = vmatprep.subr.bf16.mxu0 %v8977_v37  ;;  %5948 = vmatprep.subr.bf16.mxu1 %v8978_v6  ;;  %v9167_v55 = vld [vmem:[#allocation19_spill] sm:$0xff]  ;;  %v9169_v58 = vld [vmem:[#allocation21_spill] sm:$0xff] }
 0x7ea   :  { %v3585_v18 = vmul.f32 %v6482_v57, %v8203_v15  ;;  %v9171_v57 = vld [vmem:[#allocation23_spill] sm:$0xff] }
 0x7eb   :  { %v6484_v15 = vpop.eup %6483 }
 0x7ec   :  { %v8321_v49 = vadd.f32 %v3586_v31, %v3585_v18  ;;  %5918 = vmatpush1.bf16.msra.mxu0 %v8924_v13  ;;  %5950 = vmatpush1.bf16.msra.mxu1 %v8925_v43  ;;  %v9170_v31 = vld [vmem:[#allocation22_spill] sm:$0xff]  ;;  %v9173_v18 = vld [vmem:[#allocation25_spill] sm:$0xff] }
 0x7ed   :  { %5920 = vmatprep.subr.bf16.mxu0 %v8926_v48  ;;  %5952 = vmatprep.subr.bf16.mxu1 %v8927_v23 }
 0x7ee   :  { %6485 = vtanh.f32 %v8321_v49 }
 0x7f0   :  { %5922 = vmatpush1.bf16.msra.mxu0 %v8928_v45  ;;  %5954 = vmatpush1.bf16.msra.mxu1 %v8929_v62 }
 0x7f1   :  { %5924 = vmatprep.subr.bf16.mxu0 %v8930_v20  ;;  %5956 = vmatprep.subr.bf16.mxu1 %v8876_v56 }
 0x7f4   :  { %5926 = vmatpush1.bf16.msra.mxu0 %v8877_v29  ;;  %5958 = vmatpush1.bf16.msra.mxu1 %v8878_v4 }
 0x7f5   :  { %5928 = vmatprep.subr.bf16.mxu0 %v8879_v39  ;;  %5960 = vmatprep.subr.bf16.mxu1 %v8880_v17 }
 0x7f8   :  { %v6486_v0 = vpop.eup %6485  ;;  %5930 = vmatpush1.bf16.msra.mxu0 %v8881_v63  ;;  %5962 = vmatpush1.bf16.msra.mxu1 %v8882_v27 }
 0x7f9   :  { %5964 = vmatprep.subr.bf16.mxu0 %v8883_v52  ;;  %5996 = vmatprep.subr.bf16.mxu1 %v8884_v26  ;;  %v3589_v51 = vmul.f32 %v6486_v0, %v6484_v15  ;;  %v9152_v52 = vld [vmem:[#allocation4_spill] sm:$0xff]  ;;  %v9153_v26 = vld [vmem:[#allocation5_spill] sm:$0xff]  ;;  %v9174_v15 = vld [vmem:[#allocation26_spill] sm:$0xff] }
 0x7fa   :  { %v9175_v0 = vld [vmem:[#allocation27_spill] sm:$0xff] }
 0x7fb   :  { %3797 = vmatmul.mubr.f32.vlgmr.msra.gmra.mrb[28].mxu0 %v3589_v51  ;;  %3868 = vmatmul.mubr.f32.vlgmr.msra.gmra.mrb[28].mxu1 %v3589_v51 }
 0x7fc   :  { %5966 = vmatpush1.bf16.msra.mxu0 %v6675_v35  ;;  %5998 = vmatpush1.bf16.msra.mxu1 %v6686_v38  ;;  %v9155_v35 = vld [vmem:[#allocation7_spill] sm:$0xff]  ;;  %v9156_v38 = vld [vmem:[#allocation8_spill] sm:$0xff] }
 0x7fd   :  { %5968 = vmatprep.subr.bf16.mxu0 %v6698_v42  ;;  %6000 = vmatprep.subr.bf16.mxu1 %v6713_v47  ;;  %v9157_v42 = vld [vmem:[#allocation9_spill] sm:$0xff]  ;;  %v9158_v47 = vld [vmem:[#allocation10_spill] sm:$0xff] }
 0x7fe   :  { %3966 = vmatprep.mubr.f32.mxu0 %v8788_v44  ;;  %4037 = vmatprep.mubr.f32.mxu1 %v8788_v44 }
 0x800   :  { %5970 = vmatpush1.bf16.msra.mxu0 %v6723_v50  ;;  %6002 = vmatpush1.bf16.msra.mxu1 %v6736_v54  ;;  %v9161_v50 = vld [vmem:[#allocation13_spill] sm:$0xff]  ;;  %v9162_v54 = vld [vmem:[#allocation14_spill] sm:$0xff] }
 0x801   :  { %5972 = vmatprep.subr.bf16.mxu0 %v9152_v52  ;;  %6004 = vmatprep.subr.bf16.mxu1 %v9153_v26  ;;  %v9176_v52 = vld [vmem:[#allocation28_spill] sm:$0xff]  ;;  %v9177_v26 = vld [vmem:[#allocation29_spill] sm:$0xff] }
 0x804   :  { %5974 = vmatpush1.bf16.msra.mxu0 %v9154_v59  ;;  %6006 = vmatpush1.bf16.msra.mxu1 %v9155_v35  ;;  %v9178_v59 = vld [vmem:[#allocation30_spill] sm:$0xff]  ;;  %v9179_v35 = vld [vmem:[#allocation31_spill] sm:$0xff] }
 0x805   :  { %5976 = vmatprep.subr.bf16.mxu0 %v9156_v38  ;;  %6008 = vmatprep.subr.bf16.mxu1 %v9157_v42  ;;  %v9180_v38 = vld [vmem:[#allocation32_spill] sm:$0xff]  ;;  %v9181_v42 = vld [vmem:[#allocation33_spill] sm:$0xff] }
 0x808   :  { %5978 = vmatpush1.bf16.msra.mxu0 %v9158_v47  ;;  %6010 = vmatpush1.bf16.msra.mxu1 %v9159_v61  ;;  %v9182_v47 = vld [vmem:[#allocation34_spill] sm:$0xff]  ;;  %v9183_v61 = vld [vmem:[#allocation35_spill] sm:$0xff] }
 0x809   :  { %5980 = vmatprep.subr.bf16.mxu0 %v9160_v11  ;;  %6012 = vmatprep.subr.bf16.mxu1 %v9161_v50  ;;  %v9184_v11 = vld [vmem:[#allocation36_spill] sm:$0xff]  ;;  %v9185_v50 = vld [vmem:[#allocation37_spill] sm:$0xff] }
 0x80c   :  { %5982 = vmatpush1.bf16.msra.mxu0 %v9162_v54  ;;  %6014 = vmatpush1.bf16.msra.mxu1 %v9163_v2  ;;  %v9187_v54 = vld [vmem:[#allocation39_spill] sm:$0xff]  ;;  %v9188_v2 = vld [vmem:[#allocation40_spill] sm:$0xff] }
 0x80d   :  { %5984 = vmatprep.subr.bf16.mxu0 %v9164_v8  ;;  %6016 = vmatprep.subr.bf16.mxu1 %v9165_v36  ;;  %v9189_v8 = vld [vmem:[#allocation41_spill] sm:$0xff]  ;;  %v9190_v36 = vld [vmem:[#allocation42_spill] sm:$0xff] }
 0x810   :  { %5986 = vmatpush1.bf16.msra.mxu0 %v9166_v1  ;;  %6018 = vmatpush1.bf16.msra.mxu1 %v9167_v55  ;;  %v9191_v1 = vld [vmem:[#allocation43_spill] sm:$0xff]  ;;  %v9192_v55 = vld [vmem:[#allocation44_spill] sm:$0xff] }
 0x811   :  { %5988 = vmatprep.subr.bf16.mxu0 %v9168_v5  ;;  %6020 = vmatprep.subr.bf16.mxu1 %v9169_v58  ;;  %v9193_v5 = vld [vmem:[#allocation45_spill] sm:$0xff]  ;;  %v9194_v58 = vld [vmem:[#allocation46_spill] sm:$0xff] }
 0x814   :  { %5990 = vmatpush1.bf16.msra.mxu0 %v9170_v31  ;;  %6022 = vmatpush1.bf16.msra.mxu1 %v9171_v57  ;;  %v9195_v31 = vld [vmem:[#allocation47_spill] sm:$0xff]  ;;  %v9196_v57 = vld [vmem:[#allocation48_spill] sm:$0xff] }
 0x815   :  { %5992 = vmatprep.subr.bf16.mxu0 %v9172_v7  ;;  %6024 = vmatprep.subr.bf16.mxu1 %v9173_v18  ;;  %v9197_v7 = vld [vmem:[#allocation49_spill] sm:$0xff]  ;;  %v9198_v18 = vld [vmem:[#allocation50_spill] sm:$0xff] }
 0x818   :  { %5994 = vmatpush1.bf16.msra.mxu0 %v9174_v15  ;;  %6026 = vmatpush1.bf16.msra.mxu1 %v9175_v0  ;;  %v9199_v15 = vld [vmem:[#allocation51_spill] sm:$0xff]  ;;  %v9200_v0 = vld [vmem:[#allocation52_spill] sm:$0xff] }
 0x819   :  { %6028 = vmatprep.subr.bf16.mxu0 %v9176_v52  ;;  %6060 = vmatprep.subr.bf16.mxu1 %v9177_v26  ;;  %v9201_v52 = vld [vmem:[#allocation53_spill] sm:$0xff]  ;;  %v9202_v26 = vld [vmem:[#allocation54_spill] sm:$0xff] }
 0x81b   :  { %3967 = vmatmul.mubr.f32.vlgmr.msra.gmra.mrb[14].mxu0 %v3589_v51  ;;  %4038 = vmatmul.mubr.f32.vlgmr.msra.gmra.mrb[14].mxu1 %v3589_v51  ;;  %v9186_v51 = vld [vmem:[#allocation38_spill] sm:$0xff] }
 0x81c   :  { %6030 = vmatpush1.bf16.msra.mxu0 %v9178_v59  ;;  %6062 = vmatpush1.bf16.msra.mxu1 %v9179_v35  ;;  %v9203_v59 = vld [vmem:[#allocation55_spill] sm:$0xff]  ;;  %v9204_v35 = vld [vmem:[#allocation56_spill] sm:$0xff] }
 0x81d   :  { %6032 = vmatprep.subr.bf16.mxu0 %v9180_v38  ;;  %6064 = vmatprep.subr.bf16.mxu1 %v9181_v42  ;;  %v9205_v38 = vld [vmem:[#allocation57_spill] sm:$0xff]  ;;  %v9206_v42 = vld [vmem:[#allocation58_spill] sm:$0xff] }
 0x81e   :  { %4132 = vmatprep.mubr.f32.mxu0 %v8788_v44  ;;  %4203 = vmatprep.mubr.f32.mxu1 %v8788_v44 }
 0x820   :  { %6034 = vmatpush1.bf16.msra.mxu0 %v9182_v47  ;;  %6066 = vmatpush1.bf16.msra.mxu1 %v9183_v61  ;;  %v9207_v47 = vld [vmem:[#allocation59_spill] sm:$0xff]  ;;  %v9208_v61 = vld [vmem:[#allocation60_spill] sm:$0xff] }
 0x821   :  { %6036 = vmatprep.subr.bf16.mxu0 %v9184_v11  ;;  %6068 = vmatprep.subr.bf16.mxu1 %v9185_v50  ;;  %v9209_v11 = vld [vmem:[#allocation61_spill] sm:$0xff] }
 0x824   :  { %6038 = vmatpush1.bf16.msra.mxu0 %v9186_v51  ;;  %6070 = vmatpush1.bf16.msra.mxu1 %v9187_v54  ;;  %v9210_v54 = vld [vmem:[#allocation92_spill] sm:$0xff] }
 0x825   :  { %6040 = vmatprep.subr.bf16.mxu0 %v9188_v2  ;;  %6072 = vmatprep.subr.bf16.mxu1 %v9189_v8 }
 0x828   :  { %6042 = vmatpush1.bf16.msra.mxu0 %v9190_v36  ;;  %6074 = vmatpush1.bf16.msra.mxu1 %v9191_v1 }
 0x829   :  { %6044 = vmatprep.subr.bf16.mxu0 %v9192_v55  ;;  %6076 = vmatprep.subr.bf16.mxu1 %v9193_v5 }
 0x82c   :  { %6046 = vmatpush1.bf16.msra.mxu0 %v9194_v58  ;;  %6078 = vmatpush1.bf16.msra.mxu1 %v9195_v31  ;;  %v9211_v58 = vld [vmem:[#allocation97_spill] sm:$0xff] }
 0x82d   :  { %6048 = vmatprep.subr.bf16.mxu0 %v9196_v57  ;;  %6080 = vmatprep.subr.bf16.mxu1 %v9197_v7 }
 0x830   :  { %6050 = vmatpush1.bf16.msra.mxu0 %v9198_v18  ;;  %6082 = vmatpush1.bf16.msra.mxu1 %v9199_v15 }
 0x831   :  { %6052 = vmatprep.subr.bf16.mxu0 %v9200_v0  ;;  %6084 = vmatprep.subr.bf16.mxu1 %v9201_v52 }
 0x834   :  { %6054 = vmatpush1.bf16.msra.mxu0 %v9202_v26  ;;  %6086 = vmatpush1.bf16.msra.mxu1 %v9203_v59 }
 0x835   :  { %6056 = vmatprep.subr.bf16.mxu0 %v9204_v35  ;;  %6088 = vmatprep.subr.bf16.mxu1 %v9205_v38 }
 0x838   :  { %6058 = vmatpush1.bf16.msra.mxu0 %v9206_v42  ;;  %6090 = vmatpush1.bf16.msra.mxu1 %v9207_v47 }
 0x839   :  { %6092 = vmatprep.subr.bf16.mxu0 %v9208_v61  ;;  %6124 = vmatprep.subr.bf16.mxu1 %v9209_v11 }
 0x8ce   :  { %v3798_v50 = vpop.f32.mrb[28].mxu0  ;;  %v3869_v51 = vpop.f32.mrb[28].mxu1 }
 0x8cf   :  { %v3874_v2 = vadd.f32 %v3798_v50, %v9210_v54  ;;  %v3800_v8 = vpop.f32.mrb[29].mxu0  ;;  %v3871_v36 = vpop.f32.mrb[29].mxu1  ;;  %v3876_v31 = vadd.f32 %v3869_v51, %v9211_v58 }
 0x8d0   :  { %v3875_v1 = vadd.f32 %v3800_v8, %v8908_v40  ;;  %v3877_v57 = vadd.f32 %v3871_v36, %v8971_v28 }
 0x8d1   :  { %v4537_v55 = vmul.f32 -1.442695, %v3874_v2  ;;  %v4539_v7 = vmul.f32 -1.442695, %v3876_v31 }
 0x8d2   :  { %v4538_v5 = vmul.f32 -1.442695, %v3875_v1 }
 0x8d3   :  { %6487 = vpow2.f32 %v4537_v55 }
 0x8d4   :  { %6489 = vpow2.f32 %v4538_v5 }
 0x8d5   :  { %6491 = vtanh.f32 %v3877_v57 }
 0x8d6   :  { %6493 = vpow2.f32 %v4539_v7 }
 0x8dd   :  { %v6488_v18 = vpop.eup %6487 }
 0x8de   :  { %v3887_v15 = vadd.f32 1.0, %v6488_v18  ;;  %v6490_v0 = vpop.eup %6489 }
 0x8df   :  { %v3888_v52 = vadd.f32 1.0, %v6490_v0  ;;  %v6492_v26 = vpop.eup %6491 }
 0x8e0   :  { %6495 = vrcp.f32 %v3887_v15  ;;  %v6494_v59 = vpop.eup %6493 }
 0x8e1   :  { %6497 = vrcp.f32 %v3888_v52  ;;  %v3889_v47 = vadd.f32 1.0, %v6494_v59  ;;  %v4395_v59 = vld [vmem:[%s8520_s7 + $0x78] sm:$0xff] }
 0x8e3   :  { %6499 = vrcp.f32 %v3889_v47 }
 0x8ea   :  { %v6496_v35 = vpop.eup %6495 }
 0x8eb   :  { %v3898_v38 = vmul.f32 %v6496_v35, %v6492_v26  ;;  %v6498_v42 = vpop.eup %6497  ;;  %v4394_v26 = vld [vmem:[%s8520_s7 + $0x70] sm:$0xff] }
 0x8ec   :  { %v3897_v61 = vmul.f32 %v6498_v42, %v8295_v32  ;;  %v6177_v35 = vpack.c.bf16 %v4395_v59, %v4394_v26 }
 0x8ed   :  { %v6500_v32 = vpop.eup %6499 }
 0x8ee   :  { %v3968_v11 = vpop.f32.mrb[14].mxu0  ;;  %v4039_v50 = vpop.f32.mrb[14].mxu1  ;;  %v8413_v51 = vadd.f32 %v3898_v38, %v3897_v61 }
 0x8ef   :  { %v6193_v2 = vadd.f32 %v3968_v11, %v8911_v12  ;;  %v3970_v8 = vpop.f32.mrb[15].mxu0  ;;  %v4041_v36 = vpop.f32.mrb[15].mxu1  ;;  %v6209_v31 = vadd.f32 %v4039_v50, %v8852_v16 }
 0x8f0   :  { %v6194_v1 = vadd.f32 %v3970_v8, %v8851_v3  ;;  %6501 = vtanh.f32 %v8413_v51  ;;  %v6210_v57 = vadd.f32 %v4041_v36, %v7608_v34 }
 0x8f1   :  { %v4540_v55 = vmul.f32 -1.442695, %v6193_v2  ;;  %v4542_v18 = vmul.f32 -1.442695, %v6209_v31 }
 0x8f2   :  { %v4541_v5 = vmul.f32 -1.442695, %v6194_v1 }
 0x8f3   :  { %6503 = vpow2.f32 %v4540_v55 }
 0x8f4   :  { %6505 = vpow2.f32 %v4541_v5 }
 0x8f5   :  { %6507 = vtanh.f32 %v6210_v57 }
 0x8f6   :  { %6509 = vpow2.f32 %v4542_v18 }
 0x8fa   :  { %v6502_v7 = vpop.eup %6501 }
 0x8fb   :  { %v3901_v15 = vmul.f32 %v6502_v7, %v6500_v32 }
 0x8fd   :  { %v6504_v12 = vpop.eup %6503  ;;  %4133 = vmatmul.mubr.f32.vlgmr.msra.gmra.mrb[30].mxu0 %v3901_v15  ;;  %4204 = vmatmul.mubr.f32.vlgmr.msra.gmra.mrb[30].mxu1 %v3901_v15 }
 0x8fe   :  { %v4053_v0 = vadd.f32 1.0, %v6504_v12  ;;  %v6506_v3 = vpop.eup %6505  ;;  %6094 = vmatpush1.bf16.msra.mxu0 %v8853_v53  ;;  %6126 = vmatpush1.bf16.msra.mxu1 %v8854_v30 }
 0x8ff   :  { %v4054_v52 = vadd.f32 1.0, %v6506_v3  ;;  %6096 = vmatprep.subr.bf16.mxu0 %v8912_v9  ;;  %6128 = vmatprep.subr.bf16.mxu1 %v8913_v33  ;;  %v6508_v34 = vpop.eup %6507 }
 0x900   :  { %6511 = vrcp.f32 %v4053_v0  ;;  %4274 = vmatprep.mubr.f32.mxu0 %v8788_v44  ;;  %4345 = vmatprep.mubr.f32.mxu1 %v8788_v44  ;;  %v6510_v16 = vpop.eup %6509 }
 0x901   :  { %6513 = vrcp.f32 %v4054_v52  ;;  %v4055_v33 = vadd.f32 1.0, %v6510_v16  ;;  %v4546_v52 = vld [vmem:[%s8521_s8] ss:$0 sm:$0xff] }
 0x902   :  { %6098 = vmatpush1.bf16.msra.mxu0 %v8914_v25  ;;  %6130 = vmatpush1.bf16.msra.mxu1 %v8915_v19 }
 0x903   :  { %6100 = vmatprep.subr.bf16.mxu0 %v8916_v14  ;;  %6132 = vmatprep.subr.bf16.mxu1 %v8972_v10  ;;  %6515 = vrcp.f32 %v4055_v33  ;;  %v4389_v10 = vld [vmem:[%s8520_s7 + $0x48] sm:$0xff] }
 0x906   :  { %6102 = vmatpush1.bf16.msra.mxu0 %v8973_v41  ;;  %6134 = vmatpush1.bf16.msra.mxu1 %v8974_v46  ;;  %v4390_v46 = vld [vmem:[%s8520_s7 + $0x50] sm:$0xff] }
 0x907   :  { %6104 = vmatprep.subr.bf16.mxu0 %v8975_v21  ;;  %6136 = vmatprep.subr.bf16.mxu1 %v8976_v24  ;;  %v4391_v21 = vld [vmem:[%s8520_s7 + $0x58] sm:$0xff] }
 0x908   :  { %v6171_v24 = vpack.c.bf16 %v4391_v21, %v4390_v46 }
 0x90a   :  { %v6512_v53 = vpop.eup %6511  ;;  %6106 = vmatpush1.bf16.msra.mxu0 %v8865_v22  ;;  %6138 = vmatpush1.bf16.msra.mxu1 %v8866_v60 }
 0x90b   :  { %v4064_v30 = vmul.f32 %v6512_v53, %v6508_v34  ;;  %v6514_v9 = vpop.eup %6513  ;;  %6108 = vmatprep.subr.bf16.mxu0 %v8977_v37  ;;  %6140 = vmatprep.subr.bf16.mxu1 %v8978_v6  ;;  %v4392_v37 = vld [vmem:[%s8520_s7 + $0x60] sm:$0xff]  ;;  %v4393_v6 = vld [vmem:[%s8520_s7 + $0x68] sm:$0xff] }
 0x90c   :  { %v4063_v25 = vmul.f32 %v6514_v9, %v8321_v49  ;;  %v6174_v49 = vpack.c.bf16 %v4393_v6, %v4392_v37 }
 0x90d   :  { %v6516_v22 = vpop.eup %6515 }
 0x90e   :  { %v4065_v19 = vadd.f32 %v4064_v30, %v4063_v25  ;;  %6110 = vmatpush1.bf16.msra.mxu0 %v8924_v13  ;;  %6142 = vmatpush1.bf16.msra.mxu1 %v8925_v43  ;;  %v4385_v13 = vld [vmem:[%s8520_s7 + $0x28] sm:$0xff] }
 0x90f   :  { %6112 = vmatprep.subr.bf16.mxu0 %v8926_v48  ;;  %6144 = vmatprep.subr.bf16.mxu1 %v8927_v23  ;;  %v4387_v48 = vld [vmem:[%s8520_s7 + $0x38] sm:$0xff] }
 0x910   :  { %6517 = vtanh.f32 %v4065_v19 }
 0x912   :  { %6114 = vmatpush1.bf16.msra.mxu0 %v8928_v45  ;;  %6146 = vmatpush1.bf16.msra.mxu1 %v8929_v62  ;;  %v4386_v62 = vld [vmem:[%s8520_s7 + $0x30] sm:$0xff]  ;;  %v4388_v45 = vld [vmem:[%s8520_s7 + $0x40] sm:$0xff] }
 0x913   :  { %6116 = vmatprep.subr.bf16.mxu0 %v8930_v20  ;;  %6148 = vmatprep.subr.bf16.mxu1 %v8876_v56  ;;  %v4380_v56 = vld [vmem:[%s8520_s7] sm:$0xff]  ;;  %v6165_v23 = vpack.c.bf16 %v4387_v48, %v4386_v62  ;;  %v6168_v41 = vpack.c.bf16 %v4389_v10, %v4388_v45 }
 0x914   :  { %v4384_v20 = vld [vmem:[%s8520_s7 + $0x20] sm:$0xff] }
 0x915   :  { %v6162_v43 = vpack.c.bf16 %v4385_v13, %v4384_v20 }
 0x916   :  { %6118 = vmatpush1.bf16.msra.mxu0 %v8877_v29  ;;  %6150 = vmatpush1.bf16.msra.mxu1 %v8878_v4  ;;  %v4381_v29 = vld [vmem:[%s8520_s7 + $0x8] sm:$0xff] }
 0x917   :  { %6120 = vmatprep.subr.bf16.mxu0 %v8879_v39  ;;  %6152 = vmatprep.subr.bf16.mxu1 %v8880_v17  ;;  %v6156_v4 = vpack.c.bf16 %v4381_v29, %v4380_v56  ;;  %v6537_v39 = vmov 0.0|0.0  }
 0x91a   :  { %v6518_v60 = vpop.eup %6517  ;;  %6122 = vmatpush1.bf16.msra.mxu0 %v8881_v63  ;;  %6154 = vmatpush1.bf16.msra.mxu1 %v8882_v27  ;;  %v4382_v27 = vld [vmem:[%s8520_s7 + $0x10] sm:$0xff]  ;;  %v4383_v63 = vld [vmem:[%s8520_s7 + $0x18] sm:$0xff] }
 0x91b   :  { %v4067_v14 = vmul.f32 %v6518_v60, %v6516_v22  ;;  %6155 = vmatprep.subr.bf16.mxu0 %v6537_v39  ;;  %v6159_v17 = vpack.c.bf16 %v4383_v63, %v4382_v27 }
 0x91d   :  { %4275 = vmatmul.mubr.f32.vlgmr.msra.gmra.mrb[30].mxu0 %v4067_v14  ;;  %4346 = vmatmul.mubr.f32.vlgmr.msra.gmra.mrb[30].mxu1 %v4067_v14 }
 0x91e   :  { %6157 = vmatpush3.bf16.msra.mxu0 %v6156_v4  ;;  %4596 = vmatprep.mubr.msk.f32.mxu0 %vm6538_vm4, %v8788_v44 }
 0x91f   :  { %6158 = vmatprep.subr.bf16.mxu0 %v6537_v39 }
 0x922   :  { %6160 = vmatpush3.bf16.msra.mxu0 %v6159_v17 }
 0x923   :  { %6161 = vmatprep.subr.bf16.mxu0 %v6537_v39 }
 0x926   :  { %6163 = vmatpush3.bf16.msra.mxu0 %v6162_v43 }
 0x927   :  { %6164 = vmatprep.subr.bf16.mxu0 %v6537_v39 }
 0x92a   :  { %6166 = vmatpush3.bf16.msra.mxu0 %v6165_v23 }
 0x92b   :  { %6167 = vmatprep.subr.bf16.mxu0 %v6537_v39 }
 0x92e   :  { %6169 = vmatpush3.bf16.msra.mxu0 %v6168_v41 }
 0x92f   :  { %6170 = vmatprep.subr.bf16.mxu0 %v6537_v39 }
 0x932   :  { %6172 = vmatpush3.bf16.msra.mxu0 %v6171_v24 }
 0x933   :  { %6173 = vmatprep.subr.bf16.mxu0 %v6537_v39 }
 0x936   :  { %6175 = vmatpush3.bf16.msra.mxu0 %v6174_v49 }
 0x937   :  { %6176 = vmatprep.subr.bf16.mxu0 %v6537_v39 }
 0x93a   :  { %6178 = vmatpush3.bf16.msra.mxu0 %v6177_v35 }
 0x9f0   :  { %v4276_v38 = vpop.f32.mrb[30].mxu0  ;;  %v4347_v42 = vpop.f32.mrb[30].mxu1 }
 0x9f1   :  { %v4352_v47 = vadd.f32 %v4276_v38, %v9210_v54  ;;  %v4278_v44 = vpop.f32.mrb[31].mxu0  ;;  %v4349_v61 = vpop.f32.mrb[31].mxu1  ;;  %v4354_v8 = vadd.f32 %v4347_v42, %v9211_v58 }
 0x9f2   :  { %v4353_v11 = vadd.f32 %v4278_v44, %v8908_v40  ;;  %v4355_v36 = vadd.f32 %v4349_v61, %v8971_v28 }
 0x9f3   :  { %v4543_v50 = vmul.f32 -1.442695, %v4352_v47  ;;  %v4545_v1 = vmul.f32 -1.442695, %v4354_v8 }
 0x9f4   :  { %v4544_v2 = vmul.f32 -1.442695, %v4353_v11 }
 0x9f5   :  { %6519 = vpow2.f32 %v4543_v50 }
 0x9f6   :  { %6521 = vpow2.f32 %v4544_v2 }
 0x9f7   :  { %6523 = vtanh.f32 %v4355_v36 }
 0x9f8   :  { %6525 = vpow2.f32 %v4545_v1 }
 0x9ff   :  { %v6520_v55 = vpop.eup %6519 }
 0xa00   :  { %v4365_v5 = vadd.f32 1.0, %v6520_v55  ;;  %v6522_v31 = vpop.eup %6521 }
 0xa01   :  { %v4366_v54 = vadd.f32 1.0, %v6522_v31  ;;  %v6524_v32 = vpop.eup %6523 }
 0xa02   :  { %6527 = vrcp.f32 %v4365_v5  ;;  %v6526_v57 = vpop.eup %6525 }
 0xa03   :  { %6529 = vrcp.f32 %v4366_v54  ;;  %v4367_v15 = vadd.f32 1.0, %v6526_v57 }
 0xa05   :  { %6531 = vrcp.f32 %v4367_v15 }
 0xa0c   :  { %v6528_v40 = vpop.eup %6527 }
 0xa0d   :  { %v4376_v7 = vmul.f32 %v6528_v40, %v6524_v32  ;;  %v6530_v18 = vpop.eup %6529 }
 0xa0e   :  { %v4375_v12 = vmul.f32 %v6530_v18, %v8413_v51 }
 0xa0f   :  { %v6532_v28 = vpop.eup %6531 }
 0xa10   :  { %v4377_v58 = vadd.f32 %v4376_v7, %v4375_v12 }
 0xa12   :  { %6533 = vtanh.f32 %v4377_v58 }
 0xa1c   :  { %v6534_v0 = vpop.eup %6533 }
 0xa1d   :  { %v4379_v3 = vmul.f32 %v6534_v0, %v6532_v28 }
 0xa1f   :  { %4597 = vmatmul.mubr.f32.vlgmr.msra.gmra.mrb[32].mxu0 %v4379_v3 }
 0xaf2   :  { %v4469_v34 = vpop.f32.mrb[32].mxu0 }
 0xaf3   :  { %v4470_v16 = vadd.f32 %v4546_v52, %v4469_v34  ;;  %v4598_v53 = vpop.f32.mrb[33].mxu0 }
 0xaf5   :  { %4473 = vst [vmem:[%s8522_s9] sm:$0xff] %v4470_v16 }

</bundles_post_ra>
